<compile_context>
chip_gen: v6e
topology: v6e:2x2x1
jax: 0.10.0
libtpu: 0.0.40
codegen_flags: <defaults>
</compile_context>

<pallas_src>
import functools
import math

import jax
import jax.numpy as jnp
import numpy as np
from jax.experimental import pallas as pl
from jax.experimental.pallas import tpu as pltpu


def _block_kernel(x_ref,
                  wqkv_ref, bqkv_ref,
                  wp_ref, bp_ref,
                  g1_ref, b1_ref, g2_ref, b2_ref,
                  wfc_ref, bfc_ref, wpr_ref, bpr_ref,
                  out_ref, attn_ref,
                  *, n_head):
    Bb, T, C = x_ref.shape            # one (Bb, T, C) slab per grid step
    H = n_head
    D = C // H
    M = Bb * T
    BH = Bb * H
    eps = 1e-5

    x = x_ref[...].reshape(M, C)      # fold batch into the M (sublane) dimension, f32

    def layernorm(z, g, b):
        mu = jnp.mean(z, axis=-1, keepdims=True)
        var = jnp.mean((z - mu) ** 2, axis=-1, keepdims=True)
        return (z - mu) * jax.lax.rsqrt(var + eps) * g + b

    # ---- attention branch: LN1 -> fused QKV -> causal softmax -> weighted sum -> proj
    xn = layernorm(x, g1_ref[...], b1_ref[...])

    # Single fused QKV matmul: bf16 operands, f32 accumulation on the MXU.
    qkv = jnp.dot(xn.astype(jnp.bfloat16), wqkv_ref[...],
                  preferred_element_type=jnp.float32) + bqkv_ref[...]

    def split_heads(z):               # (M, C) -> (Bb*H, T, D), bf16 MXU operand
        return (z.reshape(Bb, T, H, D)
                 .transpose(0, 2, 1, 3)
                 .reshape(BH, T, D)
                 .astype(jnp.bfloat16))

    q = split_heads(qkv[:, 0:C])
    k = split_heads(qkv[:, C:2 * C])
    v = split_heads(qkv[:, 2 * C:3 * C])

    scale = 1.0 / math.sqrt(D)
    row = jax.lax.broadcasted_iota(jnp.int32, (T, T), 0)
    col = jax.lax.broadcasted_iota(jnp.int32, (T, T), 1)
    causal = (row >= col)[None]       # (1, T, T) broadcasts over the Bb*H batch dim

    # att = q @ k^T * scale, batched over all (batch, head) pairs in one einsum.
    att = jnp.einsum('bqd,bkd->bqk', q, k,
                     preferred_element_type=jnp.float32) * scale    # (Bb*H, T, T) f32
    att = jnp.where(causal, att, -jnp.inf)
    att = att - jnp.max(att, axis=-1, keepdims=True)
    p = jnp.exp(att)
    # Exact reciprocal: the probabilities are a user-visible output (attn_save).
    att = p * (1.0 / jnp.sum(p, axis=-1, keepdims=True))

    # One lane-dense, full-block store of all heads' attention weights.
    attn_ref[...] = att.reshape(Bb, H, T, T)

    y = jnp.einsum('bqk,bkd->bqd', att.astype(jnp.bfloat16), v,
                   preferred_element_type=jnp.float32)              # (Bb*H, T, D)
    y = y.reshape(Bb, H, T, D).transpose(0, 2, 1, 3).reshape(M, C)  # back to (M, C)

    y = jnp.dot(y.astype(jnp.bfloat16), wp_ref[...],
                preferred_element_type=jnp.float32) + bp_ref[...]
    x1 = x + y                        # first residual

    # ---- MLP branch: LN2 -> fc (4C) -> exact GELU (matches nn.GELU) -> proj (C)
    xn2 = layernorm(x1, g2_ref[...], b2_ref[...])
    h1 = jnp.dot(xn2.astype(jnp.bfloat16), wfc_ref[...],
                 preferred_element_type=jnp.float32) + bfc_ref[...]
    h1 = 0.5 * h1 * (1.0 + jax.lax.erf(h1 * (1.0 / math.sqrt(2.0))))
    h2 = jnp.dot(h1.astype(jnp.bfloat16), wpr_ref[...],
                 preferred_element_type=jnp.float32) + bpr_ref[...]

    out_ref[...] = (x1 + h2).reshape(Bb, T, C)    # second residual


def prepare_params(params, dtype=jnp.bfloat16):
    """One-time layout prep (at parameter-load time, not per call): transpose torch
    Linear weights (y = x @ W^T + b), fuse q/k/v into a single (C, 3C) weight /
    (1, 3C) bias, and cast matmul weights to bf16."""
    def wt(name):
        return jnp.asarray(params[name], jnp.float32).T.astype(dtype)

    def b2d(name):
        return jnp.asarray(params[name], jnp.float32).reshape(1, -1)

    wqkv = jnp.concatenate([wt("wq"), wt("wk"), wt("wv")], axis=1)       # (C, 3C) bf16
    bqkv = jnp.concatenate([b2d("bq"), b2d("bk"), b2d("bv")], axis=1)    # (1, 3C) f32
    return dict(
        wqkv=wqkv, bqkv=bqkv,
        wp=wt("wp"), bp=b2d("bp"),
        g1=b2d("g1"), beta1=b2d("beta1"), g2=b2d("g2"), beta2=b2d("beta2"),
        wfc=wt("wfc"), bfc=b2d("bfc"), wpr=wt("wpr"), bpr=b2d("bpr"),
    )


def _tpu_info():
    """Returns (vmem_capacity_bytes, tensorcores_per_chip, mxu_m)."""
    kind = ""
    try:
        kind = jax.devices()[0].device_kind.lower()
    except Exception:
        pass
    is_v7 = ("v7" in kind) or ("tpu7" in kind)
    is_v6 = "v6" in kind
    vmem_bytes = (64 if is_v7 else 128) * 1024 * 1024
    try:
        vmem_bytes = int(pltpu.get_tpu_info().vmem_capacity_bytes)
    except Exception:
        pass
    num_tc = 2 if is_v7 else 1            # only v7x has 2 TensorCores per chip
    mxu_m = 256 if (is_v6 or is_v7) else 128
    return vmem_bytes, num_tc, mxu_m


def block_forward(x, prep, *, n_head, batch_block=None):
    """x: (B, T, C) float32. prep: output of prepare_params.
    Returns (out (B, T, C) f32, attn (B, H, T, T) f32)."""
    B, T, C = x.shape
    H = n_head

    weight_args = (
        prep["wqkv"], prep["bqkv"],
        prep["wp"], prep["bp"],
        prep["g1"], prep["beta1"], prep["g2"], prep["beta2"],
        prep["wfc"], prep["bfc"], prep["wpr"], prep["bpr"],
    )
    weight_bytes = sum(int(np.prod(a.shape)) * a.dtype.itemsize for a in weight_args)

    vmem_bytes, num_tc, mxu_m = _tpu_info()
    # ~80% of physical VMEM (≈51 MiB on v7x, ≈102 MiB on v5e/v6e) leaves headroom
    # for compiler internal scratch / pipeline buffers.
    vmem_limit = max(32 * 1024 * 1024, min(int(vmem_bytes * 0.8), 112 * 1024 * 1024))

    if batch_block is None:
        # Fill the MXU M dimension: target Bb*T ≈ 2 MXU tiles of rows
        # (512 on v6e/v7x 256x256 MXU, 256 on v5e 128x128 MXU), capped by VMEM.
        target_m = 2 * mxu_m
        bb = max(1, min(B, max(1, target_m // max(T, 1))))

        # Only on v7x (2 TCs, parallel grid axis) keep >= num_tc grid steps.
        if num_tc > 1:
            while bb > 1 and pl.cdiv(B, bb) < num_tc:
                bb -= 1

        def vmem_estimate(n):
            m = n * T
            io = m * C * 4 * 2 + n * H * T * T * 4          # x in + out + attn out (per buffer)
            interm = (m * 7 * C * 4                          # qkv (3C) + h1 (4C) f32
                      + 2 * n * H * T * T * 4                # att logits + probs f32
                      + 3 * m * C * 2)                       # bf16 operand copies
            return 2 * io + 2 * weight_bytes + interm        # double-buffered IO + weights

        while bb > 1 and vmem_estimate(bb) > vmem_limit:
            bb -= 1
        while B % bb != 0:                                   # grid must tile B exactly
            bb -= 1
        batch_block = bb

    out_shape = (
        jax.ShapeDtypeStruct((B, T, C), jnp.float32),
        jax.ShapeDtypeStruct((B, H, T, T), jnp.float32),
    )
    kernel = functools.partial(_block_kernel, n_head=n_head)

    def build(single_buffer_weights):
        def weight_spec(a):
            nd = a.ndim
            idx = lambda i, _nd=nd: (0,) * _nd
            if single_buffer_weights:
                # Weight blocks never change across the grid: single-buffer them to
                # halve their VMEM footprint (matters most on v7x's 64 MiB VMEM).
                return pl.BlockSpec(a.shape, idx, pipeline_mode=pl.Buffered(1))
            return pl.BlockSpec(a.shape, idx)

        in_specs = [pl.BlockSpec((batch_block, T, C), lambda i: (i, 0, 0))]
        in_specs += [weight_spec(a) for a in weight_args]
        out_specs = (
            pl.BlockSpec((batch_block, T, C), lambda i: (i, 0, 0)),
            pl.BlockSpec((batch_block, H, T, T), lambda i: (i, 0, 0, 0)),
        )
        return pl.pallas_call(
            kernel,
            out_shape=out_shape,
            grid=(B // batch_block,),
            in_specs=in_specs,
            out_specs=out_specs,
            compiler_params=pltpu.CompilerParams(
                dimension_semantics=("parallel",),
                vmem_limit_bytes=vmem_limit),
        )

    if hasattr(pl, "Buffered"):
        try:
            return build(True)(x, *weight_args)
        except Exception:
            pass  # single-buffered weight specs unsupported in this build; fall back
    return build(False)(x, *weight_args)


# ---------------------- pure-JAX reference (mirrors the PyTorch forward) ---------------
def block_reference(x, params, *, n_head):
    B, T, C = x.shape
    D = C // n_head

    def ln(z, g, b):
        mu = z.mean(-1, keepdims=True)
        var = ((z - mu) ** 2).mean(-1, keepdims=True)
        return (z - mu) / jnp.sqrt(var + 1e-5) * g + b

    def lin(z, w, b):
        return z @ w.T + b

    xn = ln(x, params["g1"], params["beta1"])
    q = lin(xn, params["wq"], params["bq"]).reshape(B, T, n_head, D).transpose(0, 2, 1, 3)
    k = lin(xn, params["wk"], params["bk"]).reshape(B, T, n_head, D).transpose(0, 2, 1, 3)
    v = lin(xn, params["wv"], params["bv"]).reshape(B, T, n_head, D).transpose(0, 2, 1, 3)
    att = jnp.einsum("bhtd,bhsd->bhts", q, k) / math.sqrt(D)
    mask = jnp.tril(jnp.ones((T, T)))[None, None]
    att = jnp.where(mask == 0, -jnp.inf, att)
    att = jax.nn.softmax(att, axis=-1)
    y = jnp.einsum("bhts,bhsd->bhtd", att, v).transpose(0, 2, 1, 3).reshape(B, T, C)
    y = lin(y, params["wp"], params["bp"])
    x1 = x + y
    h = lin(ln(x1, params["g2"], params["beta2"]), params["wfc"], params["bfc"])
    h = 0.5 * h * (1.0 + jax.lax.erf(h / math.sqrt(2.0)))
    h = lin(h, params["wpr"], params["bpr"])
    return x1 + h, att


if __name__ == "__main__":
    # Small shapes implied by the module: nembd=32, nhead=4, seq_len=8, scaf_len=4.
    B, T, C, H = 2, 8, 32, 4

    key = jax.random.PRNGKey(0)
    keys = jax.random.split(key, 16)
    std = 0.02
    params = {
        "wq": std * jax.random.normal(keys[0], (C, C), jnp.float32),
        "bq": std * jax.random.normal(keys[1], (C,), jnp.float32),
        "wk": std * jax.random.normal(keys[2], (C, C), jnp.float32),
        "bk": std * jax.random.normal(keys[3], (C,), jnp.float32),
        "wv": std * jax.random.normal(keys[4], (C, C), jnp.float32),
        "bv": std * jax.random.normal(keys[5], (C,), jnp.float32),
        "wp": std * jax.random.normal(keys[6], (C, C), jnp.float32),
        "bp": std * jax.random.normal(keys[7], (C,), jnp.float32),
        "g1": jnp.ones((C,), jnp.float32),
        "beta1": std * jax.random.normal(keys[8], (C,), jnp.float32),
        "g2": jnp.ones((C,), jnp.float32),
        "beta2": std * jax.random.normal(keys[9], (C,), jnp.float32),
        "wfc": std * jax.random.normal(keys[10], (4 * C, C), jnp.float32),
        "bfc": std * jax.random.normal(keys[11], (4 * C,), jnp.float32),
        "wpr": std * jax.random.normal(keys[12], (C, 4 * C), jnp.float32),
        "bpr": std * jax.random.normal(keys[13], (C,), jnp.float32),
    }
    x = jax.random.normal(keys[14], (B, T, C), jnp.float32)

    prep = prepare_params(params)     # one-time layout / fusion / bf16 prep
    out, attn = block_forward(x, prep, n_head=H)
    jax.block_until_ready((out, attn))

    ref_out, ref_attn = block_reference(x, params, n_head=H)
    # bf16 MXU operands (f32 accumulation) -> loosened tolerance vs. the f32 reference;
    # the softmax normalization itself is exact.
    np.testing.assert_allclose(np.asarray(out), np.asarray(ref_out), rtol=2e-2, atol=2e-2)
    np.testing.assert_allclose(np.asarray(attn), np.asarray(ref_attn), rtol=2e-2, atol=2e-2)

    print("KERNEL_OK")
</pallas_src>

<mosaic_0001>
module attributes {stable_mosaic.version = 11 : i64} {
  func.func @_block_kernel(%arg0: i32, %arg1: memref<2x8x32xf32, #tpu.memory_space<vmem>>, %arg2: memref<32x96xbf16, #tpu.memory_space<vmem>>, %arg3: memref<1x96xf32, #tpu.memory_space<vmem>>, %arg4: memref<32x32xbf16, #tpu.memory_space<vmem>>, %arg5: memref<1x32xf32, #tpu.memory_space<vmem>>, %arg6: memref<1x32xf32, #tpu.memory_space<vmem>>, %arg7: memref<1x32xf32, #tpu.memory_space<vmem>>, %arg8: memref<1x32xf32, #tpu.memory_space<vmem>>, %arg9: memref<1x32xf32, #tpu.memory_space<vmem>>, %arg10: memref<32x128xbf16, #tpu.memory_space<vmem>>, %arg11: memref<1x128xf32, #tpu.memory_space<vmem>>, %arg12: memref<128x32xbf16, #tpu.memory_space<vmem>>, %arg13: memref<1x32xf32, #tpu.memory_space<vmem>>, %arg14: memref<2x8x32xf32, #tpu.memory_space<vmem>>, %arg15: memref<2x4x8x8xf32, #tpu.memory_space<vmem>>) attributes {dimension_semantics = [#tpu.dimension_semantics<parallel>], iteration_bounds = array<i64: 1>, scalar_prefetch = 0 : i64, scratch_operands = 0 : i64, tpu.core_type = #tpu.core_type<tc>, window_params = [{transform_indices = @transform_0, window_bounds = array<i64: 2, 8, 32>}, {pipeline_mode = #tpu.pipeline_mode<synchronous>, transform_indices = @transform_1, window_bounds = array<i64: 32, 96>}, {pipeline_mode = #tpu.pipeline_mode<synchronous>, transform_indices = @transform_2, window_bounds = array<i64: 1, 96>}, {pipeline_mode = #tpu.pipeline_mode<synchronous>, transform_indices = @transform_3, window_bounds = array<i64: 32, 32>}, {pipeline_mode = #tpu.pipeline_mode<synchronous>, transform_indices = @transform_4, window_bounds = array<i64: 1, 32>}, {pipeline_mode = #tpu.pipeline_mode<synchronous>, transform_indices = @transform_5, window_bounds = array<i64: 1, 32>}, {pipeline_mode = #tpu.pipeline_mode<synchronous>, transform_indices = @transform_6, window_bounds = array<i64: 1, 32>}, {pipeline_mode = #tpu.pipeline_mode<synchronous>, transform_indices = @transform_7, window_bounds = array<i64: 1, 32>}, {pipeline_mode = #tpu.pipeline_mode<synchronous>, transform_indices = @transform_8, window_bounds = array<i64: 1, 32>}, {pipeline_mode = #tpu.pipeline_mode<synchronous>, transform_indices = @transform_9, window_bounds = array<i64: 32, 128>}, {pipeline_mode = #tpu.pipeline_mode<synchronous>, transform_indices = @transform_10, window_bounds = array<i64: 1, 128>}, {pipeline_mode = #tpu.pipeline_mode<synchronous>, transform_indices = @transform_11, window_bounds = array<i64: 128, 32>}, {pipeline_mode = #tpu.pipeline_mode<synchronous>, transform_indices = @transform_12, window_bounds = array<i64: 1, 32>}, {transform_indices = @transform_13, window_bounds = array<i64: 2, 8, 32>}, {transform_indices = @transform_14, window_bounds = array<i64: 2, 4, 8, 8>}]} {
    %c0 = arith.constant 0 : index
    %c0_0 = arith.constant 0 : index
    %c0_1 = arith.constant 0 : index
    %0 = vector.load %arg1[%c0, %c0_0, %c0_1] : memref<2x8x32xf32, #tpu.memory_space<vmem>>, vector<2x8x32xf32>
    %1 = vector.shape_cast %0 : vector<2x8x32xf32> to vector<16x32xf32>
    %c0_2 = arith.constant 0 : index
    %c0_3 = arith.constant 0 : index
    %2 = vector.load %arg6[%c0_2, %c0_3] : memref<1x32xf32, #tpu.memory_space<vmem>>, vector<1x32xf32>
    %c0_4 = arith.constant 0 : index
    %c0_5 = arith.constant 0 : index
    %3 = vector.load %arg7[%c0_4, %c0_5] : memref<1x32xf32, #tpu.memory_space<vmem>>, vector<1x32xf32>
    %cst = arith.constant dense<0.000000e+00> : vector<16xf32>
    %4 = vector.multi_reduction <add>, %1, %cst [1] : vector<16x32xf32> to vector<16xf32>
    %5 = vector.shape_cast %4 : vector<16xf32> to vector<16x1xf32>
    %cst_6 = arith.constant 3.200000e+01 : f32
    %6 = vector.broadcast %cst_6 : f32 to vector<16x1xf32>
    %7 = arith.divf %5, %6 : vector<16x1xf32>
    %8 = vector.broadcast %7 : vector<16x1xf32> to vector<16x32xf32>
    %9 = arith.subf %1, %8 : vector<16x32xf32>
    %10 = arith.mulf %9, %9 : vector<16x32xf32>
    %cst_7 = arith.constant dense<0.000000e+00> : vector<16xf32>
    %11 = vector.multi_reduction <add>, %10, %cst_7 [1] : vector<16x32xf32> to vector<16xf32>
    %12 = vector.shape_cast %11 : vector<16xf32> to vector<16x1xf32>
    %cst_8 = arith.constant 3.200000e+01 : f32
    %13 = vector.broadcast %cst_8 : f32 to vector<16x1xf32>
    %14 = arith.divf %12, %13 : vector<16x1xf32>
    %15 = vector.broadcast %7 : vector<16x1xf32> to vector<16x32xf32>
    %16 = arith.subf %1, %15 : vector<16x32xf32>
    %cst_9 = arith.constant 9.99999974E-6 : f32
    %17 = vector.broadcast %cst_9 : f32 to vector<16x1xf32>
    %18 = arith.addf %14, %17 : vector<16x1xf32>
    %19 = math.rsqrt %18 : vector<16x1xf32>
    %20 = vector.broadcast %19 : vector<16x1xf32> to vector<16x32xf32>
    %21 = arith.mulf %16, %20 : vector<16x32xf32>
    %22 = vector.broadcast %2 : vector<1x32xf32> to vector<16x32xf32>
    %23 = arith.mulf %21, %22 : vector<16x32xf32>
    %24 = vector.broadcast %3 : vector<1x32xf32> to vector<16x32xf32>
    %25 = arith.addf %23, %24 : vector<16x32xf32>
    %26 = arith.truncf %25 : vector<16x32xf32> to vector<16x32xbf16>
    %c0_10 = arith.constant 0 : index
    %c0_11 = arith.constant 0 : index
    %27 = vector.load %arg2[%c0_10, %c0_11] : memref<32x96xbf16, #tpu.memory_space<vmem>>, vector<32x96xbf16>
    %cst_12 = arith.constant dense<0.000000e+00> : vector<16x96xf32>
    %28 = tpu.matmul %26, %27, %cst_12 {dimension_numbers = #tpu.dot_dimension_numbers<[1], [0], [0], [1], [0, 0, 1, 1], [], []>} : vector<16x32xbf16>, vector<32x96xbf16>, vector<16x96xf32> -> vector<16x96xf32>
    %c0_13 = arith.constant 0 : index
    %c0_14 = arith.constant 0 : index
    %29 = vector.load %arg3[%c0_13, %c0_14] : memref<1x96xf32, #tpu.memory_space<vmem>>, vector<1x96xf32>
    %30 = vector.broadcast %29 : vector<1x96xf32> to vector<16x96xf32>
    %31 = arith.addf %28, %30 : vector<16x96xf32>
    %32 = vector.extract_strided_slice %31 {offsets = [0, 0], sizes = [16, 32], strides = [1, 1]} : vector<16x96xf32> to vector<16x32xf32>
    %33 = vector.shape_cast %32 : vector<16x32xf32> to vector<2x8x4x8xf32>
    %34 = tpu.transpose %33, [0, 2, 1, 3] : vector<2x8x4x8xf32> -> vector<2x4x8x8xf32>
    %35 = vector.shape_cast %34 : vector<2x4x8x8xf32> to vector<8x8x8xf32>
    %36 = arith.truncf %35 : vector<8x8x8xf32> to vector<8x8x8xbf16>
    %37 = vector.extract_strided_slice %31 {offsets = [0, 32], sizes = [16, 32], strides = [1, 1]} : vector<16x96xf32> to vector<16x32xf32>
    %38 = vector.shape_cast %37 : vector<16x32xf32> to vector<2x8x4x8xf32>
    %39 = tpu.transpose %38, [0, 2, 1, 3] : vector<2x8x4x8xf32> -> vector<2x4x8x8xf32>
    %40 = vector.shape_cast %39 : vector<2x4x8x8xf32> to vector<8x8x8xf32>
    %41 = arith.truncf %40 : vector<8x8x8xf32> to vector<8x8x8xbf16>
    %42 = vector.extract_strided_slice %31 {offsets = [0, 64], sizes = [16, 32], strides = [1, 1]} : vector<16x96xf32> to vector<16x32xf32>
    %43 = vector.shape_cast %42 : vector<16x32xf32> to vector<2x8x4x8xf32>
    %44 = tpu.transpose %43, [0, 2, 1, 3] : vector<2x8x4x8xf32> -> vector<2x4x8x8xf32>
    %45 = vector.shape_cast %44 : vector<2x4x8x8xf32> to vector<8x8x8xf32>
    %46 = arith.truncf %45 : vector<8x8x8xf32> to vector<8x8x8xbf16>
    %47 = tpu.iota {dimensions = array<i32: 0>} : vector<8x8xi32>
    %48 = tpu.iota {dimensions = array<i32: 1>} : vector<8x8xi32>
    %49 = arith.cmpi sge, %47, %48 : vector<8x8xi32>
    %50 = vector.shape_cast %49 : vector<8x8xi1> to vector<1x8x8xi1>
    "tpu.trace_start"() <{level = 10 : i32, message = "bqd,bkd->bqk"}> : () -> ()
    %cst_15 = arith.constant dense<0.000000e+00> : vector<8x8x8xf32>
    %51 = tpu.matmul %36, %41, %cst_15 {dimension_numbers = #tpu.dot_dimension_numbers<[2], [2], [1], [1], [0, 0, 0, 1, 1, 1], [0], [0]>} : vector<8x8x8xbf16>, vector<8x8x8xbf16>, vector<8x8x8xf32> -> vector<8x8x8xf32>
    "tpu.trace_stop"() : () -> ()
    %cst_16 = arith.constant 0.353553385 : f32
    %52 = vector.broadcast %cst_16 : f32 to vector<8x8x8xf32>
    %53 = arith.mulf %51, %52 : vector<8x8x8xf32>
    %cst_17 = arith.constant 0xFF800000 : f32
    %54 = vector.shape_cast %50 : vector<1x8x8xi1> to vector<1x8x8xi1>
    %55 = vector.broadcast %54 : vector<1x8x8xi1> to vector<8x8x8xi1>
    %56 = vector.broadcast %cst_17 : f32 to vector<8x8x8xf32>
    %57 = arith.select %55, %53, %56 : vector<8x8x8xi1>, vector<8x8x8xf32>
    %cst_18 = arith.constant dense<0xFF800000> : vector<8x8xf32>
    %58 = vector.multi_reduction <maximumf>, %57, %cst_18 [2] : vector<8x8x8xf32> to vector<8x8xf32>
    %59 = vector.shape_cast %58 : vector<8x8xf32> to vector<8x8x1xf32>
    %60 = vector.broadcast %59 : vector<8x8x1xf32> to vector<8x8x8xf32>
    %61 = arith.subf %57, %60 : vector<8x8x8xf32>
    %62 = math.exp %61 : vector<8x8x8xf32>
    %cst_19 = arith.constant dense<0.000000e+00> : vector<8x8xf32>
    %63 = vector.multi_reduction <add>, %62, %cst_19 [2] : vector<8x8x8xf32> to vector<8x8xf32>
    %64 = vector.shape_cast %63 : vector<8x8xf32> to vector<8x8x1xf32>
    %cst_20 = arith.constant 1.000000e+00 : f32
    %65 = vector.broadcast %cst_20 : f32 to vector<8x8x1xf32>
    %66 = arith.divf %65, %64 : vector<8x8x1xf32>
    %67 = vector.broadcast %66 : vector<8x8x1xf32> to vector<8x8x8xf32>
    %68 = arith.mulf %62, %67 : vector<8x8x8xf32>
    %69 = vector.shape_cast %68 : vector<8x8x8xf32> to vector<2x4x8x8xf32>
    %c0_21 = arith.constant 0 : index
    %c0_22 = arith.constant 0 : index
    %c0_23 = arith.constant 0 : index
    %c0_24 = arith.constant 0 : index
    %70 = vector.load %arg15[%c0_21, %c0_22, %c0_23, %c0_24] : memref<2x4x8x8xf32, #tpu.memory_space<vmem>>, vector<2x4x8x8xf32>
    tpu.vector_store %arg15[%c0_21, %c0_22, %c0_23, %c0_24], %69 {strides = array<i32>} : memref<2x4x8x8xf32, #tpu.memory_space<vmem>>, vector<2x4x8x8xf32>,
    %71 = arith.truncf %68 : vector<8x8x8xf32> to vector<8x8x8xbf16>
    "tpu.trace_start"() <{level = 10 : i32, message = "bqk,bkd->bqd"}> : () -> ()
    %cst_25 = arith.constant dense<0.000000e+00> : vector<8x8x8xf32>
    %72 = tpu.matmul %71, %46, %cst_25 {dimension_numbers = #tpu.dot_dimension_numbers<[2], [1], [1], [2], [0, 0, 0, 1, 1, 2], [0], [0]>} : vector<8x8x8xbf16>, vector<8x8x8xbf16>, vector<8x8x8xf32> -> vector<8x8x8xf32>
    "tpu.trace_stop"() : () -> ()
    %73 = vector.shape_cast %72 : vector<8x8x8xf32> to vector<2x4x8x8xf32>
    %74 = tpu.transpose %73, [0, 2, 1, 3] : vector<2x4x8x8xf32> -> vector<2x8x4x8xf32>
    %75 = vector.shape_cast %74 : vector<2x8x4x8xf32> to vector<16x32xf32>
    %76 = arith.truncf %75 : vector<16x32xf32> to vector<16x32xbf16>
    %c0_26 = arith.constant 0 : index
    %c0_27 = arith.constant 0 : index
    %77 = vector.load %arg4[%c0_26, %c0_27] : memref<32x32xbf16, #tpu.memory_space<vmem>>, vector<32x32xbf16>
    %cst_28 = arith.constant dense<0.000000e+00> : vector<16x32xf32>
    %78 = tpu.matmul %76, %77, %cst_28 {dimension_numbers = #tpu.dot_dimension_numbers<[1], [0], [0], [1], [0, 0, 1, 1], [], []>} : vector<16x32xbf16>, vector<32x32xbf16>, vector<16x32xf32> -> vector<16x32xf32>
    %c0_29 = arith.constant 0 : index
    %c0_30 = arith.constant 0 : index
    %79 = vector.load %arg5[%c0_29, %c0_30] : memref<1x32xf32, #tpu.memory_space<vmem>>, vector<1x32xf32>
    %80 = vector.broadcast %79 : vector<1x32xf32> to vector<16x32xf32>
    %81 = arith.addf %78, %80 : vector<16x32xf32>
    %82 = arith.addf %1, %81 : vector<16x32xf32>
    %c0_31 = arith.constant 0 : index
    %c0_32 = arith.constant 0 : index
    %83 = vector.load %arg8[%c0_31, %c0_32] : memref<1x32xf32, #tpu.memory_space<vmem>>, vector<1x32xf32>
    %c0_33 = arith.constant 0 : index
    %c0_34 = arith.constant 0 : index
    %84 = vector.load %arg9[%c0_33, %c0_34] : memref<1x32xf32, #tpu.memory_space<vmem>>, vector<1x32xf32>
    %cst_35 = arith.constant dense<0.000000e+00> : vector<16xf32>
    %85 = vector.multi_reduction <add>, %82, %cst_35 [1] : vector<16x32xf32> to vector<16xf32>
    %86 = vector.shape_cast %85 : vector<16xf32> to vector<16x1xf32>
    %cst_36 = arith.constant 3.200000e+01 : f32
    %87 = vector.broadcast %cst_36 : f32 to vector<16x1xf32>
    %88 = arith.divf %86, %87 : vector<16x1xf32>
    %89 = vector.broadcast %88 : vector<16x1xf32> to vector<16x32xf32>
    %90 = arith.subf %82, %89 : vector<16x32xf32>
    %91 = arith.mulf %90, %90 : vector<16x32xf32>
    %cst_37 = arith.constant dense<0.000000e+00> : vector<16xf32>
    %92 = vector.multi_reduction <add>, %91, %cst_37 [1] : vector<16x32xf32> to vector<16xf32>
    %93 = vector.shape_cast %92 : vector<16xf32> to vector<16x1xf32>
    %cst_38 = arith.constant 3.200000e+01 : f32
    %94 = vector.broadcast %cst_38 : f32 to vector<16x1xf32>
    %95 = arith.divf %93, %94 : vector<16x1xf32>
    %96 = vector.broadcast %88 : vector<16x1xf32> to vector<16x32xf32>
    %97 = arith.subf %82, %96 : vector<16x32xf32>
    %cst_39 = arith.constant 9.99999974E-6 : f32
    %98 = vector.broadcast %cst_39 : f32 to vector<16x1xf32>
    %99 = arith.addf %95, %98 : vector<16x1xf32>
    %100 = math.rsqrt %99 : vector<16x1xf32>
    %101 = vector.broadcast %100 : vector<16x1xf32> to vector<16x32xf32>
    %102 = arith.mulf %97, %101 : vector<16x32xf32>
    %103 = vector.broadcast %83 : vector<1x32xf32> to vector<16x32xf32>
    %104 = arith.mulf %102, %103 : vector<16x32xf32>
    %105 = vector.broadcast %84 : vector<1x32xf32> to vector<16x32xf32>
    %106 = arith.addf %104, %105 : vector<16x32xf32>
    %107 = arith.truncf %106 : vector<16x32xf32> to vector<16x32xbf16>
    %c0_40 = arith.constant 0 : index
    %c0_41 = arith.constant 0 : index
    %108 = vector.load %arg10[%c0_40, %c0_41] : memref<32x128xbf16, #tpu.memory_space<vmem>>, vector<32x128xbf16>
    %cst_42 = arith.constant dense<0.000000e+00> : vector<16x128xf32>
    %109 = tpu.matmul %107, %108, %cst_42 {dimension_numbers = #tpu.dot_dimension_numbers<[1], [0], [0], [1], [0, 0, 1, 1], [], []>} : vector<16x32xbf16>, vector<32x128xbf16>, vector<16x128xf32> -> vector<16x128xf32>
    %c0_43 = arith.constant 0 : index
    %c0_44 = arith.constant 0 : index
    %110 = vector.load %arg11[%c0_43, %c0_44] : memref<1x128xf32, #tpu.memory_space<vmem>>, vector<1x128xf32>
    %111 = vector.broadcast %110 : vector<1x128xf32> to vector<16x128xf32>
    %112 = arith.addf %109, %111 : vector<16x128xf32>
    %cst_45 = arith.constant 5.000000e-01 : f32
    %113 = vector.broadcast %cst_45 : f32 to vector<16x128xf32>
    %114 = arith.mulf %113, %112 : vector<16x128xf32>
    %cst_46 = arith.constant 0.707106769 : f32
    %115 = vector.broadcast %cst_46 : f32 to vector<16x128xf32>
    %116 = arith.mulf %112, %115 : vector<16x128xf32>
    %117 = math.erf %116 : vector<16x128xf32>
    %cst_47 = arith.constant 1.000000e+00 : f32
    %118 = vector.broadcast %cst_47 : f32 to vector<16x128xf32>
    %119 = arith.addf %118, %117 : vector<16x128xf32>
    %120 = arith.mulf %114, %119 : vector<16x128xf32>
    %121 = arith.truncf %120 : vector<16x128xf32> to vector<16x128xbf16>
    %c0_48 = arith.constant 0 : index
    %c0_49 = arith.constant 0 : index
    %122 = vector.load %arg12[%c0_48, %c0_49] : memref<128x32xbf16, #tpu.memory_space<vmem>>, vector<128x32xbf16>
    %cst_50 = arith.constant dense<0.000000e+00> : vector<16x32xf32>
    %123 = tpu.matmul %121, %122, %cst_50 {dimension_numbers = #tpu.dot_dimension_numbers<[1], [0], [0], [1], [0, 0, 1, 1], [], []>} : vector<16x128xbf16>, vector<128x32xbf16>, vector<16x32xf32> -> vector<16x32xf32>
    %c0_51 = arith.constant 0 : index
    %c0_52 = arith.constant 0 : index
    %124 = vector.load %arg13[%c0_51, %c0_52] : memref<1x32xf32, #tpu.memory_space<vmem>>, vector<1x32xf32>
    %125 = vector.broadcast %124 : vector<1x32xf32> to vector<16x32xf32>
    %126 = arith.addf %123, %125 : vector<16x32xf32>
    %127 = arith.addf %82, %126 : vector<16x32xf32>
    %128 = vector.shape_cast %127 : vector<16x32xf32> to vector<2x8x32xf32>
    %c0_53 = arith.constant 0 : index
    %c0_54 = arith.constant 0 : index
    %c0_55 = arith.constant 0 : index
    %129 = vector.load %arg14[%c0_53, %c0_54, %c0_55] : memref<2x8x32xf32, #tpu.memory_space<vmem>>, vector<2x8x32xf32>
    tpu.vector_store %arg14[%c0_53, %c0_54, %c0_55], %128 {strides = array<i32>} : memref<2x8x32xf32, #tpu.memory_space<vmem>>, vector<2x8x32xf32>,
    return
  }
  func.func @transform_0(%arg0: i32) -> (i32, i32, i32) {
    %c0_i32 = arith.constant 0 : i32
    %c0_i32_0 = arith.constant 0 : i32
    %c0_i32_1 = arith.constant 0 : i32
    return %arg0, %c0_i32, %c0_i32_0 : i32, i32, i32
  }
  func.func @transform_1(%arg0: i32) -> (i32, i32) {
    %c0_i32 = arith.constant 0 : i32
    %c0_i32_0 = arith.constant 0 : i32
    %c0_i32_1 = arith.constant 0 : i32
    return %c0_i32, %c0_i32_0 : i32, i32
  }
  func.func @transform_2(%arg0: i32) -> (i32, i32) {
    %c0_i32 = arith.constant 0 : i32
    %c0_i32_0 = arith.constant 0 : i32
    %c0_i32_1 = arith.constant 0 : i32
    return %c0_i32, %c0_i32_0 : i32, i32
  }
  func.func @transform_3(%arg0: i32) -> (i32, i32) {
    %c0_i32 = arith.constant 0 : i32
    %c0_i32_0 = arith.constant 0 : i32
    %c0_i32_1 = arith.constant 0 : i32
    return %c0_i32, %c0_i32_0 : i32, i32
  }
  func.func @transform_4(%arg0: i32) -> (i32, i32) {
    %c0_i32 = arith.constant 0 : i32
    %c0_i32_0 = arith.constant 0 : i32
    %c0_i32_1 = arith.constant 0 : i32
    return %c0_i32, %c0_i32_0 : i32, i32
  }
  func.func @transform_5(%arg0: i32) -> (i32, i32) {
    %c0_i32 = arith.constant 0 : i32
    %c0_i32_0 = arith.constant 0 : i32
    %c0_i32_1 = arith.constant 0 : i32
    return %c0_i32, %c0_i32_0 : i32, i32
  }
  func.func @transform_6(%arg0: i32) -> (i32, i32) {
    %c0_i32 = arith.constant 0 : i32
    %c0_i32_0 = arith.constant 0 : i32
    %c0_i32_1 = arith.constant 0 : i32
    return %c0_i32, %c0_i32_0 : i32, i32
  }
  func.func @transform_7(%arg0: i32) -> (i32, i32) {
    %c0_i32 = arith.constant 0 : i32
    %c0_i32_0 = arith.constant 0 : i32
    %c0_i32_1 = arith.constant 0 : i32
    return %c0_i32, %c0_i32_0 : i32, i32
  }
  func.func @transform_8(%arg0: i32) -> (i32, i32) {
    %c0_i32 = arith.constant 0 : i32
    %c0_i32_0 = arith.constant 0 : i32
    %c0_i32_1 = arith.constant 0 : i32
    return %c0_i32, %c0_i32_0 : i32, i32
  }
  func.func @transform_9(%arg0: i32) -> (i32, i32) {
    %c0_i32 = arith.constant 0 : i32
    %c0_i32_0 = arith.constant 0 : i32
    %c0_i32_1 = arith.constant 0 : i32
    return %c0_i32, %c0_i32_0 : i32, i32
  }
  func.func @transform_10(%arg0: i32) -> (i32, i32) {
    %c0_i32 = arith.constant 0 : i32
    %c0_i32_0 = arith.constant 0 : i32
    %c0_i32_1 = arith.constant 0 : i32
    return %c0_i32, %c0_i32_0 : i32, i32
  }
  func.func @transform_11(%arg0: i32) -> (i32, i32) {
    %c0_i32 = arith.constant 0 : i32
    %c0_i32_0 = arith.constant 0 : i32
    %c0_i32_1 = arith.constant 0 : i32
    return %c0_i32, %c0_i32_0 : i32, i32
  }
  func.func @transform_12(%arg0: i32) -> (i32, i32) {
    %c0_i32 = arith.constant 0 : i32
    %c0_i32_0 = arith.constant 0 : i32
    %c0_i32_1 = arith.constant 0 : i32
    return %c0_i32, %c0_i32_0 : i32, i32
  }
  func.func @transform_13(%arg0: i32) -> (i32, i32, i32) {
    %c0_i32 = arith.constant 0 : i32
    %c0_i32_0 = arith.constant 0 : i32
    %c0_i32_1 = arith.constant 0 : i32
    return %arg0, %c0_i32, %c0_i32_0 : i32, i32, i32
  }
  func.func @transform_14(%arg0: i32) -> (i32, i32, i32, i32) {
    %c0_i32 = arith.constant 0 : i32
    %c0_i32_0 = arith.constant 0 : i32
    %c0_i32_1 = arith.constant 0 : i32
    %c0_i32_2 = arith.constant 0 : i32
    return %arg0, %c0_i32, %c0_i32_0, %c0_i32_1 : i32, i32, i32, i32
  }
}

module attributes {stable_mosaic.version = 11 : i64} {
  func.func @_block_kernel(%arg0: i32, %arg1: memref<2x8x32xf32, #tpu.memory_space<vmem>>, %arg2: memref<32x96xbf16, #tpu.memory_space<vmem>>, %arg3: memref<1x96xf32, #tpu.memory_space<vmem>>, %arg4: memref<32x32xbf16, #tpu.memory_space<vmem>>, %arg5: memref<1x32xf32, #tpu.memory_space<vmem>>, %arg6: memref<1x32xf32, #tpu.memory_space<vmem>>, %arg7: memref<1x32xf32, #tpu.memory_space<vmem>>, %arg8: memref<1x32xf32, #tpu.memory_space<vmem>>, %arg9: memref<1x32xf32, #tpu.memory_space<vmem>>, %arg10: memref<32x128xbf16, #tpu.memory_space<vmem>>, %arg11: memref<1x128xf32, #tpu.memory_space<vmem>>, %arg12: memref<128x32xbf16, #tpu.memory_space<vmem>>, %arg13: memref<1x32xf32, #tpu.memory_space<vmem>>, %arg14: memref<2x8x32xf32, #tpu.memory_space<vmem>>, %arg15: memref<2x4x8x8xf32, #tpu.memory_space<vmem>>) attributes {dimension_semantics = [#tpu.dimension_semantics<parallel>], iteration_bounds = array<i64: 1>, scalar_prefetch = 0 : i64, scratch_operands = 0 : i64, tpu.core_type = #tpu.core_type<tc>, window_params = [{transform_indices = @transform_0, window_bounds = array<i64: 2, 8, 32>}, {pipeline_mode = #tpu.pipeline_mode<synchronous>, transform_indices = @transform_1, window_bounds = array<i64: 32, 96>}, {pipeline_mode = #tpu.pipeline_mode<synchronous>, transform_indices = @transform_2, window_bounds = array<i64: 1, 96>}, {pipeline_mode = #tpu.pipeline_mode<synchronous>, transform_indices = @transform_3, window_bounds = array<i64: 32, 32>}, {pipeline_mode = #tpu.pipeline_mode<synchronous>, transform_indices = @transform_4, window_bounds = array<i64: 1, 32>}, {pipeline_mode = #tpu.pipeline_mode<synchronous>, transform_indices = @transform_5, window_bounds = array<i64: 1, 32>}, {pipeline_mode = #tpu.pipeline_mode<synchronous>, transform_indices = @transform_6, window_bounds = array<i64: 1, 32>}, {pipeline_mode = #tpu.pipeline_mode<synchronous>, transform_indices = @transform_7, window_bounds = array<i64: 1, 32>}, {pipeline_mode = #tpu.pipeline_mode<synchronous>, transform_indices = @transform_8, window_bounds = array<i64: 1, 32>}, {pipeline_mode = #tpu.pipeline_mode<synchronous>, transform_indices = @transform_9, window_bounds = array<i64: 32, 128>}, {pipeline_mode = #tpu.pipeline_mode<synchronous>, transform_indices = @transform_10, window_bounds = array<i64: 1, 128>}, {pipeline_mode = #tpu.pipeline_mode<synchronous>, transform_indices = @transform_11, window_bounds = array<i64: 128, 32>}, {pipeline_mode = #tpu.pipeline_mode<synchronous>, transform_indices = @transform_12, window_bounds = array<i64: 1, 32>}, {transform_indices = @transform_13, window_bounds = array<i64: 2, 8, 32>}, {transform_indices = @transform_14, window_bounds = array<i64: 2, 4, 8, 8>}]} {
    %c0 = arith.constant 0 : index
    %c0_0 = arith.constant 0 : index
    %c0_1 = arith.constant 0 : index
    %0 = vector.load %arg1[%c0, %c0_0, %c0_1] : memref<2x8x32xf32, #tpu.memory_space<vmem>>, vector<2x8x32xf32>
    %1 = vector.shape_cast %0 : vector<2x8x32xf32> to vector<16x32xf32>
    %c0_2 = arith.constant 0 : index
    %c0_3 = arith.constant 0 : index
    %2 = vector.load %arg6[%c0_2, %c0_3] : memref<1x32xf32, #tpu.memory_space<vmem>>, vector<1x32xf32>
    %c0_4 = arith.constant 0 : index
    %c0_5 = arith.constant 0 : index
    %3 = vector.load %arg7[%c0_4, %c0_5] : memref<1x32xf32, #tpu.memory_space<vmem>>, vector<1x32xf32>
    %cst = arith.constant dense<0.000000e+00> : vector<16xf32>
    %4 = vector.multi_reduction <add>, %1, %cst [1] : vector<16x32xf32> to vector<16xf32>
    %5 = vector.shape_cast %4 : vector<16xf32> to vector<16x1xf32>
    %cst_6 = arith.constant 3.200000e+01 : f32
    %6 = vector.broadcast %cst_6 : f32 to vector<16x1xf32>
    %7 = arith.divf %5, %6 : vector<16x1xf32>
    %8 = vector.broadcast %7 : vector<16x1xf32> to vector<16x32xf32>
    %9 = arith.subf %1, %8 : vector<16x32xf32>
    %10 = arith.mulf %9, %9 : vector<16x32xf32>
    %cst_7 = arith.constant dense<0.000000e+00> : vector<16xf32>
    %11 = vector.multi_reduction <add>, %10, %cst_7 [1] : vector<16x32xf32> to vector<16xf32>
    %12 = vector.shape_cast %11 : vector<16xf32> to vector<16x1xf32>
    %cst_8 = arith.constant 3.200000e+01 : f32
    %13 = vector.broadcast %cst_8 : f32 to vector<16x1xf32>
    %14 = arith.divf %12, %13 : vector<16x1xf32>
    %15 = vector.broadcast %7 : vector<16x1xf32> to vector<16x32xf32>
    %16 = arith.subf %1, %15 : vector<16x32xf32>
    %cst_9 = arith.constant 9.99999974E-6 : f32
    %17 = vector.broadcast %cst_9 : f32 to vector<16x1xf32>
    %18 = arith.addf %14, %17 : vector<16x1xf32>
    %19 = math.rsqrt %18 : vector<16x1xf32>
    %20 = vector.broadcast %19 : vector<16x1xf32> to vector<16x32xf32>
    %21 = arith.mulf %16, %20 : vector<16x32xf32>
    %22 = vector.broadcast %2 : vector<1x32xf32> to vector<16x32xf32>
    %23 = arith.mulf %21, %22 : vector<16x32xf32>
    %24 = vector.broadcast %3 : vector<1x32xf32> to vector<16x32xf32>
    %25 = arith.addf %23, %24 : vector<16x32xf32>
    %26 = arith.truncf %25 : vector<16x32xf32> to vector<16x32xbf16>
    %c0_10 = arith.constant 0 : index
    %c0_11 = arith.constant 0 : index
    %27 = vector.load %arg2[%c0_10, %c0_11] : memref<32x96xbf16, #tpu.memory_space<vmem>>, vector<32x96xbf16>
    %cst_12 = arith.constant dense<0.000000e+00> : vector<16x96xf32>
    %28 = tpu.matmul %26, %27, %cst_12 {dimension_numbers = #tpu.dot_dimension_numbers<[1], [0], [0], [1], [0, 0, 1, 1], [], []>} : vector<16x32xbf16>, vector<32x96xbf16>, vector<16x96xf32> -> vector<16x96xf32>
    %c0_13 = arith.constant 0 : index
    %c0_14 = arith.constant 0 : index
    %29 = vector.load %arg3[%c0_13, %c0_14] : memref<1x96xf32, #tpu.memory_space<vmem>>, vector<1x96xf32>
    %30 = vector.broadcast %29 : vector<1x96xf32> to vector<16x96xf32>
    %31 = arith.addf %28, %30 : vector<16x96xf32>
    %32 = vector.extract_strided_slice %31 {offsets = [0, 0], sizes = [16, 32], strides = [1, 1]} : vector<16x96xf32> to vector<16x32xf32>
    %33 = vector.shape_cast %32 : vector<16x32xf32> to vector<2x8x4x8xf32>
    %34 = tpu.transpose %33, [0, 2, 1, 3] : vector<2x8x4x8xf32> -> vector<2x4x8x8xf32>
    %35 = vector.shape_cast %34 : vector<2x4x8x8xf32> to vector<8x8x8xf32>
    %36 = arith.truncf %35 : vector<8x8x8xf32> to vector<8x8x8xbf16>
    %37 = vector.extract_strided_slice %31 {offsets = [0, 32], sizes = [16, 32], strides = [1, 1]} : vector<16x96xf32> to vector<16x32xf32>
    %38 = vector.shape_cast %37 : vector<16x32xf32> to vector<2x8x4x8xf32>
    %39 = tpu.transpose %38, [0, 2, 1, 3] : vector<2x8x4x8xf32> -> vector<2x4x8x8xf32>
    %40 = vector.shape_cast %39 : vector<2x4x8x8xf32> to vector<8x8x8xf32>
    %41 = arith.truncf %40 : vector<8x8x8xf32> to vector<8x8x8xbf16>
    %42 = vector.extract_strided_slice %31 {offsets = [0, 64], sizes = [16, 32], strides = [1, 1]} : vector<16x96xf32> to vector<16x32xf32>
    %43 = vector.shape_cast %42 : vector<16x32xf32> to vector<2x8x4x8xf32>
    %44 = tpu.transpose %43, [0, 2, 1, 3] : vector<2x8x4x8xf32> -> vector<2x4x8x8xf32>
    %45 = vector.shape_cast %44 : vector<2x4x8x8xf32> to vector<8x8x8xf32>
    %46 = arith.truncf %45 : vector<8x8x8xf32> to vector<8x8x8xbf16>
    %47 = tpu.iota {dimensions = array<i32: 0>} : vector<8x8xi32>
    %48 = tpu.iota {dimensions = array<i32: 1>} : vector<8x8xi32>
    %49 = arith.cmpi sge, %47, %48 : vector<8x8xi32>
    %50 = vector.shape_cast %49 : vector<8x8xi1> to vector<1x8x8xi1>
    "tpu.trace_start"() <{level = 10 : i32, message = "bqd,bkd->bqk"}> : () -> ()
    %cst_15 = arith.constant dense<0.000000e+00> : vector<8x8x8xf32>
    %51 = tpu.matmul %36, %41, %cst_15 {dimension_numbers = #tpu.dot_dimension_numbers<[2], [2], [1], [1], [0, 0, 0, 1, 1, 1], [0], [0]>} : vector<8x8x8xbf16>, vector<8x8x8xbf16>, vector<8x8x8xf32> -> vector<8x8x8xf32>
    "tpu.trace_stop"() : () -> ()
    %cst_16 = arith.constant 0.353553385 : f32
    %52 = vector.broadcast %cst_16 : f32 to vector<8x8x8xf32>
    %53 = arith.mulf %51, %52 : vector<8x8x8xf32>
    %cst_17 = arith.constant 0xFF800000 : f32
    %54 = vector.shape_cast %50 : vector<1x8x8xi1> to vector<1x8x8xi1>
    %55 = vector.broadcast %54 : vector<1x8x8xi1> to vector<8x8x8xi1>
    %56 = vector.broadcast %cst_17 : f32 to vector<8x8x8xf32>
    %57 = arith.select %55, %53, %56 : vector<8x8x8xi1>, vector<8x8x8xf32>
    %cst_18 = arith.constant dense<0xFF800000> : vector<8x8xf32>
    %58 = vector.multi_reduction <maximumf>, %57, %cst_18 [2] : vector<8x8x8xf32> to vector<8x8xf32>
    %59 = vector.shape_cast %58 : vector<8x8xf32> to vector<8x8x1xf32>
    %60 = vector.broadcast %59 : vector<8x8x1xf32> to vector<8x8x8xf32>
    %61 = arith.subf %57, %60 : vector<8x8x8xf32>
    %62 = math.exp %61 : vector<8x8x8xf32>
    %cst_19 = arith.constant dense<0.000000e+00> : vector<8x8xf32>
    %63 = vector.multi_reduction <add>, %62, %cst_19 [2] : vector<8x8x8xf32> to vector<8x8xf32>
    %64 = vector.shape_cast %63 : vector<8x8xf32> to vector<8x8x1xf32>
    %cst_20 = arith.constant 1.000000e+00 : f32
    %65 = vector.broadcast %cst_20 : f32 to vector<8x8x1xf32>
    %66 = arith.divf %65, %64 : vector<8x8x1xf32>
    %67 = vector.broadcast %66 : vector<8x8x1xf32> to vector<8x8x8xf32>
    %68 = arith.mulf %62, %67 : vector<8x8x8xf32>
    %69 = vector.shape_cast %68 : vector<8x8x8xf32> to vector<2x4x8x8xf32>
    %c0_21 = arith.constant 0 : index
    %c0_22 = arith.constant 0 : index
    %c0_23 = arith.constant 0 : index
    %c0_24 = arith.constant 0 : index
    %70 = vector.load %arg15[%c0_21, %c0_22, %c0_23, %c0_24] : memref<2x4x8x8xf32, #tpu.memory_space<vmem>>, vector<2x4x8x8xf32>
    tpu.vector_store %arg15[%c0_21, %c0_22, %c0_23, %c0_24], %69 {strides = array<i32>} : memref<2x4x8x8xf32, #tpu.memory_space<vmem>>, vector<2x4x8x8xf32>,
    %71 = arith.truncf %68 : vector<8x8x8xf32> to vector<8x8x8xbf16>
    "tpu.trace_start"() <{level = 10 : i32, message = "bqk,bkd->bqd"}> : () -> ()
    %cst_25 = arith.constant dense<0.000000e+00> : vector<8x8x8xf32>
    %72 = tpu.matmul %71, %46, %cst_25 {dimension_numbers = #tpu.dot_dimension_numbers<[2], [1], [1], [2], [0, 0, 0, 1, 1, 2], [0], [0]>} : vector<8x8x8xbf16>, vector<8x8x8xbf16>, vector<8x8x8xf32> -> vector<8x8x8xf32>
    "tpu.trace_stop"() : () -> ()
    %73 = vector.shape_cast %72 : vector<8x8x8xf32> to vector<2x4x8x8xf32>
    %74 = tpu.transpose %73, [0, 2, 1, 3] : vector<2x4x8x8xf32> -> vector<2x8x4x8xf32>
    %75 = vector.shape_cast %74 : vector<2x8x4x8xf32> to vector<16x32xf32>
    %76 = arith.truncf %75 : vector<16x32xf32> to vector<16x32xbf16>
    %c0_26 = arith.constant 0 : index
    %c0_27 = arith.constant 0 : index
    %77 = vector.load %arg4[%c0_26, %c0_27] : memref<32x32xbf16, #tpu.memory_space<vmem>>, vector<32x32xbf16>
    %cst_28 = arith.constant dense<0.000000e+00> : vector<16x32xf32>
    %78 = tpu.matmul %76, %77, %cst_28 {dimension_numbers = #tpu.dot_dimension_numbers<[1], [0], [0], [1], [0, 0, 1, 1], [], []>} : vector<16x32xbf16>, vector<32x32xbf16>, vector<16x32xf32> -> vector<16x32xf32>
    %c0_29 = arith.constant 0 : index
    %c0_30 = arith.constant 0 : index
    %79 = vector.load %arg5[%c0_29, %c0_30] : memref<1x32xf32, #tpu.memory_space<vmem>>, vector<1x32xf32>
    %80 = vector.broadcast %79 : vector<1x32xf32> to vector<16x32xf32>
    %81 = arith.addf %78, %80 : vector<16x32xf32>
    %82 = arith.addf %1, %81 : vector<16x32xf32>
    %c0_31 = arith.constant 0 : index
    %c0_32 = arith.constant 0 : index
    %83 = vector.load %arg8[%c0_31, %c0_32] : memref<1x32xf32, #tpu.memory_space<vmem>>, vector<1x32xf32>
    %c0_33 = arith.constant 0 : index
    %c0_34 = arith.constant 0 : index
    %84 = vector.load %arg9[%c0_33, %c0_34] : memref<1x32xf32, #tpu.memory_space<vmem>>, vector<1x32xf32>
    %cst_35 = arith.constant dense<0.000000e+00> : vector<16xf32>
    %85 = vector.multi_reduction <add>, %82, %cst_35 [1] : vector<16x32xf32> to vector<16xf32>
    %86 = vector.shape_cast %85 : vector<16xf32> to vector<16x1xf32>
    %cst_36 = arith.constant 3.200000e+01 : f32
    %87 = vector.broadcast %cst_36 : f32 to vector<16x1xf32>
    %88 = arith.divf %86, %87 : vector<16x1xf32>
    %89 = vector.broadcast %88 : vector<16x1xf32> to vector<16x32xf32>
    %90 = arith.subf %82, %89 : vector<16x32xf32>
    %91 = arith.mulf %90, %90 : vector<16x32xf32>
    %cst_37 = arith.constant dense<0.000000e+00> : vector<16xf32>
    %92 = vector.multi_reduction <add>, %91, %cst_37 [1] : vector<16x32xf32> to vector<16xf32>
    %93 = vector.shape_cast %92 : vector<16xf32> to vector<16x1xf32>
    %cst_38 = arith.constant 3.200000e+01 : f32
    %94 = vector.broadcast %cst_38 : f32 to vector<16x1xf32>
    %95 = arith.divf %93, %94 : vector<16x1xf32>
    %96 = vector.broadcast %88 : vector<16x1xf32> to vector<16x32xf32>
    %97 = arith.subf %82, %96 : vector<16x32xf32>
    %cst_39 = arith.constant 9.99999974E-6 : f32
    %98 = vector.broadcast %cst_39 : f32 to vector<16x1xf32>
    %99 = arith.addf %95, %98 : vector<16x1xf32>
    %100 = math.rsqrt %99 : vector<16x1xf32>
    %101 = vector.broadcast %100 : vector<16x1xf32> to vector<16x32xf32>
    %102 = arith.mulf %97, %101 : vector<16x32xf32>
    %103 = vector.broadcast %83 : vector<1x32xf32> to vector<16x32xf32>
    %104 = arith.mulf %102, %103 : vector<16x32xf32>
    %105 = vector.broadcast %84 : vector<1x32xf32> to vector<16x32xf32>
    %106 = arith.addf %104, %105 : vector<16x32xf32>
    %107 = arith.truncf %106 : vector<16x32xf32> to vector<16x32xbf16>
    %c0_40 = arith.constant 0 : index
    %c0_41 = arith.constant 0 : index
    %108 = vector.load %arg10[%c0_40, %c0_41] : memref<32x128xbf16, #tpu.memory_space<vmem>>, vector<32x128xbf16>
    %cst_42 = arith.constant dense<0.000000e+00> : vector<16x128xf32>
    %109 = tpu.matmul %107, %108, %cst_42 {dimension_numbers = #tpu.dot_dimension_numbers<[1], [0], [0], [1], [0, 0, 1, 1], [], []>} : vector<16x32xbf16>, vector<32x128xbf16>, vector<16x128xf32> -> vector<16x128xf32>
    %c0_43 = arith.constant 0 : index
    %c0_44 = arith.constant 0 : index
    %110 = vector.load %arg11[%c0_43, %c0_44] : memref<1x128xf32, #tpu.memory_space<vmem>>, vector<1x128xf32>
    %111 = vector.broadcast %110 : vector<1x128xf32> to vector<16x128xf32>
    %112 = arith.addf %109, %111 : vector<16x128xf32>
    %cst_45 = arith.constant 5.000000e-01 : f32
    %113 = vector.broadcast %cst_45 : f32 to vector<16x128xf32>
    %114 = arith.mulf %113, %112 : vector<16x128xf32>
    %cst_46 = arith.constant 0.707106769 : f32
    %115 = vector.broadcast %cst_46 : f32 to vector<16x128xf32>
    %116 = arith.mulf %112, %115 : vector<16x128xf32>
    %117 = math.erf %116 : vector<16x128xf32>
    %cst_47 = arith.constant 1.000000e+00 : f32
    %118 = vector.broadcast %cst_47 : f32 to vector<16x128xf32>
    %119 = arith.addf %118, %117 : vector<16x128xf32>
    %120 = arith.mulf %114, %119 : vector<16x128xf32>
    %121 = arith.truncf %120 : vector<16x128xf32> to vector<16x128xbf16>
    %c0_48 = arith.constant 0 : index
    %c0_49 = arith.constant 0 : index
    %122 = vector.load %arg12[%c0_48, %c0_49] : memref<128x32xbf16, #tpu.memory_space<vmem>>, vector<128x32xbf16>
    %cst_50 = arith.constant dense<0.000000e+00> : vector<16x32xf32>
    %123 = tpu.matmul %121, %122, %cst_50 {dimension_numbers = #tpu.dot_dimension_numbers<[1], [0], [0], [1], [0, 0, 1, 1], [], []>} : vector<16x128xbf16>, vector<128x32xbf16>, vector<16x32xf32> -> vector<16x32xf32>
    %c0_51 = arith.constant 0 : index
    %c0_52 = arith.constant 0 : index
    %124 = vector.load %arg13[%c0_51, %c0_52] : memref<1x32xf32, #tpu.memory_space<vmem>>, vector<1x32xf32>
    %125 = vector.broadcast %124 : vector<1x32xf32> to vector<16x32xf32>
    %126 = arith.addf %123, %125 : vector<16x32xf32>
    %127 = arith.addf %82, %126 : vector<16x32xf32>
    %128 = vector.shape_cast %127 : vector<16x32xf32> to vector<2x8x32xf32>
    %c0_53 = arith.constant 0 : index
    %c0_54 = arith.constant 0 : index
    %c0_55 = arith.constant 0 : index
    %129 = vector.load %arg14[%c0_53, %c0_54, %c0_55] : memref<2x8x32xf32, #tpu.memory_space<vmem>>, vector<2x8x32xf32>
    tpu.vector_store %arg14[%c0_53, %c0_54, %c0_55], %128 {strides = array<i32>} : memref<2x8x32xf32, #tpu.memory_space<vmem>>, vector<2x8x32xf32>,
    return
  }
  func.func @transform_0(%arg0: i32) -> (i32, i32, i32) {
    %c0_i32 = arith.constant 0 : i32
    %c0_i32_0 = arith.constant 0 : i32
    %c0_i32_1 = arith.constant 0 : i32
    return %arg0, %c0_i32, %c0_i32_0 : i32, i32, i32
  }
  func.func @transform_1(%arg0: i32) -> (i32, i32) {
    %c0_i32 = arith.constant 0 : i32
    %c0_i32_0 = arith.constant 0 : i32
    %c0_i32_1 = arith.constant 0 : i32
    return %c0_i32, %c0_i32_0 : i32, i32
  }
  func.func @transform_2(%arg0: i32) -> (i32, i32) {
    %c0_i32 = arith.constant 0 : i32
    %c0_i32_0 = arith.constant 0 : i32
    %c0_i32_1 = arith.constant 0 : i32
    return %c0_i32, %c0_i32_0 : i32, i32
  }
  func.func @transform_3(%arg0: i32) -> (i32, i32) {
    %c0_i32 = arith.constant 0 : i32
    %c0_i32_0 = arith.constant 0 : i32
    %c0_i32_1 = arith.constant 0 : i32
    return %c0_i32, %c0_i32_0 : i32, i32
  }
  func.func @transform_4(%arg0: i32) -> (i32, i32) {
    %c0_i32 = arith.constant 0 : i32
    %c0_i32_0 = arith.constant 0 : i32
    %c0_i32_1 = arith.constant 0 : i32
    return %c0_i32, %c0_i32_0 : i32, i32
  }
  func.func @transform_5(%arg0: i32) -> (i32, i32) {
    %c0_i32 = arith.constant 0 : i32
    %c0_i32_0 = arith.constant 0 : i32
    %c0_i32_1 = arith.constant 0 : i32
    return %c0_i32, %c0_i32_0 : i32, i32
  }
  func.func @transform_6(%arg0: i32) -> (i32, i32) {
    %c0_i32 = arith.constant 0 : i32
    %c0_i32_0 = arith.constant 0 : i32
    %c0_i32_1 = arith.constant 0 : i32
    return %c0_i32, %c0_i32_0 : i32, i32
  }
  func.func @transform_7(%arg0: i32) -> (i32, i32) {
    %c0_i32 = arith.constant 0 : i32
    %c0_i32_0 = arith.constant 0 : i32
    %c0_i32_1 = arith.constant 0 : i32
    return %c0_i32, %c0_i32_0 : i32, i32
  }
  func.func @transform_8(%arg0: i32) -> (i32, i32) {
    %c0_i32 = arith.constant 0 : i32
    %c0_i32_0 = arith.constant 0 : i32
    %c0_i32_1 = arith.constant 0 : i32
    return %c0_i32, %c0_i32_0 : i32, i32
  }
  func.func @transform_9(%arg0: i32) -> (i32, i32) {
    %c0_i32 = arith.constant 0 : i32
    %c0_i32_0 = arith.constant 0 : i32
    %c0_i32_1 = arith.constant 0 : i32
    return %c0_i32, %c0_i32_0 : i32, i32
  }
  func.func @transform_10(%arg0: i32) -> (i32, i32) {
    %c0_i32 = arith.constant 0 : i32
    %c0_i32_0 = arith.constant 0 : i32
    %c0_i32_1 = arith.constant 0 : i32
    return %c0_i32, %c0_i32_0 : i32, i32
  }
  func.func @transform_11(%arg0: i32) -> (i32, i32) {
    %c0_i32 = arith.constant 0 : i32
    %c0_i32_0 = arith.constant 0 : i32
    %c0_i32_1 = arith.constant 0 : i32
    return %c0_i32, %c0_i32_0 : i32, i32
  }
  func.func @transform_12(%arg0: i32) -> (i32, i32) {
    %c0_i32 = arith.constant 0 : i32
    %c0_i32_0 = arith.constant 0 : i32
    %c0_i32_1 = arith.constant 0 : i32
    return %c0_i32, %c0_i32_0 : i32, i32
  }
  func.func @transform_13(%arg0: i32) -> (i32, i32, i32) {
    %c0_i32 = arith.constant 0 : i32
    %c0_i32_0 = arith.constant 0 : i32
    %c0_i32_1 = arith.constant 0 : i32
    return %arg0, %c0_i32, %c0_i32_0 : i32, i32, i32
  }
  func.func @transform_14(%arg0: i32) -> (i32, i32, i32, i32) {
    %c0_i32 = arith.constant 0 : i32
    %c0_i32_0 = arith.constant 0 : i32
    %c0_i32_1 = arith.constant 0 : i32
    %c0_i32_2 = arith.constant 0 : i32
    return %arg0, %c0_i32, %c0_i32_0, %c0_i32_1 : i32, i32, i32, i32
  }
}

</mosaic_0001>

<bundles_post_ra>
// kernel: tpu_custom_call.1
= control target key start
LH: loop header
LB: loop body
LE: loop exit
PB: predicated region body
PF: predicated region fallthrough
CT: control target
= control target key end

     0   :  { %20 = vsyncpa [#allocation3], 0  ;;  %vm53_vm0 = vcmask 261120   ;;  %s3615_s0 = inlined_call_operand.vmem [shape: f32[2,8,32], index: 0, kind: input, shape index: {}]   ;;  %s3616_s1 = inlined_call_operand.vmem [shape: bf16[32,96], index: 1, kind: input, shape index: {}]   ;;  %s3617_s2 = inlined_call_operand.vmem [shape: f32[1,96], index: 2, kind: input, shape index: {}]   ;;  %s3618_s3 = inlined_call_operand.vmem [shape: bf16[32,32], index: 3, kind: input, shape index: {}]   ;;  %s3619_s4 = inlined_call_operand.vmem [shape: f32[1,32], index: 4, kind: input, shape index: {}]   ;;  %s3620_s5 = inlined_call_operand.vmem [shape: f32[1,32], index: 5, kind: input, shape index: {}]   ;;  %s3621_s6 = inlined_call_operand.vmem [shape: f32[1,32], index: 6, kind: input, shape index: {}]   ;;  %s3622_s7 = inlined_call_operand.vmem [shape: f32[1,32], index: 7, kind: input, shape index: {}]   ;;  %s3623_s8 = inlined_call_operand.vmem [shape: f32[1,32], index: 8, kind: input, shape index: {}]   ;;  %s3624_s9 = inlined_call_operand.vmem [shape: bf16[32,128], index: 9, kind: input, shape index: {}]   ;;  %s3625_s10 = inlined_call_operand.vmem [shape: f32[1,128], index: 10, kind: input, shape index: {}]   ;;  %s3626_s11 = inlined_call_operand.vmem [shape: bf16[128,32], index: 11, kind: input, shape index: {}]   ;;  %s3627_s12 = inlined_call_operand.vmem [shape: f32[1,32], index: 12, kind: input, shape index: {}]   ;;  %s3628_s13 = inlined_call_operand.hbm [shape: f32[2,8,32], index: 13, kind: output, shape index: {0}]   ;;  %s3629_s14 = inlined_call_operand.hbm [shape: f32[2,4,8,8], index: 14, kind: output, shape index: {1}]  }
   0x1   :  { %v49_v0 = vld [vmem:[%s3615_s0] sm:$0xff]  ;;  %v50_v1 = vld [vmem:[%s3615_s0 + $0x8] sm:$0xff] }
   0x2   :  { %v54_v2 = vsel %vm53_vm0, %v49_v0, 0.0  ;;  %v57_v3 = vsel %vm53_vm0, %v50_v1, 0.0 }
   0x3   :  { %55 = vadd.xlane.f32.xlu0 %v54_v2 }
   0x7   :  { %58 = vadd.xlane.f32.xlu0 %v57_v3 }
   0x8   :  { %21 = vsyncpa [#allocation5], 0  ;;  %v2868_v14 = vld [vmem:[%s3616_s1 + $0x8] sm:$0xff]   ;;  %v2972_v15 = vmov 0.0   ;;  %vm2973_vm1 = vmmov 0   ;;  %v2869_v16 = vld [vmem:[%s3616_s1] sm:$0xff]   ;;  %v190_v49 = vlaneseq }
   0x9   :  { %2698 = vmatprep.subr.bf16.mxu0 %v2972_v15  ;;  %2702 = vmatprep.mubr.msk.bf16.mxu0 %vm2973_vm1, %v2972_v15  ;;  %v2591_v25 = vld [vmem:[%s3620_s5] ss:$0 sm:$0xff]  ;;  %s2974_s5 = smov 112   ;;  %s2976_s26 = smov 104   ;;  %v2978_v47 = vmov 1983009808  }
   0xa   :  { %2699 = vmatpush3.bf16.msra.mxu0 %v2868_v14  ;;  %2718 = vmatprep.subr.bf16.mxu1 %v2972_v15  ;;  %v2592_v29 = vld [vmem:[%s3621_s6] ss:$0 sm:$0xff]  ;;  %s2975_s6 = smov 120   ;;  %v188_v48 = vunpack.c.l.s4 %v2978_v47  ;;  %v3129_v51 = vshrl.u32 %v190_v49, 7  ;;  %v2979_v52 = vmov 1934713408  }
   0xb   :  { %2700 = vmatprep.subr.bf16.mxu0 %v2972_v15  ;;  %2720 = vmatprep.mubr.msk.bf16.mxu1 %vm2973_vm1, %v2972_v15  ;;  %v2593_v34 = vld [vmem:[%s3617_s2] ss:$0 sm:$0xff]  ;;  %s2977_s2 = smov 96   ;;  %v220_v53 = vunpack.c.l.s4 %v2979_v52  ;;  %vm1078_vm2 = vcmask 64512   ;;  %s2980_s27 = smov 64   ;;  %vm1580_vm4 = vcmask 1043456  }
   0xc   :  { %v189_v50 = vunpack.c.0.s8 %v188_v48  ;;  %s2981_s16 = smov 16   ;;  %s2983_s17 = smov 24   ;;  %vm2244_vm5 = vcmask 130048   ;;  %vm2247_vm6 = vcmask 195584  }
   0xd   :  { %v221_v59 = vunpack.c.0.s8 %v220_v53 }
   0xe   :  { %2701 = vmatpush3.bf16.msra.mxu0 %v2869_v16  ;;  %v3136_v56 = vsub.s32 %v189_v50, %v3129_v51 }
   0xf   :  { %2706 = vmatprep.subr.bf16.mxu0 %v2972_v15 }
  0x8c   :  { %v56_v4 = vpop.xlane.xlu0 %55 }
  0x8d   :  { %v61_v5 = vmul.f32 0.03125, %v56_v4 }
  0x8f   :  { %v63_v6 = vsub.f32 %v49_v0, %v61_v5  ;;  %v3147_v0 = vsub.s32 %v221_v59, %v3129_v51 }
  0x90   :  { %v59_v7 = vpop.xlane.xlu0 %58 }
  0x91   :  { %v62_v8 = vmul.f32 0.03125, %v59_v7  ;;  %v65_v9 = vmul.f32 %v63_v6, %v63_v6 }
  0x93   :  { %v64_v10 = vsub.f32 %v50_v1, %v62_v8  ;;  %v67_v11 = vsel %vm53_vm0, %v65_v9, 0.0 }
  0x94   :  { %68 = vadd.xlane.f32.xlu1 %v67_v11 }
  0x95   :  { %v66_v12 = vmul.f32 %v64_v10, %v64_v10 }
  0x97   :  { %v70_v13 = vsel %vm53_vm0, %v66_v12, 0.0 }
  0x98   :  { %71 = vadd.xlane.f32.xlu1 %v70_v13 }
 0x11d   :  { %v69_v17 = vpop.xlane.xlu1 %68 }
 0x11e   :  { %v73_v18 = vmul.f32 0.03125, %v69_v17 }
 0x120   :  { %v75_v19 = vadd.f32 1e-05, %v73_v18 }
 0x121   :  { %v72_v20 = vpop.xlane.xlu1 %71 }
 0x122   :  { %2882 = vrsqrt.f32 %v75_v19  ;;  %v74_v21 = vmul.f32 0.03125, %v72_v20 }
 0x124   :  { %v76_v22 = vadd.f32 1e-05, %v74_v21 }
 0x126   :  { %2884 = vrsqrt.f32 %v76_v22 }
 0x12f   :  { %v2883_v23 = vpop.eup %2882 }
 0x130   :  { %v79_v24 = vmul.f32 %v2883_v23, %v63_v6 }
 0x132   :  { %v87_v28 = vmul.f32 %v2591_v25, %v79_v24 }
 0x133   :  { %v2885_v26 = vpop.eup %2884 }
 0x134   :  { %v80_v27 = vmul.f32 %v2885_v26, %v64_v10  ;;  %v95_v31 = vadd.f32 %v2592_v29, %v87_v28 }
 0x136   :  { %v88_v30 = vmul.f32 %v2591_v25, %v80_v27 }
 0x138   :  { %v96_v32 = vadd.f32 %v2592_v29, %v88_v30 }
 0x13a   :  { %v97_v33 = vpack.c.bf16 %v96_v32, %v95_v31 }
 0x13c   :  { %2703 = vmatmul.mubr.msk.bf16.vlgmr.msra.gmra.mxu0 %vm53_vm0, %v97_v33 }
 0x13d   :  { %2708 = vmatprep.mubr.msk.bf16.mxu0 %vm2973_vm1, %v2972_v15 }
 0x1fc   :  { %v158_v35 = vpop.f32.mrf.mxu0 }
 0x1fd   :  { %v3098_v36 = vadd.f32 %v2593_v34, %v158_v35 }
 0x1fe   :  { %v2704_v37 = vpop.f32.mrf.mxu0 }
 0x1ff   :  { %173 = vrot.lane.b32.xlu1 %v3098_v36, %s2974_s5  ;;  %167 = vrot.lane.b32.xlu0 %v3098_v36, %s2975_s6 }
 0x200   :  { %v161_v38 = vpop.f32.mrf.mxu0 }
 0x201   :  { %v3102_v39 = vadd.f32 %v2593_v34, %v161_v38 }
 0x202   :  { %v2705_v40 = vpop.f32.mrf.mxu0 }
 0x203   :  { %179 = vrot.lane.b32.xlu1 %v3098_v36, %s2976_s26  ;;  %175 = vrot.lane.b32.xlu0 %v3102_v39, %s2974_s5 }
 0x207   :  { %465 = vrot.lane.b32.xlu0 %v3098_v36, %s2977_s2  ;;  %169 = vrot.lane.b32.xlu1 %v3102_v39, %s2975_s6 }
 0x20b   :  { %181 = vrot.lane.b32.xlu1 %v3102_v39, %s2976_s26 }
 0x271   :  { %v3109_v41 = vpop.permute.xlu1 %173  ;;  %v3111_v42 = vpop.permute.xlu0 %167 }
 0x272   :  { %473 = vrot.lane.b32.xlu0 %v3109_v41, %s2977_s2  ;;  %469 = vrot.lane.b32.xlu1 %v3111_v42, %s2977_s2  ;;  %v185_v57 = vcombine.low %v3098_v36, %v3109_v41  ;;  %v186_v58 = vcombine.high %v3098_v36, %v3109_v41 }
 0x274   :  { %v193_v62 = vrot.slane %v185_v57, %v3136_v56  ;;  %v200_v63 = vrot.slane %v186_v58, %v3136_v56 }
 0x275   :  { %v3115_v43 = vpop.permute.xlu1 %179  ;;  %v3119_v44 = vpop.permute.xlu0 %175 }
 0x276   :  { %467 = vrot.lane.b32.xlu0 %v3102_v39, %s2977_s2  ;;  %477 = vrot.lane.b32.xlu1 %v3115_v43, %s2977_s2  ;;  %v201_v54 = vcombine.low %v3111_v42, %v3115_v43  ;;  %v202_v55 = vcombine.high %v3111_v42, %v3115_v43  ;;  %v253_v16 = vcombine.low %v3102_v39, %v3119_v44 }
 0x277   :  { %v254_v19 = vcombine.high %v3102_v39, %v3119_v44 }
 0x278   :  { %v209_v60 = vrot.slane %v201_v54, %v3136_v56  ;;  %v216_v61 = vrot.slane %v202_v55, %v3136_v56  ;;  %v261_v26 = vrot.slane %v253_v16, %v3136_v56 }
 0x279   :  { %v3121_v45 = vpop.permute.xlu1 %169  ;;  %v466_v10 = vpop.permute.xlu0 %465  ;;  %v268_v28 = vrot.slane %v254_v19, %v3136_v56 }
 0x27a   :  { %475 = vrot.lane.b32.xlu0 %v3119_v44, %s2977_s2  ;;  %471 = vrot.lane.b32.xlu1 %v3121_v45, %s2977_s2  ;;  %v217_v1 = vcombine.low %v193_v62, %v209_v60  ;;  %v218_v2 = vcombine.high %v193_v62, %v209_v60  ;;  %v233_v3 = vcombine.low %v200_v63, %v216_v61 }
 0x27b   :  { %v234_v4 = vcombine.high %v200_v63, %v216_v61 }
 0x27c   :  { %v225_v5 = vrot.slane %v217_v1, %v3147_v0  ;;  %v232_v6 = vrot.slane %v218_v2, %v3147_v0  ;;  %v241_v7 = vrot.slane %v233_v3, %v3147_v0 }
 0x27d   :  { %v3125_v46 = vpop.permute.xlu1 %181  ;;  %v248_v8 = vrot.slane %v234_v4, %v3147_v0 }
 0x27e   :  { %479 = vrot.lane.b32.xlu1 %v3125_v46, %s2977_s2  ;;  %v321_v9 = vcombine.low %v225_v5, %v232_v6  ;;  %v2597_v11 = vcombine.high %v225_v5, %v232_v6  ;;  %v269_v14 = vcombine.low %v3121_v45, %v3125_v46  ;;  %v270_v17 = vcombine.high %v3121_v45, %v3125_v46 }
 0x27f   :  { %v337_v12 = vcombine.low %v241_v7, %v248_v8  ;;  %v2598_v13 = vcombine.high %v241_v7, %v248_v8 }
 0x280   :  { %v328_v18 = vrot.slane %v321_v9, %v3136_v56  ;;  %v336_v22 = vrot.slane %v2597_v11, %v3136_v56  ;;  %v277_v25 = vrot.slane %v269_v14, %v3136_v56  ;;  %v284_v27 = vrot.slane %v270_v17, %v3136_v56 }
 0x281   :  { %v344_v23 = vrot.slane %v337_v12, %v3136_v56  ;;  %v352_v24 = vrot.slane %v2598_v13, %v3136_v56 }
 0x282   :  { %v285_v32 = vcombine.low %v261_v26, %v277_v25  ;;  %v286_v33 = vcombine.high %v261_v26, %v277_v25  ;;  %v353_v35 = vcombine.low %v328_v18, %v336_v22  ;;  %v301_v47 = vcombine.low %v268_v28, %v284_v27 }
 0x283   :  { %v369_v37 = vcombine.low %v344_v23, %v352_v24  ;;  %v302_v48 = vcombine.high %v268_v28, %v284_v27  ;;  %v354_v50 = vcombine.high %v328_v18, %v336_v22  ;;  %v370_v52 = vcombine.high %v344_v23, %v352_v24 }
 0x284   :  { %v293_v58 = vrot.slane %v285_v32, %v3147_v0  ;;  %v300_v59 = vrot.slane %v286_v33, %v3147_v0  ;;  %v3176_v61 = vrot.slane %v353_v35, %v3147_v0  ;;  %v309_v5 = vrot.slane %v301_v47, %v3147_v0 }
 0x285   :  { %v3179_v62 = vrot.slane %v369_v37, %v3147_v0  ;;  %v316_v6 = vrot.slane %v302_v48, %v3147_v0  ;;  %v3184_v7 = vrot.slane %v354_v50, %v3147_v0  ;;  %v3187_v8 = vrot.slane %v370_v52, %v3147_v0 }
 0x286   :  { %v389_v13 = vcombine.low %v293_v58, %v300_v59  ;;  %v2599_v14 = vcombine.high %v293_v58, %v300_v59 }
 0x287   :  { %v405_v23 = vcombine.low %v309_v5, %v316_v6  ;;  %v2600_v24 = vcombine.high %v309_v5, %v316_v6 }
 0x2e4   :  { %v474_v20 = vpop.permute.xlu0 %473  ;;  %v470_v21 = vpop.permute.xlu1 %469 }
 0x2e5   :  { %v489_v29 = vcombine.low %v466_v10, %v474_v20  ;;  %v490_v30 = vcombine.high %v466_v10, %v474_v20 }
 0x2e7   :  { %v497_v53 = vrot.slane %v489_v29, %v3136_v56  ;;  %v504_v54 = vrot.slane %v490_v30, %v3136_v56 }
 0x2e8   :  { %v468_v31 = vpop.permute.xlu0 %467  ;;  %v478_v34 = vpop.permute.xlu1 %477 }
 0x2e9   :  { %v505_v38 = vcombine.low %v470_v21, %v478_v34  ;;  %v506_v40 = vcombine.high %v470_v21, %v478_v34 }
 0x2eb   :  { %v513_v55 = vrot.slane %v505_v38, %v3136_v56  ;;  %v520_v57 = vrot.slane %v506_v40, %v3136_v56 }
 0x2ec   :  { %v472_v60 = vpop.permute.xlu1 %471  ;;  %v476_v4 = vpop.permute.xlu0 %475 }
 0x2ed   :  { %v521_v63 = vcombine.low %v497_v53, %v513_v55  ;;  %v522_v1 = vcombine.high %v497_v53, %v513_v55  ;;  %v537_v2 = vcombine.low %v504_v54, %v520_v57  ;;  %v538_v3 = vcombine.high %v504_v54, %v520_v57 }
 0x2ee   :  { %v557_v16 = vcombine.low %v468_v31, %v476_v4  ;;  %v558_v17 = vcombine.high %v468_v31, %v476_v4 }
 0x2ef   :  { %v529_v9 = vrot.slane %v521_v63, %v3147_v0  ;;  %v536_v10 = vrot.slane %v522_v1, %v3147_v0  ;;  %v545_v11 = vrot.slane %v537_v2, %v3147_v0  ;;  %v552_v12 = vrot.slane %v538_v3, %v3147_v0 }
 0x2f0   :  { %v480_v18 = vpop.permute.xlu1 %479  ;;  %v565_v31 = vrot.slane %v557_v16, %v3136_v56  ;;  %v572_v32 = vrot.slane %v558_v17, %v3136_v56  ;;  %v3210_v1 = vrot.slane %v389_v13, %v3136_v56  ;;  %v404_v2 = vrot.slane %v2599_v14, %v3136_v56 }
 0x2f1   :  { %v625_v19 = vcombine.low %v529_v9, %v536_v10  ;;  %v2601_v20 = vcombine.high %v529_v9, %v536_v10  ;;  %v641_v21 = vcombine.low %v545_v11, %v552_v12  ;;  %v2602_v22 = vcombine.high %v545_v11, %v552_v12 }
 0x2f2   :  { %v573_v25 = vcombine.low %v472_v60, %v480_v18  ;;  %v574_v26 = vcombine.high %v472_v60, %v480_v18  ;;  %v412_v11 = vrot.slane %v405_v23, %v3136_v56  ;;  %v420_v12 = vrot.slane %v2600_v24, %v3136_v56 }
 0x2f3   :  { %v632_v27 = vrot.slane %v625_v19, %v3136_v56  ;;  %v640_v28 = vrot.slane %v2601_v20, %v3136_v56  ;;  %v648_v29 = vrot.slane %v641_v21, %v3136_v56  ;;  %v656_v30 = vrot.slane %v2602_v22, %v3136_v56 }
 0x2f4   :  { %v581_v33 = vrot.slane %v573_v25, %v3136_v56  ;;  %v588_v34 = vrot.slane %v574_v26, %v3136_v56  ;;  %v385_v26 = vcombine.low %v3176_v61, %v3179_v62 }
 0x2f5   :  { %v657_v35 = vcombine.low %v632_v27, %v640_v28  ;;  %v673_v37 = vcombine.low %v648_v29, %v656_v30  ;;  %v658_v38 = vcombine.high %v632_v27, %v640_v28  ;;  %v674_v40 = vcombine.high %v648_v29, %v656_v30 }
 0x2f6   :  { %v589_v47 = vcombine.low %v565_v31, %v581_v33  ;;  %v590_v48 = vcombine.high %v565_v31, %v581_v33  ;;  %v605_v50 = vcombine.low %v572_v32, %v588_v34  ;;  %v606_v52 = vcombine.high %v572_v32, %v588_v34 }
 0x2f7   :  { %v665_v53 = vrot.slane %v657_v35, %v3147_v0  ;;  %v681_v54 = vrot.slane %v673_v37, %v3147_v0  ;;  %v672_v55 = vrot.slane %v658_v38, %v3147_v0  ;;  %v688_v57 = vrot.slane %v674_v40, %v3147_v0 }
 0x2f8   :  { %v597_v58 = vrot.slane %v589_v47, %v3147_v0  ;;  %v604_v59 = vrot.slane %v590_v48, %v3147_v0  ;;  %v613_v60 = vrot.slane %v605_v50, %v3147_v0  ;;  %v620_v63 = vrot.slane %v606_v52, %v3147_v0 }
 0x2f9   :  { %v689_v3 = vcombine.low %v665_v53, %v681_v54  ;;  %v691_v4 = vcombine.low %v672_v55, %v688_v57  ;;  %v690_v22 = vcombine.high %v665_v53, %v681_v54  ;;  %v387_v27 = vcombine.low %v3184_v7, %v3187_v8 }
 0x2fa   :  { %v693_v5 = vcombine.low %v597_v58, %v604_v59  ;;  %v2603_v6 = vcombine.high %v597_v58, %v604_v59  ;;  %v709_v9 = vcombine.low %v613_v60, %v620_v63  ;;  %v2604_v10 = vcombine.high %v613_v60, %v620_v63 }
 0x2fb   :  { %v761_v16 = vpack.c.bf16 %v689_v3, %v689_v3  ;;  %v763_v17 = vpack.c.bf16 %v691_v4, %v691_v4  ;;  %v421_v31 = vcombine.low %v3210_v1, %v404_v2  ;;  %v437_v32 = vcombine.low %v412_v11, %v420_v12 }
 0x2fc   :  { %v700_v18 = vrot.slane %v693_v5, %v3136_v56  ;;  %v708_v19 = vrot.slane %v2603_v6, %v3136_v56  ;;  %v716_v13 = vrot.slane %v709_v9, %v3136_v56  ;;  %v724_v14 = vrot.slane %v2604_v10, %v3136_v56 }
 0x2fd   :  { %v1083_v20 = vsel %vm1078_vm2, %v761_v16, 0  ;;  %v1175_v21 = vsel %vm1078_vm2, %v763_v17, 0  ;;  %v762_v33 = vpack.c.bf16 %v690_v22, %v690_v22  ;;  %v457_v38 = vpack.c.bf16 %v385_v26, %v385_v26 }
 0x2fe   :  { %2707 = vmatpush3.bf16.xpose.msra.mxu0 %v1083_v20  ;;  %2719 = vmatpush3.bf16.xpose.msra.mxu1 %v1175_v21  ;;  %v725_v23 = vcombine.low %v700_v18, %v708_v19  ;;  %v741_v25 = vcombine.low %v716_v13, %v724_v14  ;;  %v726_v24 = vcombine.high %v700_v18, %v708_v19  ;;  %v1076_v21 = vand.u32 127, %v190_v49 }
 0x2ff   :  { %2712 = vmatprep.subr.bf16.mxu0 %v2972_v15  ;;  %2730 = vmatprep.subr.bf16.mxu1 %v2972_v15  ;;  %v742_v28 = vcombine.high %v716_v13, %v724_v14  ;;  %v459_v40 = vpack.c.bf16 %v387_v27, %v387_v27  ;;  %v429_v48 = vrot.slane %v421_v31, %v3147_v0  ;;  %v1129_v52 = vsel %vm1078_vm2, %v762_v33, 0 }
 0x300   :  { %v733_v29 = vrot.slane %v725_v23, %v3147_v0  ;;  %v749_v30 = vrot.slane %v741_v25, %v3147_v0  ;;  %v740_v35 = vrot.slane %v726_v24, %v3147_v0  ;;  %v445_v50 = vrot.slane %v437_v32, %v3147_v0 }
 0x301   :  { %v756_v37 = vrot.slane %v742_v28, %v3147_v0  ;;  %v692_v53 = vcombine.high %v672_v55, %v688_v57  ;;  %v386_v59 = vcombine.high %v3176_v61, %v3179_v62  ;;  %v422_v55 = vcombine.high %v3210_v1, %v404_v2 }
 0x302   :  { %v757_v34 = vcombine.low %v733_v29, %v749_v30  ;;  %v453_v60 = vcombine.low %v429_v48, %v445_v50  ;;  %v438_v57 = vcombine.high %v412_v11, %v420_v12  ;;  %v758_v62 = vcombine.high %v733_v29, %v749_v30 }
 0x303   :  { %v759_v58 = vcombine.low %v740_v35, %v756_v37  ;;  %v764_v63 = vpack.c.bf16 %v692_v53, %v692_v53  ;;  %v458_v4 = vpack.c.bf16 %v386_v59, %v386_v59  ;;  %v436_v6 = vrot.slane %v422_v55, %v3147_v0 }
 0x304   :  { %v765_v47 = vpack.c.bf16 %v757_v34, %v757_v34  ;;  %v461_v5 = vpack.c.bf16 %v453_v60, %v453_v60  ;;  %v452_v9 = vrot.slane %v438_v57, %v3147_v0  ;;  %v388_v1 = vcombine.high %v3184_v7, %v3187_v8 }
 0x305   :  { %2709 = vmatmul.mubr.msk.bf16.vlgmr.msra.gmra.mxu0 %vm1078_vm2, %v457_v38  ;;  %2721 = vmatmul.mubr.msk.bf16.vlgmr.msra.gmra.mxu1 %vm1078_vm2, %v459_v40  ;;  %v767_v3 = vpack.c.bf16 %v759_v58, %v759_v58  ;;  %v1221_v61 = vsel %vm1078_vm2, %v764_v63, 0  ;;  %v766_v11 = vpack.c.bf16 %v758_v62, %v758_v62  ;;  %v760_v7 = vcombine.high %v740_v35, %v756_v37 }
 0x306   :  { %2713 = vmatpush3.bf16.xpose.msra.mxu0 %v1129_v52  ;;  %v1267_v54 = vsel %vm1078_vm2, %v765_v47, 0  ;;  %2714 = vmatprep.mubr.msk.bf16.mxu0 %vm2973_vm1, %v2972_v15  ;;  %v455_v2 = vcombine.low %v436_v6, %v452_v9  ;;  %v460_v12 = vpack.c.bf16 %v388_v1, %v388_v1  ;;  %v454_v8 = vcombine.high %v429_v48, %v445_v50 }
 0x307   :  { %2731 = vmatpush3.bf16.xpose.msra.mxu1 %v1267_v54  ;;  %2732 = vmatprep.mubr.msk.bf16.mxu1 %vm2973_vm1, %v2972_v15  ;;  %v1359_v10 = vsel %vm1078_vm2, %v767_v3, 0  ;;  %v1313_v17 = vsel %vm1078_vm2, %v766_v11, 0  ;;  %v768_v18 = vpack.c.bf16 %v760_v7, %v760_v7  ;;  %v456_v14 = vcombine.high %v436_v6, %v452_v9 }
 0x308   :  { %2724 = vmatprep.subr.bf16.mxu0 %v2972_v15  ;;  %2742 = vmatprep.subr.bf16.mxu1 %v2972_v15  ;;  %v463_v16 = vpack.c.bf16 %v455_v2, %v455_v2  ;;  %v462_v19 = vpack.c.bf16 %v454_v8, %v454_v8  ;;  %vm3279_vm3 = vcmp.ge.s32.totalorder %v3129_v51, %v1076_v21 }
 0x309   :  { %v1405_v13 = vsel %vm1078_vm2, %v768_v18, 0  ;;  %v464_v20 = vpack.c.bf16 %v456_v14, %v456_v14 }
 0x30d   :  { %2715 = vmatmul.mubr.msk.bf16.vlgmr.msra.gmra.mxu0 %vm1078_vm2, %v458_v4 }
 0x30e   :  { %2733 = vmatmul.mubr.msk.bf16.vlgmr.msra.gmra.mxu1 %vm1078_vm2, %v461_v5  ;;  %2725 = vmatpush3.bf16.xpose.msra.mxu0 %v1221_v61 }
 0x30f   :  { %2743 = vmatpush3.bf16.xpose.msra.mxu1 %v1359_v10  ;;  %2726 = vmatprep.mubr.msk.bf16.mxu0 %vm2973_vm1, %v2972_v15 }
 0x310   :  { %2744 = vmatprep.mubr.msk.bf16.mxu1 %vm2973_vm1, %v2972_v15  ;;  %2736 = vmatprep.subr.bf16.mxu0 %v2972_v15 }
 0x311   :  { %2754 = vmatprep.subr.bf16.mxu1 %v2972_v15 }
 0x315   :  { %2727 = vmatmul.mubr.msk.bf16.vlgmr.msra.gmra.mxu0 %vm1078_vm2, %v460_v12 }
 0x316   :  { %2745 = vmatmul.mubr.msk.bf16.vlgmr.msra.gmra.mxu1 %vm1078_vm2, %v463_v16  ;;  %2737 = vmatpush3.bf16.xpose.msra.mxu0 %v1313_v17 }
 0x317   :  { %2738 = vmatprep.mubr.msk.bf16.mxu0 %vm2973_vm1, %v2972_v15  ;;  %2748 = vmatprep.subr.bf16.mxu0 %v2972_v15 }
 0x318   :  { %2756 = vmatprep.mubr.msk.bf16.mxu1 %vm2973_vm1, %v2972_v15 }
 0x31d   :  { %2739 = vmatmul.mubr.msk.bf16.vlgmr.msra.gmra.mxu0 %vm1078_vm2, %v462_v19 }
 0x31e   :  { %2749 = vmatpush3.bf16.xpose.msra.mxu0 %v1405_v13  ;;  %2750 = vmatprep.mubr.msk.bf16.mxu0 %vm2973_vm1, %v2972_v15 }
 0x31f   :  { %2760 = vmatprep.subr.bf16.mxu0 %v2972_v15 }
 0x325   :  { %2751 = vmatmul.mubr.msk.bf16.vlgmr.msra.gmra.mxu0 %vm1078_vm2, %v464_v20 }
 0x326   :  { %2762 = vmatprep.mubr.msk.bf16.mxu0 %vm2973_vm1, %v2972_v15 }
 0x3c5   :  { %v1119_v22 = vpop.f32.mrf.mxu0  ;;  %v1211_v23 = vpop.f32.mrf.mxu1 }
 0x3c6   :  { %v1447_v24 = vmul.f32 0.35355338, %v1119_v22  ;;  %v1449_v26 = vmul.f32 0.35355338, %v1211_v23 }
 0x3c7   :  { %v2710_v27 = vpop.f32.mrf.mxu0  ;;  %v2722_v28 = vpop.f32.mrf.mxu1 }
 0x3c8   :  { %v3285_v29 = vsel %vm3279_vm3, %v1447_v24, -inf  ;;  %v3291_v51 = vsel %vm3279_vm3, %v1449_v26, -inf }
 0x3c9   :  { %v1122_v30 = vpop.f32.mrf.mxu0  ;;  %v1214_v31 = vpop.f32.mrf.mxu1  ;;  %v1465_v49 = vsel %vm1078_vm2, %v3285_v29, -inf  ;;  %v1471_v35 = vsel %vm1078_vm2, %v3291_v51, -inf }
 0x3ca   :  { %1466 = vmax.xlane.f32.xlu0 %v1465_v49 }
 0x3cb   :  { %v2711_v32 = vpop.f32.mrf.mxu0  ;;  %v2723_v33 = vpop.f32.mrf.mxu1 }
 0x3cd   :  { %v1165_v34 = vpop.f32.mrf.mxu0 }
 0x3ce   :  { %v1448_v37 = vmul.f32 0.35355338, %v1165_v34  ;;  %v1303_v38 = vpop.f32.mrf.mxu1  ;;  %1472 = vmax.xlane.f32.xlu0 %v1471_v35 }
 0x3cf   :  { %v1451_v40 = vmul.f32 0.35355338, %v1303_v38  ;;  %v2716_v47 = vpop.f32.mrf.mxu0 }
 0x3d0   :  { %v2734_v48 = vpop.f32.mrf.mxu1  ;;  %v1458_v50 = vsel %vm3279_vm3, %v1448_v37, -inf }
 0x3d1   :  { %v1168_v52 = vpop.f32.mrf.mxu0  ;;  %v1461_v53 = vsel %vm3279_vm3, %v1451_v40, -inf  ;;  %v1468_v54 = vsel %vm1078_vm2, %v1458_v50, -inf }
 0x3d2   :  { %v1306_v58 = vpop.f32.mrf.mxu1  ;;  %v1477_v59 = vsel %vm1078_vm2, %v1461_v53, -inf  ;;  %1469 = vmax.xlane.f32.xlu1 %v1468_v54 }
 0x3d3   :  { %1478 = vmax.xlane.f32.xlu0 %v1477_v59  ;;  %v2717_v60 = vpop.f32.mrf.mxu0 }
 0x3d4   :  { %v2735_v55 = vpop.f32.mrf.mxu1 }
 0x3d5   :  { %v1257_v57 = vpop.f32.mrf.mxu0 }
 0x3d6   :  { %v1450_v63 = vmul.f32 0.35355338, %v1257_v57  ;;  %v1395_v3 = vpop.f32.mrf.mxu1 }
 0x3d7   :  { %v1453_v4 = vmul.f32 0.35355338, %v1395_v3  ;;  %v2728_v5 = vpop.f32.mrf.mxu0 }
 0x3d8   :  { %v2746_v6 = vpop.f32.mrf.mxu1  ;;  %v1460_v9 = vsel %vm3279_vm3, %v1450_v63, -inf }
 0x3d9   :  { %v1260_v61 = vpop.f32.mrf.mxu0  ;;  %v1474_v62 = vsel %vm1078_vm2, %v1460_v9, -inf  ;;  %v3306_v1 = vsel %vm3279_vm3, %v1453_v4, -inf }
 0x3da   :  { %v1398_v10 = vpop.f32.mrf.mxu1  ;;  %1475 = vmax.xlane.f32.xlu0 %v1474_v62  ;;  %v1483_v16 = vsel %vm1078_vm2, %v3306_v1, -inf }
 0x3db   :  { %v2729_v2 = vpop.f32.mrf.mxu0 }
 0x3dc   :  { %v2747_v11 = vpop.f32.mrf.mxu1 }
 0x3dd   :  { %v1349_v12 = vpop.f32.mrf.mxu0 }
 0x3de   :  { %1484 = vmax.xlane.f32.xlu0 %v1483_v16  ;;  %v1452_v20 = vmul.f32 0.35355338, %v1349_v12 }
 0x3df   :  { %v2740_v17 = vpop.f32.mrf.mxu0 }
 0x3e0   :  { %v1462_v22 = vsel %vm3279_vm3, %v1452_v20, -inf }
 0x3e1   :  { %v1352_v7 = vpop.f32.mrf.mxu0  ;;  %v1480_v23 = vsel %vm1078_vm2, %v1462_v22, -inf }
 0x3e3   :  { %773 = vrot.lane.b32.xlu1 %v3111_v42, %s2980_s27  ;;  %v2741_v8 = vpop.f32.mrf.mxu0 }
 0x3e5   :  { %v1441_v18 = vpop.f32.mrf.mxu0 }
 0x3e6   :  { %v1454_v21 = vmul.f32 0.35355338, %v1441_v18 }
 0x3e7   :  { %777 = vrot.lane.b32.xlu1 %v3109_v41, %s2980_s27  ;;  %v2752_v19 = vpop.f32.mrf.mxu0 }
 0x3e8   :  { %v1464_v42 = vsel %vm3279_vm3, %v1454_v21, -inf }
 0x3e9   :  { %v1444_v13 = vpop.f32.mrf.mxu0  ;;  %v1486_v24 = vsel %vm1078_vm2, %v1464_v42, -inf }
 0x3eb   :  { %v2753_v14 = vpop.f32.mrf.mxu0 }
 0x3f4   :  { %769 = vrot.lane.b32.xlu0 %v3098_v36, %s2980_s27 }
 0x40b   :  { %1481 = vmax.xlane.f32.xlu1 %v1480_v23 }
 0x40f   :  { %1487 = vmax.xlane.f32.xlu1 %v1486_v24 }
 0x420   :  { %781 = vrot.lane.b32.xlu1 %v3115_v43, %s2980_s27 }
 0x453   :  { %v1467_v41 = vpop.xlane.xlu0 %1466 }
 0x454   :  { %v1489_v36 = vsub.f32 %v3285_v29, %v1467_v41 }
 0x456   :  { %v1497_v26 = vmul.f32 1.442695, %v1489_v36 }
 0x457   :  { %v1473_v27 = vpop.xlane.xlu0 %1472 }
 0x458   :  { %2886 = vpow2.f32 %v1497_v26  ;;  %v1491_v28 = vsub.f32 %v3291_v51, %v1473_v27 }
 0x45a   :  { %v1501_v30 = vmul.f32 1.442695, %v1491_v28 }
 0x45b   :  { %v1470_v31 = vpop.xlane.xlu1 %1469 }
 0x45c   :  { %2888 = vpow2.f32 %v1501_v30  ;;  %v1479_v49 = vpop.xlane.xlu0 %1478  ;;  %v1490_v25 = vsub.f32 %v1458_v50, %v1470_v31 }
 0x45d   :  { %v1493_v32 = vsub.f32 %v1461_v53, %v1479_v49 }
 0x45e   :  { %v1499_v33 = vmul.f32 1.442695, %v1490_v25 }
 0x45f   :  { %v1505_v34 = vmul.f32 1.442695, %v1493_v32  ;;  %v774_v58 = vpop.permute.xlu1 %773 }
 0x460   :  { %2890 = vpow2.f32 %v1499_v33 }
 0x461   :  { %2892 = vpow2.f32 %v1505_v34 }
 0x463   :  { %v1476_v35 = vpop.xlane.xlu0 %1475  ;;  %v778_v59 = vpop.permute.xlu1 %777 }
 0x464   :  { %v1492_v43 = vsub.f32 %v1460_v9, %v1476_v35 }
 0x465   :  { %v3326_v37 = vpop.eup %2886 }
 0x466   :  { %v1503_v29 = vmul.f32 1.442695, %v1492_v43  ;;  %v1513_v38 = vsel %vm1078_vm2, %v3326_v37, 0.0 }
 0x467   :  { %1514 = vadd.xlane.f32.xlu0 %v1513_v38  ;;  %v3352_v60 = vpop.xlane.xlu0 %1484 }
 0x468   :  { %2894 = vpow2.f32 %v1503_v29 }
 0x469   :  { %v3330_v51 = vpop.eup %2888 }
 0x46a   :  { %v1519_v40 = vsel %vm1078_vm2, %v3330_v51, 0.0 }
 0x46b   :  { %1520 = vadd.xlane.f32.xlu0 %v1519_v40  ;;  %v770_v3 = vpop.permute.xlu0 %769 }
 0x46c   :  { %v793_v6 = vcombine.low %v770_v3, %v778_v59  ;;  %v794_v9 = vcombine.high %v770_v3, %v778_v59  ;;  %v1495_v59 = vsub.f32 %v3306_v1, %v3352_v60 }
 0x46d   :  { %v3334_v47 = vpop.eup %2890 }
 0x46e   :  { %v3336_v48 = vpop.eup %2892  ;;  %v1516_v50 = vsel %vm1078_vm2, %v3334_v47, 0.0  ;;  %v808_v2 = vrot.slane %v794_v9, %v3136_v56 }
 0x46f   :  { %v1525_v52 = vsel %vm1078_vm2, %v3336_v48, 0.0  ;;  %1517 = vadd.xlane.f32.xlu1 %v1516_v50 }
 0x470   :  { %1526 = vadd.xlane.f32.xlu0 %v1525_v52 }
 0x475   :  { %v3342_v53 = vpop.eup %2894 }
 0x476   :  { %v1522_v54 = vsel %vm1078_vm2, %v3342_v53, 0.0 }
 0x477   :  { %1523 = vadd.xlane.f32.xlu1 %v1522_v54 }
 0x488   :  { %775 = vrot.lane.b32.xlu1 %v3121_v45, %s2980_s27 }
 0x48c   :  { %779 = vrot.lane.b32.xlu1 %v3119_v44, %s2980_s27  ;;  %v801_v44 = vrot.slane %v793_v6, %v3136_v56 }
 0x490   :  { %783 = vrot.lane.b32.xlu1 %v3125_v46, %s2980_s27 }
 0x494   :  { %v1482_v55 = vpop.xlane.xlu1 %1481 }
 0x495   :  { %v1494_v57 = vsub.f32 %v1462_v22, %v1482_v55  ;;  %v1509_v55 = vmul.f32 1.442695, %v1495_v59 }
 0x497   :  { %v1507_v63 = vmul.f32 1.442695, %v1494_v57 }
 0x498   :  { %v1488_v4 = vpop.xlane.xlu1 %1487 }
 0x499   :  { %2896 = vpow2.f32 %v1507_v63  ;;  %v1496_v5 = vsub.f32 %v1464_v42, %v1488_v4 }
 0x49b   :  { %v1511_v10 = vmul.f32 1.442695, %v1496_v5 }
 0x49c   :  { %v782_v45 = vpop.permute.xlu1 %781 }
 0x49d   :  { %v809_v61 = vcombine.low %v774_v58, %v782_v45  ;;  %v810_v62 = vcombine.high %v774_v58, %v782_v45  ;;  %2898 = vpow2.f32 %v1511_v10 }
 0x49e   :  { %2900 = vpow2.f32 %v1509_v55 }
 0x49f   :  { %v817_v46 = vrot.slane %v809_v61, %v3136_v56  ;;  %v824_v11 = vrot.slane %v810_v62, %v3136_v56 }
 0x4a1   :  { %v825_v12 = vcombine.low %v801_v44, %v817_v46  ;;  %v826_v16 = vcombine.high %v801_v44, %v817_v46  ;;  %v841_v17 = vcombine.low %v808_v2, %v824_v11  ;;  %v842_v7 = vcombine.high %v808_v2, %v824_v11 }
 0x4a3   :  { %v833_v8 = vrot.slane %v825_v12, %v3147_v0  ;;  %v840_v18 = vrot.slane %v826_v16, %v3147_v0  ;;  %v849_v19 = vrot.slane %v841_v17, %v3147_v0  ;;  %v856_v13 = vrot.slane %v842_v7, %v3147_v0 }
 0x4a5   :  { %v929_v14 = vcombine.low %v833_v8, %v840_v18  ;;  %v2605_v20 = vcombine.high %v833_v8, %v840_v18  ;;  %v945_v21 = vcombine.low %v849_v19, %v856_v13  ;;  %v2606_v22 = vcombine.high %v849_v19, %v856_v13 }
 0x4a6   :  { %v3362_v23 = vpop.eup %2896 }
 0x4a7   :  { %v936_v42 = vrot.slane %v929_v14, %v3136_v56  ;;  %v944_v24 = vrot.slane %v2605_v20, %v3136_v56  ;;  %v952_v41 = vrot.slane %v945_v21, %v3136_v56  ;;  %v960_v36 = vrot.slane %v2606_v22, %v3136_v56 }
 0x4a8   :  { %v1528_v26 = vsel %vm1078_vm2, %v3362_v23, 0.0 }
 0x4a9   :  { %1529 = vadd.xlane.f32.xlu0 %v1528_v26  ;;  %v961_v27 = vcombine.low %v936_v42, %v944_v24  ;;  %v977_v28 = vcombine.low %v952_v41, %v960_v36  ;;  %v962_v30 = vcombine.high %v936_v42, %v944_v24  ;;  %v978_v31 = vcombine.high %v952_v41, %v960_v36 }
 0x4aa   :  { %v3374_v38 = vpop.eup %2898 }
 0x4ab   :  { %v969_v49 = vrot.slane %v961_v27, %v3147_v0  ;;  %v985_v25 = vrot.slane %v977_v28, %v3147_v0  ;;  %v976_v32 = vrot.slane %v962_v30, %v3147_v0  ;;  %v992_v33 = vrot.slane %v978_v31, %v3147_v0  ;;  %v3386_v57 = vpop.eup %2900 }
 0x4ac   :  { %v1534_v58 = vsel %vm1078_vm2, %v3374_v38, 0.0  ;;  %v1531_v63 = vsel %vm1078_vm2, %v3386_v57, 0.0 }
 0x4ad   :  { %v993_v34 = vcombine.low %v969_v49, %v985_v25  ;;  %v994_v35 = vcombine.high %v969_v49, %v985_v25  ;;  %v995_v43 = vcombine.low %v976_v32, %v992_v33  ;;  %v996_v29 = vcombine.high %v976_v32, %v992_v33 }
 0x4af   :  { %v1065_v40 = vpack.c.bf16 %v993_v34, %v993_v34  ;;  %v1066_v50 = vpack.c.bf16 %v994_v35, %v994_v35  ;;  %v1067_v1 = vpack.c.bf16 %v995_v43, %v995_v43  ;;  %v1068_v46 = vpack.c.bf16 %v996_v29, %v996_v29 }
 0x4b1   :  { %v1582_v52 = vsel %vm1580_vm4, %v1065_v40, 0  ;;  %v1628_v54 = vsel %vm1580_vm4, %v1066_v50, 0  ;;  %v1674_v62 = vsel %vm1580_vm4, %v1067_v1, 0  ;;  %v1720_v16 = vsel %vm1580_vm4, %v1068_v46, 0 }
 0x4b2   :  { %2755 = vmatpush3.bf16.msra.mxu1 %v1582_v52  ;;  %2761 = vmatpush3.bf16.msra.mxu0 %v1628_v54 }
 0x4b3   :  { %2766 = vmatprep.subr.bf16.mxu1 %v2972_v15  ;;  %2772 = vmatprep.subr.bf16.mxu0 %v2972_v15 }
 0x4b4   :  { %1535 = vadd.xlane.f32.xlu1 %v1534_v58 }
 0x4bf   :  { %771 = vrot.lane.b32.xlu0 %v3102_v39, %s2980_s27 }
 0x4de   :  { %1532 = vadd.xlane.f32.xlu0 %v1531_v63 }
 0x4f0   :  { %v1515_v3 = vpop.xlane.xlu0 %1514 }
 0x4f1   :  { %2902 = vrcp.f32 %v1515_v3 }
 0x4f4   :  { %v1521_v4 = vpop.xlane.xlu0 %1520 }
 0x4f5   :  { %2904 = vrcp.f32 %v1521_v4 }
 0x4f8   :  { %v1518_v5 = vpop.xlane.xlu1 %1517 }
 0x4f9   :  { %v1527_v6 = vpop.xlane.xlu0 %1526  ;;  %2906 = vrcp.f32 %v1518_v5 }
 0x4fa   :  { %2908 = vrcp.f32 %v1527_v6 }
 0x4fe   :  { %v2903_v39 = vpop.eup %2902 }
 0x4ff   :  { %v1553_v9 = vmul.f32 %v2903_v39, %v3326_v37 }
 0x500   :  { %v1524_v60 = vpop.xlane.xlu1 %1523 }
 0x501   :  { %2910 = vrcp.f32 %v1524_v60  ;;  %1561 = vst.msk [vmem:[#allocation4] sm:$0xff] %vm1078_vm2, %v1553_v9  ;;  %v1569_v45 = vpack.c.bf16 %v1553_v9, %v1553_v9 }
 0x502   :  { %v2905_v61 = vpop.eup %2904 }
 0x503   :  { %2757 = vmatmul.mubr.msk.bf16.vlgmr.msra.gmra.mxu1 %vm1078_vm2, %v1569_v45  ;;  %v1555_v10 = vmul.f32 %v2905_v61, %v3330_v51 }
 0x504   :  { %2767 = vmatpush3.bf16.msra.mxu1 %v1674_v62  ;;  %2768 = vmatprep.mubr.msk.bf16.mxu1 %vm2973_vm1, %v2972_v15  ;;  %v776_v7 = vpop.permute.xlu1 %775 }
 0x505   :  { %1563 = vst.msk [vmem:[#allocation4 + $0x10] sm:$0xff] %vm1078_vm2, %v1555_v10  ;;  %2778 = vmatprep.subr.bf16.mxu1 %v2972_v15  ;;  %v1571_v51 = vpack.c.bf16 %v1555_v10, %v1555_v10 }
 0x506   :  { %v2907_v37 = vpop.eup %2906 }
 0x507   :  { %v2909_v44 = vpop.eup %2908  ;;  %v1554_v2 = vmul.f32 %v2907_v37, %v3334_v47 }
 0x508   :  { %v3401_v11 = vmul.f32 %v2909_v44, %v3336_v48  ;;  %v780_v8 = vpop.permute.xlu1 %779 }
 0x509   :  { %1562 = vst.msk [vmem:[#allocation4 + $0x8] sm:$0xff] %vm1078_vm2, %v1554_v2  ;;  %v1570_v12 = vpack.c.bf16 %v1554_v2, %v1554_v2 }
 0x50a   :  { %1565 = vst.msk [vmem:[#allocation4 + $0x20] sm:$0xff] %vm1078_vm2, %v3401_v11 }
 0x50b   :  { %2763 = vmatmul.mubr.msk.bf16.vlgmr.msra.gmra.mxu0 %vm1078_vm2, %v1570_v12  ;;  %2769 = vmatmul.mubr.msk.bf16.vlgmr.msra.gmra.mxu1 %vm1078_vm2, %v1571_v51  ;;  %v1573_v12 = vpack.c.bf16 %v3401_v11, %v3401_v11 }
 0x50c   :  { %2773 = vmatpush3.bf16.msra.mxu0 %v1720_v16  ;;  %2774 = vmatprep.mubr.msk.bf16.mxu0 %vm2973_vm1, %v2972_v15  ;;  %v784_v18 = vpop.permute.xlu1 %783 }
 0x50d   :  { %2784 = vmatprep.subr.bf16.mxu0 %v2972_v15  ;;  %2780 = vmatprep.mubr.msk.bf16.mxu1 %vm2973_vm1, %v2972_v15  ;;  %v877_v13 = vcombine.low %v776_v7, %v784_v18  ;;  %v878_v14 = vcombine.high %v776_v7, %v784_v18 }
 0x50e   :  { %v2911_v47 = vpop.eup %2910 }
 0x50f   :  { %v1556_v48 = vmul.f32 %v2911_v47, %v3342_v53  ;;  %v885_v53 = vrot.slane %v877_v13, %v3136_v56  ;;  %v892_v42 = vrot.slane %v878_v14, %v3136_v56 }
 0x511   :  { %1564 = vst.msk [vmem:[#allocation4 + $0x18] sm:$0xff] %vm1078_vm2, %v1556_v48  ;;  %v1572_v17 = vpack.c.bf16 %v1556_v48, %v1556_v48 }
 0x513   :  { %2775 = vmatmul.mubr.msk.bf16.vlgmr.msra.gmra.mxu0 %vm1078_vm2, %v1572_v17 }
 0x514   :  { %2786 = vmatprep.mubr.msk.bf16.mxu0 %vm2973_vm1, %v2972_v15 }
 0x532   :  { %v1530_v19 = vpop.xlane.xlu0 %1529 }
 0x533   :  { %2912 = vrcp.f32 %v1530_v19 }
 0x536   :  { %v772_v20 = vpop.permute.xlu0 %771 }
 0x537   :  { %v861_v21 = vcombine.low %v772_v20, %v780_v8  ;;  %v862_v22 = vcombine.high %v772_v20, %v780_v8 }
 0x539   :  { %v869_v24 = vrot.slane %v861_v21, %v3136_v56  ;;  %v876_v41 = vrot.slane %v862_v22, %v3136_v56 }
 0x53b   :  { %v893_v36 = vcombine.low %v869_v24, %v885_v53  ;;  %v894_v26 = vcombine.high %v869_v24, %v885_v53  ;;  %v909_v27 = vcombine.low %v876_v41, %v892_v42  ;;  %v910_v28 = vcombine.high %v876_v41, %v892_v42 }
 0x53d   :  { %v901_v30 = vrot.slane %v893_v36, %v3147_v0  ;;  %v908_v31 = vrot.slane %v894_v26, %v3147_v0  ;;  %v917_v49 = vrot.slane %v909_v27, %v3147_v0  ;;  %v924_v25 = vrot.slane %v910_v28, %v3147_v0  ;;  %v1536_v32 = vpop.xlane.xlu1 %1535 }
 0x53e   :  { %2914 = vrcp.f32 %v1536_v32 }
 0x53f   :  { %v997_v33 = vcombine.low %v901_v30, %v908_v31  ;;  %v2607_v34 = vcombine.high %v901_v30, %v908_v31  ;;  %v1013_v35 = vcombine.low %v917_v49, %v924_v25  ;;  %v2608_v43 = vcombine.high %v917_v49, %v924_v25 }
 0x540   :  { %v2913_v29 = vpop.eup %2912 }
 0x541   :  { %v1004_v40 = vrot.slane %v997_v33, %v3136_v56  ;;  %v1012_v50 = vrot.slane %v2607_v34, %v3136_v56  ;;  %v1020_v52 = vrot.slane %v1013_v35, %v3136_v56  ;;  %v1028_v54 = vrot.slane %v2608_v43, %v3136_v56 }
 0x542   :  { %v1558_v58 = vmul.f32 %v2913_v29, %v3362_v23 }
 0x543   :  { %v1029_v59 = vcombine.low %v1004_v40, %v1012_v50  ;;  %v1045_v55 = vcombine.low %v1020_v52, %v1028_v54  ;;  %v1030_v63 = vcombine.high %v1004_v40, %v1012_v50  ;;  %v1046_v3 = vcombine.high %v1020_v52, %v1028_v54 }
 0x544   :  { %1566 = vst.msk [vmem:[#allocation4 + $0x28] sm:$0xff] %vm1078_vm2, %v1558_v58  ;;  %v1574_v51 = vpack.c.bf16 %v1558_v58, %v1558_v58 }
 0x545   :  { %v1037_v4 = vrot.slane %v1029_v59, %v3147_v0  ;;  %v1053_v5 = vrot.slane %v1045_v55, %v3147_v0  ;;  %v1044_v6 = vrot.slane %v1030_v63, %v3147_v0  ;;  %v1060_v39 = vrot.slane %v1046_v3, %v3147_v0 }
 0x547   :  { %v1061_v9 = vcombine.low %v1037_v4, %v1053_v5  ;;  %v1062_v1 = vcombine.high %v1037_v4, %v1053_v5  ;;  %v1063_v60 = vcombine.low %v1044_v6, %v1060_v39  ;;  %v1064_v45 = vcombine.high %v1044_v6, %v1060_v39 }
 0x549   :  { %v1069_v61 = vpack.c.bf16 %v1061_v9, %v1061_v9  ;;  %v1070_v23 = vpack.c.bf16 %v1062_v1, %v1062_v1  ;;  %v1071_v44 = vpack.c.bf16 %v1063_v60, %v1063_v60  ;;  %v1072_v2 = vpack.c.bf16 %v1064_v45, %v1064_v45 }
 0x54b   :  { %v2915_v62 = vpop.eup %2914  ;;  %v1766_v10 = vsel %vm1580_vm4, %v1069_v61, 0  ;;  %v1812_v37 = vsel %vm1580_vm4, %v1070_v23, 0  ;;  %v1858_v16 = vsel %vm1580_vm4, %v1071_v44, 0  ;;  %v1904_v47 = vsel %vm1580_vm4, %v1072_v2, 0 }
 0x54c   :  { %2779 = vmatpush3.bf16.msra.mxu1 %v1766_v10  ;;  %2785 = vmatpush3.bf16.msra.mxu0 %v1812_v37  ;;  %v1560_v46 = vmul.f32 %v2915_v62, %v3374_v38 }
 0x54d   :  { %2790 = vmatprep.subr.bf16.mxu1 %v2972_v15  ;;  %2796 = vmatprep.subr.bf16.mxu0 %v2972_v15 }
 0x54e   :  { %1568 = vst.msk [vmem:[#allocation4 + $0x38] sm:$0xff] %vm1078_vm2, %v1560_v46  ;;  %v1576_v38 = vpack.c.bf16 %v1560_v46, %v1560_v46 }
 0x54f   :  { %2781 = vmatmul.mubr.msk.bf16.vlgmr.msra.gmra.mxu1 %vm1078_vm2, %v1573_v12  ;;  %2787 = vmatmul.mubr.msk.bf16.vlgmr.msra.gmra.mxu0 %vm1078_vm2, %v1574_v51 }
 0x550   :  { %2791 = vmatpush3.bf16.msra.mxu1 %v1858_v16  ;;  %2797 = vmatpush3.bf16.msra.mxu0 %v1904_v47 }
 0x551   :  { %2798 = vmatprep.mubr.msk.bf16.mxu0 %vm2973_vm1, %v2972_v15  ;;  %2792 = vmatprep.mubr.msk.bf16.mxu1 %vm2973_vm1, %v2972_v15 }
 0x552   :  { %2802 = vmatprep.subr.bf16.mxu1 %v2972_v15  ;;  %2810 = vmatprep.subr.bf16.mxu0 %v2972_v15 }
 0x557   :  { %2799 = vmatmul.mubr.msk.bf16.vlgmr.msra.gmra.mxu0 %vm1078_vm2, %v1576_v38 }
 0x558   :  { %2814 = vmatprep.mubr.msk.bf16.mxu0 %vm2973_vm1, %v2972_v15 }
 0x567   :  { %v1533_v11 = vpop.xlane.xlu0 %1532 }
 0x568   :  { %2916 = vrcp.f32 %v1533_v11 }
 0x575   :  { %v2917_v48 = vpop.eup %2916 }
 0x576   :  { %v1559_v17 = vmul.f32 %v2917_v48, %v3386_v57 }
 0x578   :  { %1567 = vst.msk [vmem:[#allocation4 + $0x30] sm:$0xff] %vm1078_vm2, %v1559_v17  ;;  %v1575_v7 = vpack.c.bf16 %v1559_v17, %v1559_v17 }
 0x57a   :  { %2793 = vmatmul.mubr.msk.bf16.vlgmr.msra.gmra.mxu1 %vm1078_vm2, %v1575_v7 }
 0x57b   :  { %2806 = vmatprep.mubr.msk.bf16.mxu1 %vm2973_vm1, %v2972_v15 }
 0x5c3   :  { %v1618_v8 = vpop.f32.mrf.mxu1 }
 0x5c5   :  { %v2758_v18 = vpop.f32.mrf.mxu1 }
 0x5c7   :  { %v1621_v19 = vpop.f32.mrf.mxu1 }
 0x5c9   :  { %v2759_v13 = vpop.f32.mrf.mxu1 }
 0x5cb   :  { %v1664_v14 = vpop.f32.mrf.mxu0  ;;  %v1710_v20 = vpop.f32.mrf.mxu1 }
 0x5cc   :  { %v1946_v21 = vcombine.low %v1618_v8, %v1710_v20  ;;  %v1947_v22 = vcombine.high %v1618_v8, %v1710_v20 }
 0x5cd   :  { %v2764_v53 = vpop.f32.mrf.mxu0  ;;  %v2770_v42 = vpop.f32.mrf.mxu1 }
 0x5ce   :  { %v1954_v31 = vrot.slane %v1946_v21, %v3136_v56  ;;  %v1961_v49 = vrot.slane %v1947_v22, %v3136_v56 }
 0x5cf   :  { %v1667_v24 = vpop.f32.mrf.mxu0  ;;  %v1713_v57 = vpop.f32.mrf.mxu1 }
 0x5d1   :  { %v2765_v41 = vpop.f32.mrf.mxu0  ;;  %v2771_v36 = vpop.f32.mrf.mxu1 }
 0x5d3   :  { %v1756_v26 = vpop.f32.mrf.mxu0 }
 0x5d4   :  { %v1962_v27 = vcombine.low %v1664_v14, %v1756_v26  ;;  %v1963_v28 = vcombine.high %v1664_v14, %v1756_v26 }
 0x5d5   :  { %v2776_v30 = vpop.f32.mrf.mxu0 }
 0x5d6   :  { %v1970_v25 = vrot.slane %v1962_v27, %v3136_v56  ;;  %v1977_v32 = vrot.slane %v1963_v28, %v3136_v56 }
 0x5d7   :  { %v1759_v33 = vpop.f32.mrf.mxu0 }
 0x5d8   :  { %v1978_v34 = vcombine.low %v1954_v31, %v1970_v25  ;;  %v1979_v35 = vcombine.high %v1954_v31, %v1970_v25  ;;  %v1994_v43 = vcombine.low %v1961_v49, %v1977_v32  ;;  %v1995_v29 = vcombine.high %v1961_v49, %v1977_v32 }
 0x5d9   :  { %v2777_v40 = vpop.f32.mrf.mxu0 }
 0x5da   :  { %v1986_v50 = vrot.slane %v1978_v34, %v3147_v0  ;;  %v1993_v52 = vrot.slane %v1979_v35, %v3147_v0  ;;  %v2002_v54 = vrot.slane %v1994_v43, %v3147_v0  ;;  %v2009_v58 = vrot.slane %v1995_v29, %v3147_v0  ;;  %v2870_v40 = vld [vmem:[%s3618_s3 + $0x8] sm:$0xff]  }
 0x5db   :  { %2803 = vmatpush3.bf16.msra.mxu1 %v2870_v40 }
 0x5dc   :  { %v2082_v59 = vcombine.low %v1986_v50, %v1993_v52  ;;  %v2625_v55 = vcombine.high %v1986_v50, %v1993_v52  ;;  %v2098_v63 = vcombine.low %v2002_v54, %v2009_v58  ;;  %v2626_v3 = vcombine.high %v2002_v54, %v2009_v58  ;;  %2804 = vmatprep.subr.bf16.mxu1 %v2972_v15 }
 0x5de   :  { %v2089_v4 = vrot.slane %v2082_v59, %v3136_v56  ;;  %v2097_v5 = vrot.slane %v2625_v55, %v3136_v56  ;;  %v2105_v6 = vrot.slane %v2098_v63, %v3136_v56  ;;  %v2113_v39 = vrot.slane %v2626_v3, %v3136_v56 }
 0x5e0   :  { %v2115_v9 = vcombine.high %v2089_v4, %v2097_v5  ;;  %v2131_v1 = vcombine.high %v2105_v6, %v2113_v39  ;;  %v2114_v60 = vcombine.low %v2089_v4, %v2097_v5  ;;  %v2130_v45 = vcombine.low %v2105_v6, %v2113_v39  ;;  %v2871_v4 = vld [vmem:[%s3618_s3] sm:$0xff]   ;;  %s2982_s3 = smov 8  }
 0x5e1   :  { %2805 = vmatpush3.bf16.msra.mxu1 %v2871_v4 }
 0x5e2   :  { %v3476_v61 = vrot.slane %v2115_v9, %v3147_v0  ;;  %v3479_v23 = vrot.slane %v2131_v1, %v3147_v0  ;;  %v3482_v62 = vrot.slane %v2114_v60, %v3147_v0  ;;  %v3485_v10 = vrot.slane %v2130_v45, %v3147_v0  ;;  %2818 = vmatprep.subr.bf16.mxu1 %v2972_v15 }
 0x5e4   :  { %v2148_v37 = vcombine.low %v3476_v61, %v3479_v23  ;;  %v2146_v44 = vcombine.low %v3482_v62, %v3485_v10  ;;  %v2147_v2 = vcombine.high %v3482_v62, %v3485_v10  ;;  %v2149_v46 = vcombine.high %v3476_v61, %v3479_v23  ;;  %v2629_v62 = vld [vmem:[%s3619_s4] ss:$0 sm:$0xff] }
 0x60f   :  { %v1802_v12 = vpop.f32.mrf.mxu1  ;;  %v1848_v51 = vpop.f32.mrf.mxu0 }
 0x611   :  { %v2782_v16 = vpop.f32.mrf.mxu1  ;;  %v2788_v47 = vpop.f32.mrf.mxu0 }
 0x613   :  { %v1805_v38 = vpop.f32.mrf.mxu1  ;;  %v1851_v11 = vpop.f32.mrf.mxu0 }
 0x615   :  { %v2783_v48 = vpop.f32.mrf.mxu1  ;;  %v2789_v17 = vpop.f32.mrf.mxu0 }
 0x617   :  { %v1940_v7 = vpop.f32.mrf.mxu0 }
 0x618   :  { %v2030_v13 = vcombine.low %v1848_v51, %v1940_v7  ;;  %v2031_v14 = vcombine.high %v1848_v51, %v1940_v7 }
 0x619   :  { %v2800_v8 = vpop.f32.mrf.mxu0 }
 0x61a   :  { %v2038_v42 = vrot.slane %v2030_v13, %v3136_v56  ;;  %v2045_v24 = vrot.slane %v2031_v14, %v3136_v56 }
 0x61b   :  { %v1943_v18 = vpop.f32.mrf.mxu0 }
 0x61d   :  { %v2801_v19 = vpop.f32.mrf.mxu0 }
 0x63a   :  { %v1894_v20 = vpop.f32.mrf.mxu1 }
 0x63b   :  { %v2014_v21 = vcombine.low %v1802_v12, %v1894_v20  ;;  %v2015_v22 = vcombine.high %v1802_v12, %v1894_v20  ;;  %v2926_v20 = vld [vmem:[%s3615_s0] sm:$0xff] }
 0x63c   :  { %v2794_v53 = vpop.f32.mrf.mxu1 }
 0x63d   :  { %v2022_v57 = vrot.slane %v2014_v21, %v3136_v56  ;;  %v2029_v41 = vrot.slane %v2015_v22, %v3136_v56 }
 0x63e   :  { %v1897_v36 = vpop.f32.mrf.mxu1 }
 0x63f   :  { %v2046_v26 = vcombine.low %v2022_v57, %v2038_v42  ;;  %v2047_v27 = vcombine.high %v2022_v57, %v2038_v42  ;;  %v2062_v28 = vcombine.low %v2029_v41, %v2045_v24  ;;  %v2063_v30 = vcombine.high %v2029_v41, %v2045_v24  ;;  %v2927_v57 = vld [vmem:[%s3615_s0 + $0x8] sm:$0xff] }
 0x640   :  { %v2795_v31 = vpop.f32.mrf.mxu1 }
 0x641   :  { %v2054_v49 = vrot.slane %v2046_v26, %v3147_v0  ;;  %v2061_v25 = vrot.slane %v2047_v27, %v3147_v0  ;;  %v2070_v32 = vrot.slane %v2062_v28, %v3147_v0  ;;  %v2077_v33 = vrot.slane %v2063_v30, %v3147_v0 }
 0x643   :  { %v2150_v34 = vcombine.low %v2054_v49, %v2061_v25  ;;  %v2627_v35 = vcombine.high %v2054_v49, %v2061_v25  ;;  %v2166_v43 = vcombine.low %v2070_v32, %v2077_v33  ;;  %v2628_v29 = vcombine.high %v2070_v32, %v2077_v33 }
 0x645   :  { %v2157_v50 = vrot.slane %v2150_v34, %v3136_v56  ;;  %v2165_v52 = vrot.slane %v2627_v35, %v3136_v56  ;;  %v2173_v54 = vrot.slane %v2166_v43, %v3136_v56  ;;  %v2181_v58 = vrot.slane %v2628_v29, %v3136_v56  ;;  %v2872_v35 = vld [vmem:[%s3624_s9 + $0x8] sm:$0xff]   ;;  %v2873_v43 = vld [vmem:[%s3624_s9] sm:$0xff]   ;;  %v2874_v29 = vld [vmem:[%s3626_s11 + $0x38] sm:$0xff]  }
 0x646   :  { %2811 = vmatpush3.bf16.msra.mxu0 %v2872_v35 }
 0x647   :  { %v2183_v59 = vcombine.high %v2157_v50, %v2165_v52  ;;  %v2199_v55 = vcombine.high %v2173_v54, %v2181_v58  ;;  %v2182_v63 = vcombine.low %v2157_v50, %v2165_v52  ;;  %v2198_v3 = vcombine.low %v2173_v54, %v2181_v58  ;;  %2812 = vmatprep.subr.bf16.mxu0 %v2972_v15 }
 0x649   :  { %v2197_v5 = vrot.slane %v2183_v59, %v3147_v0  ;;  %v2213_v6 = vrot.slane %v2199_v55, %v3147_v0  ;;  %v2190_v39 = vrot.slane %v2182_v63, %v3147_v0  ;;  %v2206_v9 = vrot.slane %v2198_v3, %v3147_v0  ;;  %v2633_v3 = vld [vmem:[%s3622_s7] ss:$0 sm:$0xff] }
 0x64a   :  { %2813 = vmatpush3.bf16.msra.mxu0 %v2873_v43 }
 0x64b   :  { %v2216_v56 = vcombine.low %v2197_v5, %v2213_v6  ;;  %v2215_v1 = vcombine.high %v2190_v39, %v2206_v9  ;;  %v2214_v60 = vcombine.low %v2190_v39, %v2206_v9  ;;  %v2217_v51 = vcombine.high %v2197_v5, %v2213_v6  ;;  %v2634_v39 = vld [vmem:[%s3623_s8] ss:$0 sm:$0xff] }
 0x64d   :  { %v2858_v45 = vpack.i.bf16 %v2216_v56, %v2148_v37  ;;  %v2853_v12 = vpack.i.bf16 %v2215_v1, %v2147_v2  ;;  %v2863_v16 = vpack.i.bf16 %v2217_v51, %v2149_v46  ;;  %v2877_v51 = vld [vmem:[%s3626_s11 + $0x20] sm:$0xff]  }
 0x64f   :  { %2859 = vrot.lane.b32.xlu1 %v2858_v45, %s2981_s16  ;;  %2854 = vrot.lane.b32.xlu0 %v2853_v12, %s2982_s3  ;;  %v2875_v45 = vld [vmem:[%s3626_s11 + $0x30] sm:$0xff]   ;;  %v2876_v12 = vld [vmem:[%s3626_s11 + $0x28] sm:$0xff]  }
 0x653   :  { %2864 = vrot.lane.b32.xlu0 %v2863_v16, %s2983_s17  ;;  %v2878_v16 = vld [vmem:[%s3626_s11 + $0x18] sm:$0xff]  }
 0x6c1   :  { %v2860_v0 = vpop.permute.xlu1 %2859  ;;  %v2855_v47 = vpop.permute.xlu0 %2854 }
 0x6c2   :  { %v2857_v38 = vunpack.i.h.bf16 %v2855_v47  ;;  %v2856_v11 = vunpack.i.l.bf16 %v2855_v47  ;;  %v2862_v48 = vunpack.i.h.bf16 %v2860_v0  ;;  %v2861_v17 = vunpack.i.l.bf16 %v2860_v0  ;;  %v2879_v0 = vld [vmem:[%s3626_s11 + $0x10] sm:$0xff]   ;;  %v2880_v47 = vld [vmem:[%s3626_s11 + $0x8] sm:$0xff]  }
 0x6c4   :  { %v2242_v37 = vsel %vm1078_vm2, %v2146_v44, %v2856_v11  ;;  %v2243_v2 = vsel %vm1078_vm2, %v2214_v60, %v2857_v38  ;;  %v2881_v38 = vld [vmem:[%s3626_s11] sm:$0xff]  }
 0x6c5   :  { %v2865_v7 = vpop.permute.xlu0 %2864  ;;  %v2245_v46 = vsel %vm2244_vm5, %v2242_v37, %v2861_v17  ;;  %v2246_v8 = vsel %vm2244_vm5, %v2243_v2, %v2862_v48  ;;  %v2635_v11 = vld [vmem:[%s3625_s10] ss:$0 sm:$0xff]  ;;  %s2984_s10 = smov [#allocation4]  }
 0x6c6   :  { %v2867_v61 = vunpack.i.h.bf16 %v2865_v7  ;;  %v2866_v23 = vunpack.i.l.bf16 %v2865_v7  ;;  %s2576_s11 = sshll.u32 %s2984_s10, 4  ;;  %s2577_s11 = int_to_ptr.vmem [resolvable:$true] %s2576_s11 }
 0x6c7   :  { %s2928_s4 = scalar_lea.vmem %s2577_s11, 1024  ;;  %p2933_p1 = scmp.lt.s32.totalorder %s2577_s11, %s2577_s11 }
 0x6c8   :  { %v2248_v18 = vsel %vm2247_vm6, %v2245_v46, %v2866_v23  ;;  %v2249_v19 = vsel %vm2247_vm6, %v2246_v8, %v2867_v61  ;;  %p2929_p0 = scmp.ne.s32.totalorder %s2577_s11, %s2928_s4  ;;  %p2934_p2 = scmp.lt.s32.totalorder %s2928_s4, %s2928_s4 }
 0x6c9   :  { %v2250_v13 = vpack.c.bf16 %v2249_v19, %v2248_v18 }
 0x6ca   :  { %p2935_p3 = por %p2934_p2, %p2933_p1 }
 0x6cb   :  { %2807 = vmatmul.mubr.msk.bf16.vlgmr.msra.gmra.mxu1 %vm53_vm0, %v2250_v13 }
 0x6cc   :  { %2834 = vmatprep.mubr.msk.bf16.mxu1 %vm2973_vm1, %v2972_v15  ;;  %2819 = vmatpush3.bf16.msra.mxu1 %v2874_v29  ;;  %p2936_p4 = pnand %p2935_p3, %p2929_p0 }
 0x6cd   :  { %2820 = vmatprep.subr.bf16.mxu1 %v2972_v15 }
 0x6d0   :  { %2821 = vmatpush3.bf16.msra.mxu1 %v2875_v45 }
 0x6d1   :  { %2822 = vmatprep.subr.bf16.mxu1 %v2972_v15 }
 0x6d4   :  { %2823 = vmatpush3.bf16.msra.mxu1 %v2876_v12 }
 0x6d5   :  { %2824 = vmatprep.subr.bf16.mxu1 %v2972_v15 }
 0x6d8   :  { %2825 = vmatpush3.bf16.msra.mxu1 %v2877_v51 }
 0x6d9   :  { %2826 = vmatprep.subr.bf16.mxu1 %v2972_v15 }
 0x6dc   :  { %2827 = vmatpush3.bf16.msra.mxu1 %v2878_v16 }
 0x6dd   :  { %2828 = vmatprep.subr.bf16.mxu1 %v2972_v15 }
 0x6e0   :  { %2829 = vmatpush3.bf16.msra.mxu1 %v2879_v0 }
 0x6e1   :  { %2830 = vmatprep.subr.bf16.mxu1 %v2972_v15 }
 0x6e4   :  { %2831 = vmatpush3.bf16.msra.mxu1 %v2880_v47 }
 0x6e5   :  { %2832 = vmatprep.subr.bf16.mxu1 %v2972_v15 }
 0x6e8   :  { %2833 = vmatpush3.bf16.msra.mxu1 %v2881_v38 }
 0x78b   :  { %v2311_v10 = vpop.f32.mrf.mxu1 }
 0x78c   :  { %v2312_v44 = vadd.f32 %v2629_v62, %v2311_v10 }
 0x78d   :  { %v2808_v14 = vpop.f32.mrf.mxu1 }
 0x78e   :  { %v3537_v21 = vadd.f32 %v2926_v20, %v2312_v44 }
 0x78f   :  { %v2314_v22 = vpop.f32.mrf.mxu1 }
 0x790   :  { %v2315_v53 = vadd.f32 %v2629_v62, %v2314_v22  ;;  %v2322_v42 = vsel %vm53_vm0, %v3537_v21, 0.0 }
 0x791   :  { %2323 = vadd.xlane.f32.xlu1 %v2322_v42  ;;  %v2809_v24 = vpop.f32.mrf.mxu1 }
 0x792   :  { %v3544_v41 = vadd.f32 %v2927_v57, %v2315_v53 }
 0x794   :  { %v2325_v36 = vsel %vm53_vm0, %v3544_v41, 0.0 }
 0x795   :  { %2326 = vadd.xlane.f32.xlu0 %v2325_v36 }
 0x81a   :  { %v2324_v26 = vpop.xlane.xlu1 %2323 }
 0x81b   :  { %v2328_v27 = vmul.f32 0.03125, %v2324_v26 }
 0x81d   :  { %v2330_v28 = vsub.f32 %v3537_v21, %v2328_v27 }
 0x81e   :  { %v2327_v30 = vpop.xlane.xlu0 %2326 }
 0x81f   :  { %v2329_v31 = vmul.f32 0.03125, %v2327_v30  ;;  %v2332_v49 = vmul.f32 %v2330_v28, %v2330_v28 }
 0x821   :  { %v2331_v25 = vsub.f32 %v3544_v41, %v2329_v31  ;;  %v2334_v32 = vsel %vm53_vm0, %v2332_v49, 0.0 }
 0x822   :  { %2335 = vadd.xlane.f32.xlu0 %v2334_v32 }
 0x823   :  { %v2333_v33 = vmul.f32 %v2331_v25, %v2331_v25 }
 0x825   :  { %v2337_v34 = vsel %vm53_vm0, %v2333_v33, 0.0 }
 0x826   :  { %2338 = vadd.xlane.f32.xlu0 %v2337_v34 }
 0x8ab   :  { %v2336_v40 = vpop.xlane.xlu0 %2335 }
 0x8ac   :  { %v2340_v50 = vmul.f32 0.03125, %v2336_v40 }
 0x8ae   :  { %v2342_v52 = vadd.f32 1e-05, %v2340_v50 }
 0x8af   :  { %v2339_v54 = vpop.xlane.xlu0 %2338 }
 0x8b0   :  { %2918 = vrsqrt.f32 %v2342_v52  ;;  %v2341_v58 = vmul.f32 0.03125, %v2339_v54 }
 0x8b2   :  { %v2343_v59 = vadd.f32 1e-05, %v2341_v58 }
 0x8b4   :  { %2920 = vrsqrt.f32 %v2343_v59 }
 0x8bd   :  { %v2919_v55 = vpop.eup %2918 }
 0x8be   :  { %v2346_v63 = vmul.f32 %v2919_v55, %v2330_v28 }
 0x8c0   :  { %v2354_v6 = vmul.f32 %v2633_v3, %v2346_v63 }
 0x8c1   :  { %v2921_v4 = vpop.eup %2920 }
 0x8c2   :  { %v2347_v5 = vmul.f32 %v2921_v4, %v2331_v25  ;;  %v2362_v56 = vadd.f32 %v2634_v39, %v2354_v6 }
 0x8c4   :  { %v2355_v9 = vmul.f32 %v2633_v3, %v2347_v5 }
 0x8c6   :  { %v2363_v1 = vadd.f32 %v2634_v39, %v2355_v9 }
 0x8c8   :  { %v2364_v60 = vpack.c.bf16 %v2363_v1, %v2362_v56 }
 0x8ca   :  { %2815 = vmatmul.mubr.msk.bf16.vlgmr.msra.gmra.mxu0 %vm53_vm0, %v2364_v60 }
 0x98a   :  { %v2425_v48 = vpop.f32.mrf.mxu0 }
 0x98b   :  { %v2426_v17 = vadd.f32 %v2635_v11, %v2425_v48 }
 0x98c   :  { %v2816_v37 = vpop.f32.mrf.mxu0 }
 0x98d   :  { %v2434_v2 = vmul.f32 0.70710677, %v2426_v17  ;;  %v2432_v19 = vmul.f32 0.5, %v2426_v17 }
 0x98e   :  { %v2428_v7 = vpop.f32.mrf.mxu0 }
 0x98f   :  { %2922 = verf.f32 %v2434_v2  ;;  %v2429_v61 = vadd.f32 %v2635_v11, %v2428_v7 }
 0x990   :  { %v2817_v23 = vpop.f32.mrf.mxu0 }
 0x991   :  { %v2435_v46 = vmul.f32 0.70710677, %v2429_v61  ;;  %v2433_v13 = vmul.f32 0.5, %v2429_v61 }
 0x993   :  { %2924 = verf.f32 %v2435_v46 }
 0x99c   :  { %v2923_v15 = vpop.eup %2922 }
 0x99d   :  { %v2438_v8 = vadd.f32 1.0, %v2923_v15 }
 0x99f   :  { %v2440_v10 = vmul.f32 %v2438_v8, %v2432_v19 }
 0x9a0   :  { %v2925_v18 = vpop.eup %2924 }
 0x9a1   :  { %v2439_v62 = vadd.f32 1.0, %v2925_v18 }
 0x9a3   :  { %v2441_v44 = vmul.f32 %v2439_v62, %v2433_v13 }
 0x9a5   :  { %v2442_v14 = vpack.c.bf16 %v2441_v44, %v2440_v10 }
 0x9a7   :  { %2835 = vmatmul.mubr.bf16.vlgmr.msra.gmra.mxu1 %v2442_v14 }
 0x9a8   :  { %2939 = shalt.err (!%p2936_p4)
}
 0x9a9   :  { %s2985_s23 = smov 128   ;;  %v2639_v20 = vld [vmem:[%s3627_s12] ss:$0 sm:$0xff]  ;;  %s2986_s6 = smov [#allocation2]  }
 0x9aa   :  { %2582 = dma.vmem_to_hbm [thread:$0]  %s2577_s11, 1024, %s3629_s14, [#allocation5], %s2985_s23, %s2985_s23, %s2982_s3  }
 0x9ab   :  { %s2564_s26 = sshll.u32 %s2986_s6, 4  ;;  %s2565_s26 = int_to_ptr.vmem [resolvable:$true] %s2564_s26 }
 0x9ac   :  { %s2948_s14 = scalar_lea.vmem %s2565_s26, 256  ;;  %p2953_p6 = scmp.lt.s32.totalorder %s2565_s26, %s2565_s26 }
 0x9ad   :  { %p2949_p5 = scmp.ne.s32.totalorder %s2565_s26, %s2948_s14  ;;  %p2954_p7 = scmp.lt.s32.totalorder %s2948_s14, %s2948_s14 }
 0x9af   :  { %p2955_p8 = por %p2954_p7, %p2953_p6 }
 0x9b1   :  { %p2956_p9 = pnand %p2955_p8, %p2949_p5 }
 0xa67   :  { %v2548_v22 = vpop.f32.mrf.mxu1 }
 0xa68   :  { %v2549_v53 = vadd.f32 %v2639_v20, %v2548_v22 }
 0xa69   :  { %v2836_v42 = vpop.f32.mrf.mxu1 }
 0xa6a   :  { %v2555_v24 = vadd.f32 %v2549_v53, %v3537_v21 }
 0xa6b   :  { %v2551_v57 = vpop.f32.mrf.mxu1 }
 0xa6c   :  { %2557 = vst.msk [vmem:[#allocation2] sm:$0xff] %vm53_vm0, %v2555_v24  ;;  %v2552_v36 = vadd.f32 %v2639_v20, %v2551_v57 }
 0xa6d   :  { %v2837_v26 = vpop.f32.mrf.mxu1 }
 0xa6e   :  { %v2556_v27 = vadd.f32 %v2552_v36, %v3544_v41 }
 0xa70   :  { %2558 = vst.msk [vmem:[#allocation2 + $0x8] sm:$0xff] %vm53_vm0, %v2556_v27 }
 0xa71   :  { %2959 = shalt.err (!%p2956_p9)
}
 0xa72   :  { %2570 = dma.vmem_to_hbm [thread:$0]  %s2565_s26, 256, %s3628_s13, [#allocation3], %s2985_s23, %s2985_s23, %s2982_s3  }
 0xa73   :  { %2968 = dma.done.wait [#allocation3], 256  }
 0xa74   :  { %2969 = vsyncadd [#allocation3], 4294967040 }
 0xa75   :  { %2970 = dma.done.wait [#allocation5], 1024  }
 0xa76   :  { %2971 = vsyncadd [#allocation5], 4294966272 }
 0xa77   :  { %2589 = vsyncpa [#allocation3], 1 }
 0xa78   :  { %2590 = vsyncpa [#allocation5], 1 }

// kernel: tpu_custom_call.1
= control target key start
LH: loop header
LB: loop body
LE: loop exit
PB: predicated region body
PF: predicated region fallthrough
CT: control target
= control target key end

     0   :  { %20 = vsyncpa [#allocation3], 0  ;;  %vm53_vm0 = vcmask 261120   ;;  %s3615_s0 = inlined_call_operand.vmem [shape: f32[2,8,32], index: 0, kind: input, shape index: {}]   ;;  %s3616_s1 = inlined_call_operand.vmem [shape: bf16[32,96], index: 1, kind: input, shape index: {}]   ;;  %s3617_s2 = inlined_call_operand.vmem [shape: f32[1,96], index: 2, kind: input, shape index: {}]   ;;  %s3618_s3 = inlined_call_operand.vmem [shape: bf16[32,32], index: 3, kind: input, shape index: {}]   ;;  %s3619_s4 = inlined_call_operand.vmem [shape: f32[1,32], index: 4, kind: input, shape index: {}]   ;;  %s3620_s5 = inlined_call_operand.vmem [shape: f32[1,32], index: 5, kind: input, shape index: {}]   ;;  %s3621_s6 = inlined_call_operand.vmem [shape: f32[1,32], index: 6, kind: input, shape index: {}]   ;;  %s3622_s7 = inlined_call_operand.vmem [shape: f32[1,32], index: 7, kind: input, shape index: {}]   ;;  %s3623_s8 = inlined_call_operand.vmem [shape: f32[1,32], index: 8, kind: input, shape index: {}]   ;;  %s3624_s9 = inlined_call_operand.vmem [shape: bf16[32,128], index: 9, kind: input, shape index: {}]   ;;  %s3625_s10 = inlined_call_operand.vmem [shape: f32[1,128], index: 10, kind: input, shape index: {}]   ;;  %s3626_s11 = inlined_call_operand.vmem [shape: bf16[128,32], index: 11, kind: input, shape index: {}]   ;;  %s3627_s12 = inlined_call_operand.vmem [shape: f32[1,32], index: 12, kind: input, shape index: {}]   ;;  %s3628_s13 = inlined_call_operand.hbm [shape: f32[2,8,32], index: 13, kind: output, shape index: {0}]   ;;  %s3629_s14 = inlined_call_operand.hbm [shape: f32[2,4,8,8], index: 14, kind: output, shape index: {1}]  }
   0x1   :  { %v49_v0 = vld [vmem:[%s3615_s0] sm:$0xff]  ;;  %v50_v1 = vld [vmem:[%s3615_s0 + $0x8] sm:$0xff] }
   0x2   :  { %v54_v2 = vsel %vm53_vm0, %v49_v0, 0.0  ;;  %v57_v3 = vsel %vm53_vm0, %v50_v1, 0.0 }
   0x3   :  { %55 = vadd.xlane.f32.xlu0 %v54_v2 }
   0x7   :  { %58 = vadd.xlane.f32.xlu0 %v57_v3 }
   0x8   :  { %21 = vsyncpa [#allocation5], 0  ;;  %v2868_v14 = vld [vmem:[%s3616_s1 + $0x8] sm:$0xff]   ;;  %v2972_v15 = vmov 0.0   ;;  %vm2973_vm1 = vmmov 0   ;;  %v2869_v16 = vld [vmem:[%s3616_s1] sm:$0xff]   ;;  %v190_v49 = vlaneseq }
   0x9   :  { %2698 = vmatprep.subr.bf16.mxu0 %v2972_v15  ;;  %2702 = vmatprep.mubr.msk.bf16.mxu0 %vm2973_vm1, %v2972_v15  ;;  %v2591_v25 = vld [vmem:[%s3620_s5] ss:$0 sm:$0xff]  ;;  %s2974_s5 = smov 112   ;;  %s2976_s26 = smov 104   ;;  %v2978_v47 = vmov 1983009808  }
   0xa   :  { %2699 = vmatpush3.bf16.msra.mxu0 %v2868_v14  ;;  %2718 = vmatprep.subr.bf16.mxu1 %v2972_v15  ;;  %v2592_v29 = vld [vmem:[%s3621_s6] ss:$0 sm:$0xff]  ;;  %s2975_s6 = smov 120   ;;  %v188_v48 = vunpack.c.l.s4 %v2978_v47  ;;  %v3129_v51 = vshrl.u32 %v190_v49, 7  ;;  %v2979_v52 = vmov 1934713408  }
   0xb   :  { %2700 = vmatprep.subr.bf16.mxu0 %v2972_v15  ;;  %2720 = vmatprep.mubr.msk.bf16.mxu1 %vm2973_vm1, %v2972_v15  ;;  %v2593_v34 = vld [vmem:[%s3617_s2] ss:$0 sm:$0xff]  ;;  %s2977_s2 = smov 96   ;;  %v220_v53 = vunpack.c.l.s4 %v2979_v52  ;;  %vm1078_vm2 = vcmask 64512   ;;  %s2980_s27 = smov 64   ;;  %vm1580_vm4 = vcmask 1043456  }
   0xc   :  { %v189_v50 = vunpack.c.0.s8 %v188_v48  ;;  %s2981_s16 = smov 16   ;;  %s2983_s17 = smov 24   ;;  %vm2244_vm5 = vcmask 130048   ;;  %vm2247_vm6 = vcmask 195584  }
   0xd   :  { %v221_v59 = vunpack.c.0.s8 %v220_v53 }
   0xe   :  { %2701 = vmatpush3.bf16.msra.mxu0 %v2869_v16  ;;  %v3136_v56 = vsub.s32 %v189_v50, %v3129_v51 }
   0xf   :  { %2706 = vmatprep.subr.bf16.mxu0 %v2972_v15 }
  0x8c   :  { %v56_v4 = vpop.xlane.xlu0 %55 }
  0x8d   :  { %v61_v5 = vmul.f32 0.03125, %v56_v4 }
  0x8f   :  { %v63_v6 = vsub.f32 %v49_v0, %v61_v5  ;;  %v3147_v0 = vsub.s32 %v221_v59, %v3129_v51 }
  0x90   :  { %v59_v7 = vpop.xlane.xlu0 %58 }
  0x91   :  { %v62_v8 = vmul.f32 0.03125, %v59_v7  ;;  %v65_v9 = vmul.f32 %v63_v6, %v63_v6 }
  0x93   :  { %v64_v10 = vsub.f32 %v50_v1, %v62_v8  ;;  %v67_v11 = vsel %vm53_vm0, %v65_v9, 0.0 }
  0x94   :  { %68 = vadd.xlane.f32.xlu1 %v67_v11 }
  0x95   :  { %v66_v12 = vmul.f32 %v64_v10, %v64_v10 }
  0x97   :  { %v70_v13 = vsel %vm53_vm0, %v66_v12, 0.0 }
  0x98   :  { %71 = vadd.xlane.f32.xlu1 %v70_v13 }
 0x11d   :  { %v69_v17 = vpop.xlane.xlu1 %68 }
 0x11e   :  { %v73_v18 = vmul.f32 0.03125, %v69_v17 }
 0x120   :  { %v75_v19 = vadd.f32 1e-05, %v73_v18 }
 0x121   :  { %v72_v20 = vpop.xlane.xlu1 %71 }
 0x122   :  { %2882 = vrsqrt.f32 %v75_v19  ;;  %v74_v21 = vmul.f32 0.03125, %v72_v20 }
 0x124   :  { %v76_v22 = vadd.f32 1e-05, %v74_v21 }
 0x126   :  { %2884 = vrsqrt.f32 %v76_v22 }
 0x12f   :  { %v2883_v23 = vpop.eup %2882 }
 0x130   :  { %v79_v24 = vmul.f32 %v2883_v23, %v63_v6 }
 0x132   :  { %v87_v28 = vmul.f32 %v2591_v25, %v79_v24 }
 0x133   :  { %v2885_v26 = vpop.eup %2884 }
 0x134   :  { %v80_v27 = vmul.f32 %v2885_v26, %v64_v10  ;;  %v95_v31 = vadd.f32 %v2592_v29, %v87_v28 }
 0x136   :  { %v88_v30 = vmul.f32 %v2591_v25, %v80_v27 }
 0x138   :  { %v96_v32 = vadd.f32 %v2592_v29, %v88_v30 }
 0x13a   :  { %v97_v33 = vpack.c.bf16 %v96_v32, %v95_v31 }
 0x13c   :  { %2703 = vmatmul.mubr.msk.bf16.vlgmr.msra.gmra.mxu0 %vm53_vm0, %v97_v33 }
 0x13d   :  { %2708 = vmatprep.mubr.msk.bf16.mxu0 %vm2973_vm1, %v2972_v15 }
 0x1fc   :  { %v158_v35 = vpop.f32.mrf.mxu0 }
 0x1fd   :  { %v3098_v36 = vadd.f32 %v2593_v34, %v158_v35 }
 0x1fe   :  { %v2704_v37 = vpop.f32.mrf.mxu0 }
 0x1ff   :  { %173 = vrot.lane.b32.xlu1 %v3098_v36, %s2974_s5  ;;  %167 = vrot.lane.b32.xlu0 %v3098_v36, %s2975_s6 }
 0x200   :  { %v161_v38 = vpop.f32.mrf.mxu0 }
 0x201   :  { %v3102_v39 = vadd.f32 %v2593_v34, %v161_v38 }
 0x202   :  { %v2705_v40 = vpop.f32.mrf.mxu0 }
 0x203   :  { %179 = vrot.lane.b32.xlu1 %v3098_v36, %s2976_s26  ;;  %175 = vrot.lane.b32.xlu0 %v3102_v39, %s2974_s5 }
 0x207   :  { %465 = vrot.lane.b32.xlu0 %v3098_v36, %s2977_s2  ;;  %169 = vrot.lane.b32.xlu1 %v3102_v39, %s2975_s6 }
 0x20b   :  { %181 = vrot.lane.b32.xlu1 %v3102_v39, %s2976_s26 }
 0x271   :  { %v3109_v41 = vpop.permute.xlu1 %173  ;;  %v3111_v42 = vpop.permute.xlu0 %167 }
 0x272   :  { %473 = vrot.lane.b32.xlu0 %v3109_v41, %s2977_s2  ;;  %469 = vrot.lane.b32.xlu1 %v3111_v42, %s2977_s2  ;;  %v185_v57 = vcombine.low %v3098_v36, %v3109_v41  ;;  %v186_v58 = vcombine.high %v3098_v36, %v3109_v41 }
 0x274   :  { %v193_v62 = vrot.slane %v185_v57, %v3136_v56  ;;  %v200_v63 = vrot.slane %v186_v58, %v3136_v56 }
 0x275   :  { %v3115_v43 = vpop.permute.xlu1 %179  ;;  %v3119_v44 = vpop.permute.xlu0 %175 }
 0x276   :  { %467 = vrot.lane.b32.xlu0 %v3102_v39, %s2977_s2  ;;  %477 = vrot.lane.b32.xlu1 %v3115_v43, %s2977_s2  ;;  %v201_v54 = vcombine.low %v3111_v42, %v3115_v43  ;;  %v202_v55 = vcombine.high %v3111_v42, %v3115_v43  ;;  %v253_v16 = vcombine.low %v3102_v39, %v3119_v44 }
 0x277   :  { %v254_v19 = vcombine.high %v3102_v39, %v3119_v44 }
 0x278   :  { %v209_v60 = vrot.slane %v201_v54, %v3136_v56  ;;  %v216_v61 = vrot.slane %v202_v55, %v3136_v56  ;;  %v261_v26 = vrot.slane %v253_v16, %v3136_v56 }
 0x279   :  { %v3121_v45 = vpop.permute.xlu1 %169  ;;  %v466_v10 = vpop.permute.xlu0 %465  ;;  %v268_v28 = vrot.slane %v254_v19, %v3136_v56 }
 0x27a   :  { %475 = vrot.lane.b32.xlu0 %v3119_v44, %s2977_s2  ;;  %471 = vrot.lane.b32.xlu1 %v3121_v45, %s2977_s2  ;;  %v217_v1 = vcombine.low %v193_v62, %v209_v60  ;;  %v218_v2 = vcombine.high %v193_v62, %v209_v60  ;;  %v233_v3 = vcombine.low %v200_v63, %v216_v61 }
 0x27b   :  { %v234_v4 = vcombine.high %v200_v63, %v216_v61 }
 0x27c   :  { %v225_v5 = vrot.slane %v217_v1, %v3147_v0  ;;  %v232_v6 = vrot.slane %v218_v2, %v3147_v0  ;;  %v241_v7 = vrot.slane %v233_v3, %v3147_v0 }
 0x27d   :  { %v3125_v46 = vpop.permute.xlu1 %181  ;;  %v248_v8 = vrot.slane %v234_v4, %v3147_v0 }
 0x27e   :  { %479 = vrot.lane.b32.xlu1 %v3125_v46, %s2977_s2  ;;  %v321_v9 = vcombine.low %v225_v5, %v232_v6  ;;  %v2597_v11 = vcombine.high %v225_v5, %v232_v6  ;;  %v269_v14 = vcombine.low %v3121_v45, %v3125_v46  ;;  %v270_v17 = vcombine.high %v3121_v45, %v3125_v46 }
 0x27f   :  { %v337_v12 = vcombine.low %v241_v7, %v248_v8  ;;  %v2598_v13 = vcombine.high %v241_v7, %v248_v8 }
 0x280   :  { %v328_v18 = vrot.slane %v321_v9, %v3136_v56  ;;  %v336_v22 = vrot.slane %v2597_v11, %v3136_v56  ;;  %v277_v25 = vrot.slane %v269_v14, %v3136_v56  ;;  %v284_v27 = vrot.slane %v270_v17, %v3136_v56 }
 0x281   :  { %v344_v23 = vrot.slane %v337_v12, %v3136_v56  ;;  %v352_v24 = vrot.slane %v2598_v13, %v3136_v56 }
 0x282   :  { %v285_v32 = vcombine.low %v261_v26, %v277_v25  ;;  %v286_v33 = vcombine.high %v261_v26, %v277_v25  ;;  %v353_v35 = vcombine.low %v328_v18, %v336_v22  ;;  %v301_v47 = vcombine.low %v268_v28, %v284_v27 }
 0x283   :  { %v369_v37 = vcombine.low %v344_v23, %v352_v24  ;;  %v302_v48 = vcombine.high %v268_v28, %v284_v27  ;;  %v354_v50 = vcombine.high %v328_v18, %v336_v22  ;;  %v370_v52 = vcombine.high %v344_v23, %v352_v24 }
 0x284   :  { %v293_v58 = vrot.slane %v285_v32, %v3147_v0  ;;  %v300_v59 = vrot.slane %v286_v33, %v3147_v0  ;;  %v3176_v61 = vrot.slane %v353_v35, %v3147_v0  ;;  %v309_v5 = vrot.slane %v301_v47, %v3147_v0 }
 0x285   :  { %v3179_v62 = vrot.slane %v369_v37, %v3147_v0  ;;  %v316_v6 = vrot.slane %v302_v48, %v3147_v0  ;;  %v3184_v7 = vrot.slane %v354_v50, %v3147_v0  ;;  %v3187_v8 = vrot.slane %v370_v52, %v3147_v0 }
 0x286   :  { %v389_v13 = vcombine.low %v293_v58, %v300_v59  ;;  %v2599_v14 = vcombine.high %v293_v58, %v300_v59 }
 0x287   :  { %v405_v23 = vcombine.low %v309_v5, %v316_v6  ;;  %v2600_v24 = vcombine.high %v309_v5, %v316_v6 }
 0x2e4   :  { %v474_v20 = vpop.permute.xlu0 %473  ;;  %v470_v21 = vpop.permute.xlu1 %469 }
 0x2e5   :  { %v489_v29 = vcombine.low %v466_v10, %v474_v20  ;;  %v490_v30 = vcombine.high %v466_v10, %v474_v20 }
 0x2e7   :  { %v497_v53 = vrot.slane %v489_v29, %v3136_v56  ;;  %v504_v54 = vrot.slane %v490_v30, %v3136_v56 }
 0x2e8   :  { %v468_v31 = vpop.permute.xlu0 %467  ;;  %v478_v34 = vpop.permute.xlu1 %477 }
 0x2e9   :  { %v505_v38 = vcombine.low %v470_v21, %v478_v34  ;;  %v506_v40 = vcombine.high %v470_v21, %v478_v34 }
 0x2eb   :  { %v513_v55 = vrot.slane %v505_v38, %v3136_v56  ;;  %v520_v57 = vrot.slane %v506_v40, %v3136_v56 }
 0x2ec   :  { %v472_v60 = vpop.permute.xlu1 %471  ;;  %v476_v4 = vpop.permute.xlu0 %475 }
 0x2ed   :  { %v521_v63 = vcombine.low %v497_v53, %v513_v55  ;;  %v522_v1 = vcombine.high %v497_v53, %v513_v55  ;;  %v537_v2 = vcombine.low %v504_v54, %v520_v57  ;;  %v538_v3 = vcombine.high %v504_v54, %v520_v57 }
 0x2ee   :  { %v557_v16 = vcombine.low %v468_v31, %v476_v4  ;;  %v558_v17 = vcombine.high %v468_v31, %v476_v4 }
 0x2ef   :  { %v529_v9 = vrot.slane %v521_v63, %v3147_v0  ;;  %v536_v10 = vrot.slane %v522_v1, %v3147_v0  ;;  %v545_v11 = vrot.slane %v537_v2, %v3147_v0  ;;  %v552_v12 = vrot.slane %v538_v3, %v3147_v0 }
 0x2f0   :  { %v480_v18 = vpop.permute.xlu1 %479  ;;  %v565_v31 = vrot.slane %v557_v16, %v3136_v56  ;;  %v572_v32 = vrot.slane %v558_v17, %v3136_v56  ;;  %v3210_v1 = vrot.slane %v389_v13, %v3136_v56  ;;  %v404_v2 = vrot.slane %v2599_v14, %v3136_v56 }
 0x2f1   :  { %v625_v19 = vcombine.low %v529_v9, %v536_v10  ;;  %v2601_v20 = vcombine.high %v529_v9, %v536_v10  ;;  %v641_v21 = vcombine.low %v545_v11, %v552_v12  ;;  %v2602_v22 = vcombine.high %v545_v11, %v552_v12 }
 0x2f2   :  { %v573_v25 = vcombine.low %v472_v60, %v480_v18  ;;  %v574_v26 = vcombine.high %v472_v60, %v480_v18  ;;  %v412_v11 = vrot.slane %v405_v23, %v3136_v56  ;;  %v420_v12 = vrot.slane %v2600_v24, %v3136_v56 }
 0x2f3   :  { %v632_v27 = vrot.slane %v625_v19, %v3136_v56  ;;  %v640_v28 = vrot.slane %v2601_v20, %v3136_v56  ;;  %v648_v29 = vrot.slane %v641_v21, %v3136_v56  ;;  %v656_v30 = vrot.slane %v2602_v22, %v3136_v56 }
 0x2f4   :  { %v581_v33 = vrot.slane %v573_v25, %v3136_v56  ;;  %v588_v34 = vrot.slane %v574_v26, %v3136_v56  ;;  %v385_v26 = vcombine.low %v3176_v61, %v3179_v62 }
 0x2f5   :  { %v657_v35 = vcombine.low %v632_v27, %v640_v28  ;;  %v673_v37 = vcombine.low %v648_v29, %v656_v30  ;;  %v658_v38 = vcombine.high %v632_v27, %v640_v28  ;;  %v674_v40 = vcombine.high %v648_v29, %v656_v30 }
 0x2f6   :  { %v589_v47 = vcombine.low %v565_v31, %v581_v33  ;;  %v590_v48 = vcombine.high %v565_v31, %v581_v33  ;;  %v605_v50 = vcombine.low %v572_v32, %v588_v34  ;;  %v606_v52 = vcombine.high %v572_v32, %v588_v34 }
 0x2f7   :  { %v665_v53 = vrot.slane %v657_v35, %v3147_v0  ;;  %v681_v54 = vrot.slane %v673_v37, %v3147_v0  ;;  %v672_v55 = vrot.slane %v658_v38, %v3147_v0  ;;  %v688_v57 = vrot.slane %v674_v40, %v3147_v0 }
 0x2f8   :  { %v597_v58 = vrot.slane %v589_v47, %v3147_v0  ;;  %v604_v59 = vrot.slane %v590_v48, %v3147_v0  ;;  %v613_v60 = vrot.slane %v605_v50, %v3147_v0  ;;  %v620_v63 = vrot.slane %v606_v52, %v3147_v0 }
 0x2f9   :  { %v689_v3 = vcombine.low %v665_v53, %v681_v54  ;;  %v691_v4 = vcombine.low %v672_v55, %v688_v57  ;;  %v690_v22 = vcombine.high %v665_v53, %v681_v54  ;;  %v387_v27 = vcombine.low %v3184_v7, %v3187_v8 }
 0x2fa   :  { %v693_v5 = vcombine.low %v597_v58, %v604_v59  ;;  %v2603_v6 = vcombine.high %v597_v58, %v604_v59  ;;  %v709_v9 = vcombine.low %v613_v60, %v620_v63  ;;  %v2604_v10 = vcombine.high %v613_v60, %v620_v63 }
 0x2fb   :  { %v761_v16 = vpack.c.bf16 %v689_v3, %v689_v3  ;;  %v763_v17 = vpack.c.bf16 %v691_v4, %v691_v4  ;;  %v421_v31 = vcombine.low %v3210_v1, %v404_v2  ;;  %v437_v32 = vcombine.low %v412_v11, %v420_v12 }
 0x2fc   :  { %v700_v18 = vrot.slane %v693_v5, %v3136_v56  ;;  %v708_v19 = vrot.slane %v2603_v6, %v3136_v56  ;;  %v716_v13 = vrot.slane %v709_v9, %v3136_v56  ;;  %v724_v14 = vrot.slane %v2604_v10, %v3136_v56 }
 0x2fd   :  { %v1083_v20 = vsel %vm1078_vm2, %v761_v16, 0  ;;  %v1175_v21 = vsel %vm1078_vm2, %v763_v17, 0  ;;  %v762_v33 = vpack.c.bf16 %v690_v22, %v690_v22  ;;  %v457_v38 = vpack.c.bf16 %v385_v26, %v385_v26 }
 0x2fe   :  { %2707 = vmatpush3.bf16.xpose.msra.mxu0 %v1083_v20  ;;  %2719 = vmatpush3.bf16.xpose.msra.mxu1 %v1175_v21  ;;  %v725_v23 = vcombine.low %v700_v18, %v708_v19  ;;  %v741_v25 = vcombine.low %v716_v13, %v724_v14  ;;  %v726_v24 = vcombine.high %v700_v18, %v708_v19  ;;  %v1076_v21 = vand.u32 127, %v190_v49 }
 0x2ff   :  { %2712 = vmatprep.subr.bf16.mxu0 %v2972_v15  ;;  %2730 = vmatprep.subr.bf16.mxu1 %v2972_v15  ;;  %v742_v28 = vcombine.high %v716_v13, %v724_v14  ;;  %v459_v40 = vpack.c.bf16 %v387_v27, %v387_v27  ;;  %v429_v48 = vrot.slane %v421_v31, %v3147_v0  ;;  %v1129_v52 = vsel %vm1078_vm2, %v762_v33, 0 }
 0x300   :  { %v733_v29 = vrot.slane %v725_v23, %v3147_v0  ;;  %v749_v30 = vrot.slane %v741_v25, %v3147_v0  ;;  %v740_v35 = vrot.slane %v726_v24, %v3147_v0  ;;  %v445_v50 = vrot.slane %v437_v32, %v3147_v0 }
 0x301   :  { %v756_v37 = vrot.slane %v742_v28, %v3147_v0  ;;  %v692_v53 = vcombine.high %v672_v55, %v688_v57  ;;  %v386_v59 = vcombine.high %v3176_v61, %v3179_v62  ;;  %v422_v55 = vcombine.high %v3210_v1, %v404_v2 }
 0x302   :  { %v757_v34 = vcombine.low %v733_v29, %v749_v30  ;;  %v453_v60 = vcombine.low %v429_v48, %v445_v50  ;;  %v438_v57 = vcombine.high %v412_v11, %v420_v12  ;;  %v758_v62 = vcombine.high %v733_v29, %v749_v30 }
 0x303   :  { %v759_v58 = vcombine.low %v740_v35, %v756_v37  ;;  %v764_v63 = vpack.c.bf16 %v692_v53, %v692_v53  ;;  %v458_v4 = vpack.c.bf16 %v386_v59, %v386_v59  ;;  %v436_v6 = vrot.slane %v422_v55, %v3147_v0 }
 0x304   :  { %v765_v47 = vpack.c.bf16 %v757_v34, %v757_v34  ;;  %v461_v5 = vpack.c.bf16 %v453_v60, %v453_v60  ;;  %v452_v9 = vrot.slane %v438_v57, %v3147_v0  ;;  %v388_v1 = vcombine.high %v3184_v7, %v3187_v8 }
 0x305   :  { %2709 = vmatmul.mubr.msk.bf16.vlgmr.msra.gmra.mxu0 %vm1078_vm2, %v457_v38  ;;  %2721 = vmatmul.mubr.msk.bf16.vlgmr.msra.gmra.mxu1 %vm1078_vm2, %v459_v40  ;;  %v767_v3 = vpack.c.bf16 %v759_v58, %v759_v58  ;;  %v1221_v61 = vsel %vm1078_vm2, %v764_v63, 0  ;;  %v766_v11 = vpack.c.bf16 %v758_v62, %v758_v62  ;;  %v760_v7 = vcombine.high %v740_v35, %v756_v37 }
 0x306   :  { %2713 = vmatpush3.bf16.xpose.msra.mxu0 %v1129_v52  ;;  %v1267_v54 = vsel %vm1078_vm2, %v765_v47, 0  ;;  %2714 = vmatprep.mubr.msk.bf16.mxu0 %vm2973_vm1, %v2972_v15  ;;  %v455_v2 = vcombine.low %v436_v6, %v452_v9  ;;  %v460_v12 = vpack.c.bf16 %v388_v1, %v388_v1  ;;  %v454_v8 = vcombine.high %v429_v48, %v445_v50 }
 0x307   :  { %2731 = vmatpush3.bf16.xpose.msra.mxu1 %v1267_v54  ;;  %2732 = vmatprep.mubr.msk.bf16.mxu1 %vm2973_vm1, %v2972_v15  ;;  %v1359_v10 = vsel %vm1078_vm2, %v767_v3, 0  ;;  %v1313_v17 = vsel %vm1078_vm2, %v766_v11, 0  ;;  %v768_v18 = vpack.c.bf16 %v760_v7, %v760_v7  ;;  %v456_v14 = vcombine.high %v436_v6, %v452_v9 }
 0x308   :  { %2724 = vmatprep.subr.bf16.mxu0 %v2972_v15  ;;  %2742 = vmatprep.subr.bf16.mxu1 %v2972_v15  ;;  %v463_v16 = vpack.c.bf16 %v455_v2, %v455_v2  ;;  %v462_v19 = vpack.c.bf16 %v454_v8, %v454_v8  ;;  %vm3279_vm3 = vcmp.ge.s32.totalorder %v3129_v51, %v1076_v21 }
 0x309   :  { %v1405_v13 = vsel %vm1078_vm2, %v768_v18, 0  ;;  %v464_v20 = vpack.c.bf16 %v456_v14, %v456_v14 }
 0x30d   :  { %2715 = vmatmul.mubr.msk.bf16.vlgmr.msra.gmra.mxu0 %vm1078_vm2, %v458_v4 }
 0x30e   :  { %2733 = vmatmul.mubr.msk.bf16.vlgmr.msra.gmra.mxu1 %vm1078_vm2, %v461_v5  ;;  %2725 = vmatpush3.bf16.xpose.msra.mxu0 %v1221_v61 }
 0x30f   :  { %2743 = vmatpush3.bf16.xpose.msra.mxu1 %v1359_v10  ;;  %2726 = vmatprep.mubr.msk.bf16.mxu0 %vm2973_vm1, %v2972_v15 }
 0x310   :  { %2744 = vmatprep.mubr.msk.bf16.mxu1 %vm2973_vm1, %v2972_v15  ;;  %2736 = vmatprep.subr.bf16.mxu0 %v2972_v15 }
 0x311   :  { %2754 = vmatprep.subr.bf16.mxu1 %v2972_v15 }
 0x315   :  { %2727 = vmatmul.mubr.msk.bf16.vlgmr.msra.gmra.mxu0 %vm1078_vm2, %v460_v12 }
 0x316   :  { %2745 = vmatmul.mubr.msk.bf16.vlgmr.msra.gmra.mxu1 %vm1078_vm2, %v463_v16  ;;  %2737 = vmatpush3.bf16.xpose.msra.mxu0 %v1313_v17 }
 0x317   :  { %2738 = vmatprep.mubr.msk.bf16.mxu0 %vm2973_vm1, %v2972_v15  ;;  %2748 = vmatprep.subr.bf16.mxu0 %v2972_v15 }
 0x318   :  { %2756 = vmatprep.mubr.msk.bf16.mxu1 %vm2973_vm1, %v2972_v15 }
 0x31d   :  { %2739 = vmatmul.mubr.msk.bf16.vlgmr.msra.gmra.mxu0 %vm1078_vm2, %v462_v19 }
 0x31e   :  { %2749 = vmatpush3.bf16.xpose.msra.mxu0 %v1405_v13  ;;  %2750 = vmatprep.mubr.msk.bf16.mxu0 %vm2973_vm1, %v2972_v15 }
 0x31f   :  { %2760 = vmatprep.subr.bf16.mxu0 %v2972_v15 }
 0x325   :  { %2751 = vmatmul.mubr.msk.bf16.vlgmr.msra.gmra.mxu0 %vm1078_vm2, %v464_v20 }
 0x326   :  { %2762 = vmatprep.mubr.msk.bf16.mxu0 %vm2973_vm1, %v2972_v15 }
 0x3c5   :  { %v1119_v22 = vpop.f32.mrf.mxu0  ;;  %v1211_v23 = vpop.f32.mrf.mxu1 }
 0x3c6   :  { %v1447_v24 = vmul.f32 0.35355338, %v1119_v22  ;;  %v1449_v26 = vmul.f32 0.35355338, %v1211_v23 }
 0x3c7   :  { %v2710_v27 = vpop.f32.mrf.mxu0  ;;  %v2722_v28 = vpop.f32.mrf.mxu1 }
 0x3c8   :  { %v3285_v29 = vsel %vm3279_vm3, %v1447_v24, -inf  ;;  %v3291_v51 = vsel %vm3279_vm3, %v1449_v26, -inf }
 0x3c9   :  { %v1122_v30 = vpop.f32.mrf.mxu0  ;;  %v1214_v31 = vpop.f32.mrf.mxu1  ;;  %v1465_v49 = vsel %vm1078_vm2, %v3285_v29, -inf  ;;  %v1471_v35 = vsel %vm1078_vm2, %v3291_v51, -inf }
 0x3ca   :  { %1466 = vmax.xlane.f32.xlu0 %v1465_v49 }
 0x3cb   :  { %v2711_v32 = vpop.f32.mrf.mxu0  ;;  %v2723_v33 = vpop.f32.mrf.mxu1 }
 0x3cd   :  { %v1165_v34 = vpop.f32.mrf.mxu0 }
 0x3ce   :  { %v1448_v37 = vmul.f32 0.35355338, %v1165_v34  ;;  %v1303_v38 = vpop.f32.mrf.mxu1  ;;  %1472 = vmax.xlane.f32.xlu0 %v1471_v35 }
 0x3cf   :  { %v1451_v40 = vmul.f32 0.35355338, %v1303_v38  ;;  %v2716_v47 = vpop.f32.mrf.mxu0 }
 0x3d0   :  { %v2734_v48 = vpop.f32.mrf.mxu1  ;;  %v1458_v50 = vsel %vm3279_vm3, %v1448_v37, -inf }
 0x3d1   :  { %v1168_v52 = vpop.f32.mrf.mxu0  ;;  %v1461_v53 = vsel %vm3279_vm3, %v1451_v40, -inf  ;;  %v1468_v54 = vsel %vm1078_vm2, %v1458_v50, -inf }
 0x3d2   :  { %v1306_v58 = vpop.f32.mrf.mxu1  ;;  %v1477_v59 = vsel %vm1078_vm2, %v1461_v53, -inf  ;;  %1469 = vmax.xlane.f32.xlu1 %v1468_v54 }
 0x3d3   :  { %1478 = vmax.xlane.f32.xlu0 %v1477_v59  ;;  %v2717_v60 = vpop.f32.mrf.mxu0 }
 0x3d4   :  { %v2735_v55 = vpop.f32.mrf.mxu1 }
 0x3d5   :  { %v1257_v57 = vpop.f32.mrf.mxu0 }
 0x3d6   :  { %v1450_v63 = vmul.f32 0.35355338, %v1257_v57  ;;  %v1395_v3 = vpop.f32.mrf.mxu1 }
 0x3d7   :  { %v1453_v4 = vmul.f32 0.35355338, %v1395_v3  ;;  %v2728_v5 = vpop.f32.mrf.mxu0 }
 0x3d8   :  { %v2746_v6 = vpop.f32.mrf.mxu1  ;;  %v1460_v9 = vsel %vm3279_vm3, %v1450_v63, -inf }
 0x3d9   :  { %v1260_v61 = vpop.f32.mrf.mxu0  ;;  %v1474_v62 = vsel %vm1078_vm2, %v1460_v9, -inf  ;;  %v3306_v1 = vsel %vm3279_vm3, %v1453_v4, -inf }
 0x3da   :  { %v1398_v10 = vpop.f32.mrf.mxu1  ;;  %1475 = vmax.xlane.f32.xlu0 %v1474_v62  ;;  %v1483_v16 = vsel %vm1078_vm2, %v3306_v1, -inf }
 0x3db   :  { %v2729_v2 = vpop.f32.mrf.mxu0 }
 0x3dc   :  { %v2747_v11 = vpop.f32.mrf.mxu1 }
 0x3dd   :  { %v1349_v12 = vpop.f32.mrf.mxu0 }
 0x3de   :  { %1484 = vmax.xlane.f32.xlu0 %v1483_v16  ;;  %v1452_v20 = vmul.f32 0.35355338, %v1349_v12 }
 0x3df   :  { %v2740_v17 = vpop.f32.mrf.mxu0 }
 0x3e0   :  { %v1462_v22 = vsel %vm3279_vm3, %v1452_v20, -inf }
 0x3e1   :  { %v1352_v7 = vpop.f32.mrf.mxu0  ;;  %v1480_v23 = vsel %vm1078_vm2, %v1462_v22, -inf }
 0x3e3   :  { %773 = vrot.lane.b32.xlu1 %v3111_v42, %s2980_s27  ;;  %v2741_v8 = vpop.f32.mrf.mxu0 }
 0x3e5   :  { %v1441_v18 = vpop.f32.mrf.mxu0 }
 0x3e6   :  { %v1454_v21 = vmul.f32 0.35355338, %v1441_v18 }
 0x3e7   :  { %777 = vrot.lane.b32.xlu1 %v3109_v41, %s2980_s27  ;;  %v2752_v19 = vpop.f32.mrf.mxu0 }
 0x3e8   :  { %v1464_v42 = vsel %vm3279_vm3, %v1454_v21, -inf }
 0x3e9   :  { %v1444_v13 = vpop.f32.mrf.mxu0  ;;  %v1486_v24 = vsel %vm1078_vm2, %v1464_v42, -inf }
 0x3eb   :  { %v2753_v14 = vpop.f32.mrf.mxu0 }
 0x3f4   :  { %769 = vrot.lane.b32.xlu0 %v3098_v36, %s2980_s27 }
 0x40b   :  { %1481 = vmax.xlane.f32.xlu1 %v1480_v23 }
 0x40f   :  { %1487 = vmax.xlane.f32.xlu1 %v1486_v24 }
 0x420   :  { %781 = vrot.lane.b32.xlu1 %v3115_v43, %s2980_s27 }
 0x453   :  { %v1467_v41 = vpop.xlane.xlu0 %1466 }
 0x454   :  { %v1489_v36 = vsub.f32 %v3285_v29, %v1467_v41 }
 0x456   :  { %v1497_v26 = vmul.f32 1.442695, %v1489_v36 }
 0x457   :  { %v1473_v27 = vpop.xlane.xlu0 %1472 }
 0x458   :  { %2886 = vpow2.f32 %v1497_v26  ;;  %v1491_v28 = vsub.f32 %v3291_v51, %v1473_v27 }
 0x45a   :  { %v1501_v30 = vmul.f32 1.442695, %v1491_v28 }
 0x45b   :  { %v1470_v31 = vpop.xlane.xlu1 %1469 }
 0x45c   :  { %2888 = vpow2.f32 %v1501_v30  ;;  %v1479_v49 = vpop.xlane.xlu0 %1478  ;;  %v1490_v25 = vsub.f32 %v1458_v50, %v1470_v31 }
 0x45d   :  { %v1493_v32 = vsub.f32 %v1461_v53, %v1479_v49 }
 0x45e   :  { %v1499_v33 = vmul.f32 1.442695, %v1490_v25 }
 0x45f   :  { %v1505_v34 = vmul.f32 1.442695, %v1493_v32  ;;  %v774_v58 = vpop.permute.xlu1 %773 }
 0x460   :  { %2890 = vpow2.f32 %v1499_v33 }
 0x461   :  { %2892 = vpow2.f32 %v1505_v34 }
 0x463   :  { %v1476_v35 = vpop.xlane.xlu0 %1475  ;;  %v778_v59 = vpop.permute.xlu1 %777 }
 0x464   :  { %v1492_v43 = vsub.f32 %v1460_v9, %v1476_v35 }
 0x465   :  { %v3326_v37 = vpop.eup %2886 }
 0x466   :  { %v1503_v29 = vmul.f32 1.442695, %v1492_v43  ;;  %v1513_v38 = vsel %vm1078_vm2, %v3326_v37, 0.0 }
 0x467   :  { %1514 = vadd.xlane.f32.xlu0 %v1513_v38  ;;  %v3352_v60 = vpop.xlane.xlu0 %1484 }
 0x468   :  { %2894 = vpow2.f32 %v1503_v29 }
 0x469   :  { %v3330_v51 = vpop.eup %2888 }
 0x46a   :  { %v1519_v40 = vsel %vm1078_vm2, %v3330_v51, 0.0 }
 0x46b   :  { %1520 = vadd.xlane.f32.xlu0 %v1519_v40  ;;  %v770_v3 = vpop.permute.xlu0 %769 }
 0x46c   :  { %v793_v6 = vcombine.low %v770_v3, %v778_v59  ;;  %v794_v9 = vcombine.high %v770_v3, %v778_v59  ;;  %v1495_v59 = vsub.f32 %v3306_v1, %v3352_v60 }
 0x46d   :  { %v3334_v47 = vpop.eup %2890 }
 0x46e   :  { %v3336_v48 = vpop.eup %2892  ;;  %v1516_v50 = vsel %vm1078_vm2, %v3334_v47, 0.0  ;;  %v808_v2 = vrot.slane %v794_v9, %v3136_v56 }
 0x46f   :  { %v1525_v52 = vsel %vm1078_vm2, %v3336_v48, 0.0  ;;  %1517 = vadd.xlane.f32.xlu1 %v1516_v50 }
 0x470   :  { %1526 = vadd.xlane.f32.xlu0 %v1525_v52 }
 0x475   :  { %v3342_v53 = vpop.eup %2894 }
 0x476   :  { %v1522_v54 = vsel %vm1078_vm2, %v3342_v53, 0.0 }
 0x477   :  { %1523 = vadd.xlane.f32.xlu1 %v1522_v54 }
 0x488   :  { %775 = vrot.lane.b32.xlu1 %v3121_v45, %s2980_s27 }
 0x48c   :  { %779 = vrot.lane.b32.xlu1 %v3119_v44, %s2980_s27  ;;  %v801_v44 = vrot.slane %v793_v6, %v3136_v56 }
 0x490   :  { %783 = vrot.lane.b32.xlu1 %v3125_v46, %s2980_s27 }
 0x494   :  { %v1482_v55 = vpop.xlane.xlu1 %1481 }
 0x495   :  { %v1494_v57 = vsub.f32 %v1462_v22, %v1482_v55  ;;  %v1509_v55 = vmul.f32 1.442695, %v1495_v59 }
 0x497   :  { %v1507_v63 = vmul.f32 1.442695, %v1494_v57 }
 0x498   :  { %v1488_v4 = vpop.xlane.xlu1 %1487 }
 0x499   :  { %2896 = vpow2.f32 %v1507_v63  ;;  %v1496_v5 = vsub.f32 %v1464_v42, %v1488_v4 }
 0x49b   :  { %v1511_v10 = vmul.f32 1.442695, %v1496_v5 }
 0x49c   :  { %v782_v45 = vpop.permute.xlu1 %781 }
 0x49d   :  { %v809_v61 = vcombine.low %v774_v58, %v782_v45  ;;  %v810_v62 = vcombine.high %v774_v58, %v782_v45  ;;  %2898 = vpow2.f32 %v1511_v10 }
 0x49e   :  { %2900 = vpow2.f32 %v1509_v55 }
 0x49f   :  { %v817_v46 = vrot.slane %v809_v61, %v3136_v56  ;;  %v824_v11 = vrot.slane %v810_v62, %v3136_v56 }
 0x4a1   :  { %v825_v12 = vcombine.low %v801_v44, %v817_v46  ;;  %v826_v16 = vcombine.high %v801_v44, %v817_v46  ;;  %v841_v17 = vcombine.low %v808_v2, %v824_v11  ;;  %v842_v7 = vcombine.high %v808_v2, %v824_v11 }
 0x4a3   :  { %v833_v8 = vrot.slane %v825_v12, %v3147_v0  ;;  %v840_v18 = vrot.slane %v826_v16, %v3147_v0  ;;  %v849_v19 = vrot.slane %v841_v17, %v3147_v0  ;;  %v856_v13 = vrot.slane %v842_v7, %v3147_v0 }
 0x4a5   :  { %v929_v14 = vcombine.low %v833_v8, %v840_v18  ;;  %v2605_v20 = vcombine.high %v833_v8, %v840_v18  ;;  %v945_v21 = vcombine.low %v849_v19, %v856_v13  ;;  %v2606_v22 = vcombine.high %v849_v19, %v856_v13 }
 0x4a6   :  { %v3362_v23 = vpop.eup %2896 }
 0x4a7   :  { %v936_v42 = vrot.slane %v929_v14, %v3136_v56  ;;  %v944_v24 = vrot.slane %v2605_v20, %v3136_v56  ;;  %v952_v41 = vrot.slane %v945_v21, %v3136_v56  ;;  %v960_v36 = vrot.slane %v2606_v22, %v3136_v56 }
 0x4a8   :  { %v1528_v26 = vsel %vm1078_vm2, %v3362_v23, 0.0 }
 0x4a9   :  { %1529 = vadd.xlane.f32.xlu0 %v1528_v26  ;;  %v961_v27 = vcombine.low %v936_v42, %v944_v24  ;;  %v977_v28 = vcombine.low %v952_v41, %v960_v36  ;;  %v962_v30 = vcombine.high %v936_v42, %v944_v24  ;;  %v978_v31 = vcombine.high %v952_v41, %v960_v36 }
 0x4aa   :  { %v3374_v38 = vpop.eup %2898 }
 0x4ab   :  { %v969_v49 = vrot.slane %v961_v27, %v3147_v0  ;;  %v985_v25 = vrot.slane %v977_v28, %v3147_v0  ;;  %v976_v32 = vrot.slane %v962_v30, %v3147_v0  ;;  %v992_v33 = vrot.slane %v978_v31, %v3147_v0  ;;  %v3386_v57 = vpop.eup %2900 }
 0x4ac   :  { %v1534_v58 = vsel %vm1078_vm2, %v3374_v38, 0.0  ;;  %v1531_v63 = vsel %vm1078_vm2, %v3386_v57, 0.0 }
 0x4ad   :  { %v993_v34 = vcombine.low %v969_v49, %v985_v25  ;;  %v994_v35 = vcombine.high %v969_v49, %v985_v25  ;;  %v995_v43 = vcombine.low %v976_v32, %v992_v33  ;;  %v996_v29 = vcombine.high %v976_v32, %v992_v33 }
 0x4af   :  { %v1065_v40 = vpack.c.bf16 %v993_v34, %v993_v34  ;;  %v1066_v50 = vpack.c.bf16 %v994_v35, %v994_v35  ;;  %v1067_v1 = vpack.c.bf16 %v995_v43, %v995_v43  ;;  %v1068_v46 = vpack.c.bf16 %v996_v29, %v996_v29 }
 0x4b1   :  { %v1582_v52 = vsel %vm1580_vm4, %v1065_v40, 0  ;;  %v1628_v54 = vsel %vm1580_vm4, %v1066_v50, 0  ;;  %v1674_v62 = vsel %vm1580_vm4, %v1067_v1, 0  ;;  %v1720_v16 = vsel %vm1580_vm4, %v1068_v46, 0 }
 0x4b2   :  { %2755 = vmatpush3.bf16.msra.mxu1 %v1582_v52  ;;  %2761 = vmatpush3.bf16.msra.mxu0 %v1628_v54 }
 0x4b3   :  { %2766 = vmatprep.subr.bf16.mxu1 %v2972_v15  ;;  %2772 = vmatprep.subr.bf16.mxu0 %v2972_v15 }
 0x4b4   :  { %1535 = vadd.xlane.f32.xlu1 %v1534_v58 }
 0x4bf   :  { %771 = vrot.lane.b32.xlu0 %v3102_v39, %s2980_s27 }
 0x4de   :  { %1532 = vadd.xlane.f32.xlu0 %v1531_v63 }
 0x4f0   :  { %v1515_v3 = vpop.xlane.xlu0 %1514 }
 0x4f1   :  { %2902 = vrcp.f32 %v1515_v3 }
 0x4f4   :  { %v1521_v4 = vpop.xlane.xlu0 %1520 }
 0x4f5   :  { %2904 = vrcp.f32 %v1521_v4 }
 0x4f8   :  { %v1518_v5 = vpop.xlane.xlu1 %1517 }
 0x4f9   :  { %v1527_v6 = vpop.xlane.xlu0 %1526  ;;  %2906 = vrcp.f32 %v1518_v5 }
 0x4fa   :  { %2908 = vrcp.f32 %v1527_v6 }
 0x4fe   :  { %v2903_v39 = vpop.eup %2902 }
 0x4ff   :  { %v1553_v9 = vmul.f32 %v2903_v39, %v3326_v37 }
 0x500   :  { %v1524_v60 = vpop.xlane.xlu1 %1523 }
 0x501   :  { %2910 = vrcp.f32 %v1524_v60  ;;  %1561 = vst.msk [vmem:[#allocation4] sm:$0xff] %vm1078_vm2, %v1553_v9  ;;  %v1569_v45 = vpack.c.bf16 %v1553_v9, %v1553_v9 }
 0x502   :  { %v2905_v61 = vpop.eup %2904 }
 0x503   :  { %2757 = vmatmul.mubr.msk.bf16.vlgmr.msra.gmra.mxu1 %vm1078_vm2, %v1569_v45  ;;  %v1555_v10 = vmul.f32 %v2905_v61, %v3330_v51 }
 0x504   :  { %2767 = vmatpush3.bf16.msra.mxu1 %v1674_v62  ;;  %2768 = vmatprep.mubr.msk.bf16.mxu1 %vm2973_vm1, %v2972_v15  ;;  %v776_v7 = vpop.permute.xlu1 %775 }
 0x505   :  { %1563 = vst.msk [vmem:[#allocation4 + $0x10] sm:$0xff] %vm1078_vm2, %v1555_v10  ;;  %2778 = vmatprep.subr.bf16.mxu1 %v2972_v15  ;;  %v1571_v51 = vpack.c.bf16 %v1555_v10, %v1555_v10 }
 0x506   :  { %v2907_v37 = vpop.eup %2906 }
 0x507   :  { %v2909_v44 = vpop.eup %2908  ;;  %v1554_v2 = vmul.f32 %v2907_v37, %v3334_v47 }
 0x508   :  { %v3401_v11 = vmul.f32 %v2909_v44, %v3336_v48  ;;  %v780_v8 = vpop.permute.xlu1 %779 }
 0x509   :  { %1562 = vst.msk [vmem:[#allocation4 + $0x8] sm:$0xff] %vm1078_vm2, %v1554_v2  ;;  %v1570_v12 = vpack.c.bf16 %v1554_v2, %v1554_v2 }
 0x50a   :  { %1565 = vst.msk [vmem:[#allocation4 + $0x20] sm:$0xff] %vm1078_vm2, %v3401_v11 }
 0x50b   :  { %2763 = vmatmul.mubr.msk.bf16.vlgmr.msra.gmra.mxu0 %vm1078_vm2, %v1570_v12  ;;  %2769 = vmatmul.mubr.msk.bf16.vlgmr.msra.gmra.mxu1 %vm1078_vm2, %v1571_v51  ;;  %v1573_v12 = vpack.c.bf16 %v3401_v11, %v3401_v11 }
 0x50c   :  { %2773 = vmatpush3.bf16.msra.mxu0 %v1720_v16  ;;  %2774 = vmatprep.mubr.msk.bf16.mxu0 %vm2973_vm1, %v2972_v15  ;;  %v784_v18 = vpop.permute.xlu1 %783 }
 0x50d   :  { %2784 = vmatprep.subr.bf16.mxu0 %v2972_v15  ;;  %2780 = vmatprep.mubr.msk.bf16.mxu1 %vm2973_vm1, %v2972_v15  ;;  %v877_v13 = vcombine.low %v776_v7, %v784_v18  ;;  %v878_v14 = vcombine.high %v776_v7, %v784_v18 }
 0x50e   :  { %v2911_v47 = vpop.eup %2910 }
 0x50f   :  { %v1556_v48 = vmul.f32 %v2911_v47, %v3342_v53  ;;  %v885_v53 = vrot.slane %v877_v13, %v3136_v56  ;;  %v892_v42 = vrot.slane %v878_v14, %v3136_v56 }
 0x511   :  { %1564 = vst.msk [vmem:[#allocation4 + $0x18] sm:$0xff] %vm1078_vm2, %v1556_v48  ;;  %v1572_v17 = vpack.c.bf16 %v1556_v48, %v1556_v48 }
 0x513   :  { %2775 = vmatmul.mubr.msk.bf16.vlgmr.msra.gmra.mxu0 %vm1078_vm2, %v1572_v17 }
 0x514   :  { %2786 = vmatprep.mubr.msk.bf16.mxu0 %vm2973_vm1, %v2972_v15 }
 0x532   :  { %v1530_v19 = vpop.xlane.xlu0 %1529 }
 0x533   :  { %2912 = vrcp.f32 %v1530_v19 }
 0x536   :  { %v772_v20 = vpop.permute.xlu0 %771 }
 0x537   :  { %v861_v21 = vcombine.low %v772_v20, %v780_v8  ;;  %v862_v22 = vcombine.high %v772_v20, %v780_v8 }
 0x539   :  { %v869_v24 = vrot.slane %v861_v21, %v3136_v56  ;;  %v876_v41 = vrot.slane %v862_v22, %v3136_v56 }
 0x53b   :  { %v893_v36 = vcombine.low %v869_v24, %v885_v53  ;;  %v894_v26 = vcombine.high %v869_v24, %v885_v53  ;;  %v909_v27 = vcombine.low %v876_v41, %v892_v42  ;;  %v910_v28 = vcombine.high %v876_v41, %v892_v42 }
 0x53d   :  { %v901_v30 = vrot.slane %v893_v36, %v3147_v0  ;;  %v908_v31 = vrot.slane %v894_v26, %v3147_v0  ;;  %v917_v49 = vrot.slane %v909_v27, %v3147_v0  ;;  %v924_v25 = vrot.slane %v910_v28, %v3147_v0  ;;  %v1536_v32 = vpop.xlane.xlu1 %1535 }
 0x53e   :  { %2914 = vrcp.f32 %v1536_v32 }
 0x53f   :  { %v997_v33 = vcombine.low %v901_v30, %v908_v31  ;;  %v2607_v34 = vcombine.high %v901_v30, %v908_v31  ;;  %v1013_v35 = vcombine.low %v917_v49, %v924_v25  ;;  %v2608_v43 = vcombine.high %v917_v49, %v924_v25 }
 0x540   :  { %v2913_v29 = vpop.eup %2912 }
 0x541   :  { %v1004_v40 = vrot.slane %v997_v33, %v3136_v56  ;;  %v1012_v50 = vrot.slane %v2607_v34, %v3136_v56  ;;  %v1020_v52 = vrot.slane %v1013_v35, %v3136_v56  ;;  %v1028_v54 = vrot.slane %v2608_v43, %v3136_v56 }
 0x542   :  { %v1558_v58 = vmul.f32 %v2913_v29, %v3362_v23 }
 0x543   :  { %v1029_v59 = vcombine.low %v1004_v40, %v1012_v50  ;;  %v1045_v55 = vcombine.low %v1020_v52, %v1028_v54  ;;  %v1030_v63 = vcombine.high %v1004_v40, %v1012_v50  ;;  %v1046_v3 = vcombine.high %v1020_v52, %v1028_v54 }
 0x544   :  { %1566 = vst.msk [vmem:[#allocation4 + $0x28] sm:$0xff] %vm1078_vm2, %v1558_v58  ;;  %v1574_v51 = vpack.c.bf16 %v1558_v58, %v1558_v58 }
 0x545   :  { %v1037_v4 = vrot.slane %v1029_v59, %v3147_v0  ;;  %v1053_v5 = vrot.slane %v1045_v55, %v3147_v0  ;;  %v1044_v6 = vrot.slane %v1030_v63, %v3147_v0  ;;  %v1060_v39 = vrot.slane %v1046_v3, %v3147_v0 }
 0x547   :  { %v1061_v9 = vcombine.low %v1037_v4, %v1053_v5  ;;  %v1062_v1 = vcombine.high %v1037_v4, %v1053_v5  ;;  %v1063_v60 = vcombine.low %v1044_v6, %v1060_v39  ;;  %v1064_v45 = vcombine.high %v1044_v6, %v1060_v39 }
 0x549   :  { %v1069_v61 = vpack.c.bf16 %v1061_v9, %v1061_v9  ;;  %v1070_v23 = vpack.c.bf16 %v1062_v1, %v1062_v1  ;;  %v1071_v44 = vpack.c.bf16 %v1063_v60, %v1063_v60  ;;  %v1072_v2 = vpack.c.bf16 %v1064_v45, %v1064_v45 }
 0x54b   :  { %v2915_v62 = vpop.eup %2914  ;;  %v1766_v10 = vsel %vm1580_vm4, %v1069_v61, 0  ;;  %v1812_v37 = vsel %vm1580_vm4, %v1070_v23, 0  ;;  %v1858_v16 = vsel %vm1580_vm4, %v1071_v44, 0  ;;  %v1904_v47 = vsel %vm1580_vm4, %v1072_v2, 0 }
 0x54c   :  { %2779 = vmatpush3.bf16.msra.mxu1 %v1766_v10  ;;  %2785 = vmatpush3.bf16.msra.mxu0 %v1812_v37  ;;  %v1560_v46 = vmul.f32 %v2915_v62, %v3374_v38 }
 0x54d   :  { %2790 = vmatprep.subr.bf16.mxu1 %v2972_v15  ;;  %2796 = vmatprep.subr.bf16.mxu0 %v2972_v15 }
 0x54e   :  { %1568 = vst.msk [vmem:[#allocation4 + $0x38] sm:$0xff] %vm1078_vm2, %v1560_v46  ;;  %v1576_v38 = vpack.c.bf16 %v1560_v46, %v1560_v46 }
 0x54f   :  { %2781 = vmatmul.mubr.msk.bf16.vlgmr.msra.gmra.mxu1 %vm1078_vm2, %v1573_v12  ;;  %2787 = vmatmul.mubr.msk.bf16.vlgmr.msra.gmra.mxu0 %vm1078_vm2, %v1574_v51 }
 0x550   :  { %2791 = vmatpush3.bf16.msra.mxu1 %v1858_v16  ;;  %2797 = vmatpush3.bf16.msra.mxu0 %v1904_v47 }
 0x551   :  { %2798 = vmatprep.mubr.msk.bf16.mxu0 %vm2973_vm1, %v2972_v15  ;;  %2792 = vmatprep.mubr.msk.bf16.mxu1 %vm2973_vm1, %v2972_v15 }
 0x552   :  { %2802 = vmatprep.subr.bf16.mxu1 %v2972_v15  ;;  %2810 = vmatprep.subr.bf16.mxu0 %v2972_v15 }
 0x557   :  { %2799 = vmatmul.mubr.msk.bf16.vlgmr.msra.gmra.mxu0 %vm1078_vm2, %v1576_v38 }
 0x558   :  { %2814 = vmatprep.mubr.msk.bf16.mxu0 %vm2973_vm1, %v2972_v15 }
 0x567   :  { %v1533_v11 = vpop.xlane.xlu0 %1532 }
 0x568   :  { %2916 = vrcp.f32 %v1533_v11 }
 0x575   :  { %v2917_v48 = vpop.eup %2916 }
 0x576   :  { %v1559_v17 = vmul.f32 %v2917_v48, %v3386_v57 }
 0x578   :  { %1567 = vst.msk [vmem:[#allocation4 + $0x30] sm:$0xff] %vm1078_vm2, %v1559_v17  ;;  %v1575_v7 = vpack.c.bf16 %v1559_v17, %v1559_v17 }
 0x57a   :  { %2793 = vmatmul.mubr.msk.bf16.vlgmr.msra.gmra.mxu1 %vm1078_vm2, %v1575_v7 }
 0x57b   :  { %2806 = vmatprep.mubr.msk.bf16.mxu1 %vm2973_vm1, %v2972_v15 }
 0x5c3   :  { %v1618_v8 = vpop.f32.mrf.mxu1 }
 0x5c5   :  { %v2758_v18 = vpop.f32.mrf.mxu1 }
 0x5c7   :  { %v1621_v19 = vpop.f32.mrf.mxu1 }
 0x5c9   :  { %v2759_v13 = vpop.f32.mrf.mxu1 }
 0x5cb   :  { %v1664_v14 = vpop.f32.mrf.mxu0  ;;  %v1710_v20 = vpop.f32.mrf.mxu1 }
 0x5cc   :  { %v1946_v21 = vcombine.low %v1618_v8, %v1710_v20  ;;  %v1947_v22 = vcombine.high %v1618_v8, %v1710_v20 }
 0x5cd   :  { %v2764_v53 = vpop.f32.mrf.mxu0  ;;  %v2770_v42 = vpop.f32.mrf.mxu1 }
 0x5ce   :  { %v1954_v31 = vrot.slane %v1946_v21, %v3136_v56  ;;  %v1961_v49 = vrot.slane %v1947_v22, %v3136_v56 }
 0x5cf   :  { %v1667_v24 = vpop.f32.mrf.mxu0  ;;  %v1713_v57 = vpop.f32.mrf.mxu1 }
 0x5d1   :  { %v2765_v41 = vpop.f32.mrf.mxu0  ;;  %v2771_v36 = vpop.f32.mrf.mxu1 }
 0x5d3   :  { %v1756_v26 = vpop.f32.mrf.mxu0 }
 0x5d4   :  { %v1962_v27 = vcombine.low %v1664_v14, %v1756_v26  ;;  %v1963_v28 = vcombine.high %v1664_v14, %v1756_v26 }
 0x5d5   :  { %v2776_v30 = vpop.f32.mrf.mxu0 }
 0x5d6   :  { %v1970_v25 = vrot.slane %v1962_v27, %v3136_v56  ;;  %v1977_v32 = vrot.slane %v1963_v28, %v3136_v56 }
 0x5d7   :  { %v1759_v33 = vpop.f32.mrf.mxu0 }
 0x5d8   :  { %v1978_v34 = vcombine.low %v1954_v31, %v1970_v25  ;;  %v1979_v35 = vcombine.high %v1954_v31, %v1970_v25  ;;  %v1994_v43 = vcombine.low %v1961_v49, %v1977_v32  ;;  %v1995_v29 = vcombine.high %v1961_v49, %v1977_v32 }
 0x5d9   :  { %v2777_v40 = vpop.f32.mrf.mxu0 }
 0x5da   :  { %v1986_v50 = vrot.slane %v1978_v34, %v3147_v0  ;;  %v1993_v52 = vrot.slane %v1979_v35, %v3147_v0  ;;  %v2002_v54 = vrot.slane %v1994_v43, %v3147_v0  ;;  %v2009_v58 = vrot.slane %v1995_v29, %v3147_v0  ;;  %v2870_v40 = vld [vmem:[%s3618_s3 + $0x8] sm:$0xff]  }
 0x5db   :  { %2803 = vmatpush3.bf16.msra.mxu1 %v2870_v40 }
 0x5dc   :  { %v2082_v59 = vcombine.low %v1986_v50, %v1993_v52  ;;  %v2625_v55 = vcombine.high %v1986_v50, %v1993_v52  ;;  %v2098_v63 = vcombine.low %v2002_v54, %v2009_v58  ;;  %v2626_v3 = vcombine.high %v2002_v54, %v2009_v58  ;;  %2804 = vmatprep.subr.bf16.mxu1 %v2972_v15 }
 0x5de   :  { %v2089_v4 = vrot.slane %v2082_v59, %v3136_v56  ;;  %v2097_v5 = vrot.slane %v2625_v55, %v3136_v56  ;;  %v2105_v6 = vrot.slane %v2098_v63, %v3136_v56  ;;  %v2113_v39 = vrot.slane %v2626_v3, %v3136_v56 }
 0x5e0   :  { %v2115_v9 = vcombine.high %v2089_v4, %v2097_v5  ;;  %v2131_v1 = vcombine.high %v2105_v6, %v2113_v39  ;;  %v2114_v60 = vcombine.low %v2089_v4, %v2097_v5  ;;  %v2130_v45 = vcombine.low %v2105_v6, %v2113_v39  ;;  %v2871_v4 = vld [vmem:[%s3618_s3] sm:$0xff]   ;;  %s2982_s3 = smov 8  }
 0x5e1   :  { %2805 = vmatpush3.bf16.msra.mxu1 %v2871_v4 }
 0x5e2   :  { %v3476_v61 = vrot.slane %v2115_v9, %v3147_v0  ;;  %v3479_v23 = vrot.slane %v2131_v1, %v3147_v0  ;;  %v3482_v62 = vrot.slane %v2114_v60, %v3147_v0  ;;  %v3485_v10 = vrot.slane %v2130_v45, %v3147_v0  ;;  %2818 = vmatprep.subr.bf16.mxu1 %v2972_v15 }
 0x5e4   :  { %v2148_v37 = vcombine.low %v3476_v61, %v3479_v23  ;;  %v2146_v44 = vcombine.low %v3482_v62, %v3485_v10  ;;  %v2147_v2 = vcombine.high %v3482_v62, %v3485_v10  ;;  %v2149_v46 = vcombine.high %v3476_v61, %v3479_v23  ;;  %v2629_v62 = vld [vmem:[%s3619_s4] ss:$0 sm:$0xff] }
 0x60f   :  { %v1802_v12 = vpop.f32.mrf.mxu1  ;;  %v1848_v51 = vpop.f32.mrf.mxu0 }
 0x611   :  { %v2782_v16 = vpop.f32.mrf.mxu1  ;;  %v2788_v47 = vpop.f32.mrf.mxu0 }
 0x613   :  { %v1805_v38 = vpop.f32.mrf.mxu1  ;;  %v1851_v11 = vpop.f32.mrf.mxu0 }
 0x615   :  { %v2783_v48 = vpop.f32.mrf.mxu1  ;;  %v2789_v17 = vpop.f32.mrf.mxu0 }
 0x617   :  { %v1940_v7 = vpop.f32.mrf.mxu0 }
 0x618   :  { %v2030_v13 = vcombine.low %v1848_v51, %v1940_v7  ;;  %v2031_v14 = vcombine.high %v1848_v51, %v1940_v7 }
 0x619   :  { %v2800_v8 = vpop.f32.mrf.mxu0 }
 0x61a   :  { %v2038_v42 = vrot.slane %v2030_v13, %v3136_v56  ;;  %v2045_v24 = vrot.slane %v2031_v14, %v3136_v56 }
 0x61b   :  { %v1943_v18 = vpop.f32.mrf.mxu0 }
 0x61d   :  { %v2801_v19 = vpop.f32.mrf.mxu0 }
 0x63a   :  { %v1894_v20 = vpop.f32.mrf.mxu1 }
 0x63b   :  { %v2014_v21 = vcombine.low %v1802_v12, %v1894_v20  ;;  %v2015_v22 = vcombine.high %v1802_v12, %v1894_v20  ;;  %v2926_v20 = vld [vmem:[%s3615_s0] sm:$0xff] }
 0x63c   :  { %v2794_v53 = vpop.f32.mrf.mxu1 }
 0x63d   :  { %v2022_v57 = vrot.slane %v2014_v21, %v3136_v56  ;;  %v2029_v41 = vrot.slane %v2015_v22, %v3136_v56 }
 0x63e   :  { %v1897_v36 = vpop.f32.mrf.mxu1 }
 0x63f   :  { %v2046_v26 = vcombine.low %v2022_v57, %v2038_v42  ;;  %v2047_v27 = vcombine.high %v2022_v57, %v2038_v42  ;;  %v2062_v28 = vcombine.low %v2029_v41, %v2045_v24  ;;  %v2063_v30 = vcombine.high %v2029_v41, %v2045_v24  ;;  %v2927_v57 = vld [vmem:[%s3615_s0 + $0x8] sm:$0xff] }
 0x640   :  { %v2795_v31 = vpop.f32.mrf.mxu1 }
 0x641   :  { %v2054_v49 = vrot.slane %v2046_v26, %v3147_v0  ;;  %v2061_v25 = vrot.slane %v2047_v27, %v3147_v0  ;;  %v2070_v32 = vrot.slane %v2062_v28, %v3147_v0  ;;  %v2077_v33 = vrot.slane %v2063_v30, %v3147_v0 }
 0x643   :  { %v2150_v34 = vcombine.low %v2054_v49, %v2061_v25  ;;  %v2627_v35 = vcombine.high %v2054_v49, %v2061_v25  ;;  %v2166_v43 = vcombine.low %v2070_v32, %v2077_v33  ;;  %v2628_v29 = vcombine.high %v2070_v32, %v2077_v33 }
 0x645   :  { %v2157_v50 = vrot.slane %v2150_v34, %v3136_v56  ;;  %v2165_v52 = vrot.slane %v2627_v35, %v3136_v56  ;;  %v2173_v54 = vrot.slane %v2166_v43, %v3136_v56  ;;  %v2181_v58 = vrot.slane %v2628_v29, %v3136_v56  ;;  %v2872_v35 = vld [vmem:[%s3624_s9 + $0x8] sm:$0xff]   ;;  %v2873_v43 = vld [vmem:[%s3624_s9] sm:$0xff]   ;;  %v2874_v29 = vld [vmem:[%s3626_s11 + $0x38] sm:$0xff]  }
 0x646   :  { %2811 = vmatpush3.bf16.msra.mxu0 %v2872_v35 }
 0x647   :  { %v2183_v59 = vcombine.high %v2157_v50, %v2165_v52  ;;  %v2199_v55 = vcombine.high %v2173_v54, %v2181_v58  ;;  %v2182_v63 = vcombine.low %v2157_v50, %v2165_v52  ;;  %v2198_v3 = vcombine.low %v2173_v54, %v2181_v58  ;;  %2812 = vmatprep.subr.bf16.mxu0 %v2972_v15 }
 0x649   :  { %v2197_v5 = vrot.slane %v2183_v59, %v3147_v0  ;;  %v2213_v6 = vrot.slane %v2199_v55, %v3147_v0  ;;  %v2190_v39 = vrot.slane %v2182_v63, %v3147_v0  ;;  %v2206_v9 = vrot.slane %v2198_v3, %v3147_v0  ;;  %v2633_v3 = vld [vmem:[%s3622_s7] ss:$0 sm:$0xff] }
 0x64a   :  { %2813 = vmatpush3.bf16.msra.mxu0 %v2873_v43 }
 0x64b   :  { %v2216_v56 = vcombine.low %v2197_v5, %v2213_v6  ;;  %v2215_v1 = vcombine.high %v2190_v39, %v2206_v9  ;;  %v2214_v60 = vcombine.low %v2190_v39, %v2206_v9  ;;  %v2217_v51 = vcombine.high %v2197_v5, %v2213_v6  ;;  %v2634_v39 = vld [vmem:[%s3623_s8] ss:$0 sm:$0xff] }
 0x64d   :  { %v2858_v45 = vpack.i.bf16 %v2216_v56, %v2148_v37  ;;  %v2853_v12 = vpack.i.bf16 %v2215_v1, %v2147_v2  ;;  %v2863_v16 = vpack.i.bf16 %v2217_v51, %v2149_v46  ;;  %v2877_v51 = vld [vmem:[%s3626_s11 + $0x20] sm:$0xff]  }
 0x64f   :  { %2859 = vrot.lane.b32.xlu1 %v2858_v45, %s2981_s16  ;;  %2854 = vrot.lane.b32.xlu0 %v2853_v12, %s2982_s3  ;;  %v2875_v45 = vld [vmem:[%s3626_s11 + $0x30] sm:$0xff]   ;;  %v2876_v12 = vld [vmem:[%s3626_s11 + $0x28] sm:$0xff]  }
 0x653   :  { %2864 = vrot.lane.b32.xlu0 %v2863_v16, %s2983_s17  ;;  %v2878_v16 = vld [vmem:[%s3626_s11 + $0x18] sm:$0xff]  }
 0x6c1   :  { %v2860_v0 = vpop.permute.xlu1 %2859  ;;  %v2855_v47 = vpop.permute.xlu0 %2854 }
 0x6c2   :  { %v2857_v38 = vunpack.i.h.bf16 %v2855_v47  ;;  %v2856_v11 = vunpack.i.l.bf16 %v2855_v47  ;;  %v2862_v48 = vunpack.i.h.bf16 %v2860_v0  ;;  %v2861_v17 = vunpack.i.l.bf16 %v2860_v0  ;;  %v2879_v0 = vld [vmem:[%s3626_s11 + $0x10] sm:$0xff]   ;;  %v2880_v47 = vld [vmem:[%s3626_s11 + $0x8] sm:$0xff]  }
 0x6c4   :  { %v2242_v37 = vsel %vm1078_vm2, %v2146_v44, %v2856_v11  ;;  %v2243_v2 = vsel %vm1078_vm2, %v2214_v60, %v2857_v38  ;;  %v2881_v38 = vld [vmem:[%s3626_s11] sm:$0xff]  }
 0x6c5   :  { %v2865_v7 = vpop.permute.xlu0 %2864  ;;  %v2245_v46 = vsel %vm2244_vm5, %v2242_v37, %v2861_v17  ;;  %v2246_v8 = vsel %vm2244_vm5, %v2243_v2, %v2862_v48  ;;  %v2635_v11 = vld [vmem:[%s3625_s10] ss:$0 sm:$0xff]  ;;  %s2984_s10 = smov [#allocation4]  }
 0x6c6   :  { %v2867_v61 = vunpack.i.h.bf16 %v2865_v7  ;;  %v2866_v23 = vunpack.i.l.bf16 %v2865_v7  ;;  %s2576_s11 = sshll.u32 %s2984_s10, 4  ;;  %s2577_s11 = int_to_ptr.vmem [resolvable:$true] %s2576_s11 }
 0x6c7   :  { %s2928_s4 = scalar_lea.vmem %s2577_s11, 1024  ;;  %p2933_p1 = scmp.lt.s32.totalorder %s2577_s11, %s2577_s11 }
 0x6c8   :  { %v2248_v18 = vsel %vm2247_vm6, %v2245_v46, %v2866_v23  ;;  %v2249_v19 = vsel %vm2247_vm6, %v2246_v8, %v2867_v61  ;;  %p2929_p0 = scmp.ne.s32.totalorder %s2577_s11, %s2928_s4  ;;  %p2934_p2 = scmp.lt.s32.totalorder %s2928_s4, %s2928_s4 }
 0x6c9   :  { %v2250_v13 = vpack.c.bf16 %v2249_v19, %v2248_v18 }
 0x6ca   :  { %p2935_p3 = por %p2934_p2, %p2933_p1 }
 0x6cb   :  { %2807 = vmatmul.mubr.msk.bf16.vlgmr.msra.gmra.mxu1 %vm53_vm0, %v2250_v13 }
 0x6cc   :  { %2834 = vmatprep.mubr.msk.bf16.mxu1 %vm2973_vm1, %v2972_v15  ;;  %2819 = vmatpush3.bf16.msra.mxu1 %v2874_v29  ;;  %p2936_p4 = pnand %p2935_p3, %p2929_p0 }
 0x6cd   :  { %2820 = vmatprep.subr.bf16.mxu1 %v2972_v15 }
 0x6d0   :  { %2821 = vmatpush3.bf16.msra.mxu1 %v2875_v45 }
 0x6d1   :  { %2822 = vmatprep.subr.bf16.mxu1 %v2972_v15 }
 0x6d4   :  { %2823 = vmatpush3.bf16.msra.mxu1 %v2876_v12 }
 0x6d5   :  { %2824 = vmatprep.subr.bf16.mxu1 %v2972_v15 }
 0x6d8   :  { %2825 = vmatpush3.bf16.msra.mxu1 %v2877_v51 }
 0x6d9   :  { %2826 = vmatprep.subr.bf16.mxu1 %v2972_v15 }
 0x6dc   :  { %2827 = vmatpush3.bf16.msra.mxu1 %v2878_v16 }
 0x6dd   :  { %2828 = vmatprep.subr.bf16.mxu1 %v2972_v15 }
 0x6e0   :  { %2829 = vmatpush3.bf16.msra.mxu1 %v2879_v0 }
 0x6e1   :  { %2830 = vmatprep.subr.bf16.mxu1 %v2972_v15 }
 0x6e4   :  { %2831 = vmatpush3.bf16.msra.mxu1 %v2880_v47 }
 0x6e5   :  { %2832 = vmatprep.subr.bf16.mxu1 %v2972_v15 }
 0x6e8   :  { %2833 = vmatpush3.bf16.msra.mxu1 %v2881_v38 }
 0x78b   :  { %v2311_v10 = vpop.f32.mrf.mxu1 }
 0x78c   :  { %v2312_v44 = vadd.f32 %v2629_v62, %v2311_v10 }
 0x78d   :  { %v2808_v14 = vpop.f32.mrf.mxu1 }
 0x78e   :  { %v3537_v21 = vadd.f32 %v2926_v20, %v2312_v44 }
 0x78f   :  { %v2314_v22 = vpop.f32.mrf.mxu1 }
 0x790   :  { %v2315_v53 = vadd.f32 %v2629_v62, %v2314_v22  ;;  %v2322_v42 = vsel %vm53_vm0, %v3537_v21, 0.0 }
 0x791   :  { %2323 = vadd.xlane.f32.xlu1 %v2322_v42  ;;  %v2809_v24 = vpop.f32.mrf.mxu1 }
 0x792   :  { %v3544_v41 = vadd.f32 %v2927_v57, %v2315_v53 }
 0x794   :  { %v2325_v36 = vsel %vm53_vm0, %v3544_v41, 0.0 }
 0x795   :  { %2326 = vadd.xlane.f32.xlu0 %v2325_v36 }
 0x81a   :  { %v2324_v26 = vpop.xlane.xlu1 %2323 }
 0x81b   :  { %v2328_v27 = vmul.f32 0.03125, %v2324_v26 }
 0x81d   :  { %v2330_v28 = vsub.f32 %v3537_v21, %v2328_v27 }
 0x81e   :  { %v2327_v30 = vpop.xlane.xlu0 %2326 }
 0x81f   :  { %v2329_v31 = vmul.f32 0.03125, %v2327_v30  ;;  %v2332_v49 = vmul.f32 %v2330_v28, %v2330_v28 }
 0x821   :  { %v2331_v25 = vsub.f32 %v3544_v41, %v2329_v31  ;;  %v2334_v32 = vsel %vm53_vm0, %v2332_v49, 0.0 }
 0x822   :  { %2335 = vadd.xlane.f32.xlu0 %v2334_v32 }
 0x823   :  { %v2333_v33 = vmul.f32 %v2331_v25, %v2331_v25 }
 0x825   :  { %v2337_v34 = vsel %vm53_vm0, %v2333_v33, 0.0 }
 0x826   :  { %2338 = vadd.xlane.f32.xlu0 %v2337_v34 }
 0x8ab   :  { %v2336_v40 = vpop.xlane.xlu0 %2335 }
 0x8ac   :  { %v2340_v50 = vmul.f32 0.03125, %v2336_v40 }
 0x8ae   :  { %v2342_v52 = vadd.f32 1e-05, %v2340_v50 }
 0x8af   :  { %v2339_v54 = vpop.xlane.xlu0 %2338 }
 0x8b0   :  { %2918 = vrsqrt.f32 %v2342_v52  ;;  %v2341_v58 = vmul.f32 0.03125, %v2339_v54 }
 0x8b2   :  { %v2343_v59 = vadd.f32 1e-05, %v2341_v58 }
 0x8b4   :  { %2920 = vrsqrt.f32 %v2343_v59 }
 0x8bd   :  { %v2919_v55 = vpop.eup %2918 }
 0x8be   :  { %v2346_v63 = vmul.f32 %v2919_v55, %v2330_v28 }
 0x8c0   :  { %v2354_v6 = vmul.f32 %v2633_v3, %v2346_v63 }
 0x8c1   :  { %v2921_v4 = vpop.eup %2920 }
 0x8c2   :  { %v2347_v5 = vmul.f32 %v2921_v4, %v2331_v25  ;;  %v2362_v56 = vadd.f32 %v2634_v39, %v2354_v6 }
 0x8c4   :  { %v2355_v9 = vmul.f32 %v2633_v3, %v2347_v5 }
 0x8c6   :  { %v2363_v1 = vadd.f32 %v2634_v39, %v2355_v9 }
 0x8c8   :  { %v2364_v60 = vpack.c.bf16 %v2363_v1, %v2362_v56 }
 0x8ca   :  { %2815 = vmatmul.mubr.msk.bf16.vlgmr.msra.gmra.mxu0 %vm53_vm0, %v2364_v60 }
 0x98a   :  { %v2425_v48 = vpop.f32.mrf.mxu0 }
 0x98b   :  { %v2426_v17 = vadd.f32 %v2635_v11, %v2425_v48 }
 0x98c   :  { %v2816_v37 = vpop.f32.mrf.mxu0 }
 0x98d   :  { %v2434_v2 = vmul.f32 0.70710677, %v2426_v17  ;;  %v2432_v19 = vmul.f32 0.5, %v2426_v17 }
 0x98e   :  { %v2428_v7 = vpop.f32.mrf.mxu0 }
 0x98f   :  { %2922 = verf.f32 %v2434_v2  ;;  %v2429_v61 = vadd.f32 %v2635_v11, %v2428_v7 }
 0x990   :  { %v2817_v23 = vpop.f32.mrf.mxu0 }
 0x991   :  { %v2435_v46 = vmul.f32 0.70710677, %v2429_v61  ;;  %v2433_v13 = vmul.f32 0.5, %v2429_v61 }
 0x993   :  { %2924 = verf.f32 %v2435_v46 }
 0x99c   :  { %v2923_v15 = vpop.eup %2922 }
 0x99d   :  { %v2438_v8 = vadd.f32 1.0, %v2923_v15 }
 0x99f   :  { %v2440_v10 = vmul.f32 %v2438_v8, %v2432_v19 }
 0x9a0   :  { %v2925_v18 = vpop.eup %2924 }
 0x9a1   :  { %v2439_v62 = vadd.f32 1.0, %v2925_v18 }
 0x9a3   :  { %v2441_v44 = vmul.f32 %v2439_v62, %v2433_v13 }
 0x9a5   :  { %v2442_v14 = vpack.c.bf16 %v2441_v44, %v2440_v10 }
 0x9a7   :  { %2835 = vmatmul.mubr.bf16.vlgmr.msra.gmra.mxu1 %v2442_v14 }
 0x9a8   :  { %2939 = shalt.err (!%p2936_p4)
}
 0x9a9   :  { %s2985_s23 = smov 128   ;;  %v2639_v20 = vld [vmem:[%s3627_s12] ss:$0 sm:$0xff]  ;;  %s2986_s6 = smov [#allocation2]  }
 0x9aa   :  { %2582 = dma.vmem_to_hbm [thread:$0]  %s2577_s11, 1024, %s3629_s14, [#allocation5], %s2985_s23, %s2985_s23, %s2982_s3  }
 0x9ab   :  { %s2564_s26 = sshll.u32 %s2986_s6, 4  ;;  %s2565_s26 = int_to_ptr.vmem [resolvable:$true] %s2564_s26 }
 0x9ac   :  { %s2948_s14 = scalar_lea.vmem %s2565_s26, 256  ;;  %p2953_p6 = scmp.lt.s32.totalorder %s2565_s26, %s2565_s26 }
 0x9ad   :  { %p2949_p5 = scmp.ne.s32.totalorder %s2565_s26, %s2948_s14  ;;  %p2954_p7 = scmp.lt.s32.totalorder %s2948_s14, %s2948_s14 }
 0x9af   :  { %p2955_p8 = por %p2954_p7, %p2953_p6 }
 0x9b1   :  { %p2956_p9 = pnand %p2955_p8, %p2949_p5 }
 0xa67   :  { %v2548_v22 = vpop.f32.mrf.mxu1 }
 0xa68   :  { %v2549_v53 = vadd.f32 %v2639_v20, %v2548_v22 }
 0xa69   :  { %v2836_v42 = vpop.f32.mrf.mxu1 }
 0xa6a   :  { %v2555_v24 = vadd.f32 %v2549_v53, %v3537_v21 }
 0xa6b   :  { %v2551_v57 = vpop.f32.mrf.mxu1 }
 0xa6c   :  { %2557 = vst.msk [vmem:[#allocation2] sm:$0xff] %vm53_vm0, %v2555_v24  ;;  %v2552_v36 = vadd.f32 %v2639_v20, %v2551_v57 }
 0xa6d   :  { %v2837_v26 = vpop.f32.mrf.mxu1 }
 0xa6e   :  { %v2556_v27 = vadd.f32 %v2552_v36, %v3544_v41 }
 0xa70   :  { %2558 = vst.msk [vmem:[#allocation2 + $0x8] sm:$0xff] %vm53_vm0, %v2556_v27 }
 0xa71   :  { %2959 = shalt.err (!%p2956_p9)
}
 0xa72   :  { %2570 = dma.vmem_to_hbm [thread:$0]  %s2565_s26, 256, %s3628_s13, [#allocation3], %s2985_s23, %s2985_s23, %s2982_s3  }
 0xa73   :  { %2968 = dma.done.wait [#allocation3], 256  }
 0xa74   :  { %2969 = vsyncadd [#allocation3], 4294967040 }
 0xa75   :  { %2970 = dma.done.wait [#allocation5], 1024  }
 0xa76   :  { %2971 = vsyncadd [#allocation5], 4294966272 }
 0xa77   :  { %2589 = vsyncpa [#allocation3], 1 }
 0xa78   :  { %2590 = vsyncpa [#allocation5], 1 }

</bundles_post_ra>
